<compile_context>
chip_gen: v7x
topology: tpu7x:2x2x1
jax: 0.10.0
libtpu: 0.0.40
codegen_flags: <defaults>
</compile_context>

<pallas_src>
import functools

import jax
import jax.numpy as jnp
from jax.experimental import pallas as pl
from jax.experimental.pallas import tpu as pltpu

EPS = 1e-5  # nn.BatchNorm2d default eps

_CONV_PARAMS = pltpu.CompilerParams(
    dimension_semantics=("parallel", "arbitrary"),
    vmem_limit_bytes=48 * 1024 * 1024,
)
_EW_PARAMS = pltpu.CompilerParams(
    dimension_semantics=("parallel", "parallel"),
    vmem_limit_bytes=48 * 1024 * 1024,
)

_CHUNK_ROWS = 128  # max rows of the f32 matmul result live at once (<=16 vregs)


def _pick_tile_h(h, w, target_rows):
    """Largest divisor of h with tile_h * w <= target_rows (>= 1)."""
    best = 1
    for d in range(1, h + 1):
        if h % d == 0 and d * w <= target_rows:
            best = d
    return best


def _pick_chunk_h(th, w, target_rows):
    """Largest divisor of th with chunk_h * w <= target_rows (>= 1)."""
    best = 1
    for d in range(1, th + 1):
        if th % d == 0 and d * w <= target_rows:
            best = d
    return best


# ---------------------------------------------------------------------------
# Shared conv core: 3x3 conv of one row-tile from a padded VMEM image.
#   pad_ref : (H+2, W+2, Cin) bf16 padded image (persistent scratch, built at t==0)
#   col_ref : (ch*W, 9*Cin)   bf16 im2col scratch for one row chunk
#   w_ref   : (9*Cin, Cout)   bf16 weights, tap-major / channel-minor order
#   y_ref   : (th, W, Cout)   bf16 raw conv output tile
#   stats_ref: (2, Cout)      f32; row 0 = sum, row 1 = sum of squares
# ---------------------------------------------------------------------------
def _conv_core(pad_ref, col_ref, w_ref, y_ref, stats_ref, *, th, ch, width, cin, cout):
    r0 = pl.program_id(1) * th          # top padded-row of this tile
    m = ch * width
    wv = w_ref[...]                     # (9*cin, cout) bf16, hoisted out of the loop

    def body(c, carry):
        s, ss = carry
        row = pl.multiple_of(c * ch, ch)
        base = r0 + row
        # im2col for this chunk: 9 shifted slices -> lane ranges of col_ref.
        for dy in range(3):
            for dx in range(3):
                tap = dy * 3 + dx
                patch = pad_ref[pl.ds(base + dy, ch), pl.ds(dx, width), :]
                col_ref[:, tap * cin:(tap + 1) * cin] = patch.reshape(m, cin)
        # Single K = 9*cin MXU matmul for the whole chunk (f32 accumulation).
        part = jnp.dot(col_ref[...], wv, preferred_element_type=jnp.float32)
        y_ref[pl.ds(row, ch), :, :] = part.reshape(ch, width, cout).astype(y_ref.dtype)
        s = s + jnp.sum(part, axis=0, keepdims=True)
        ss = ss + jnp.sum(part * part, axis=0, keepdims=True)
        return s, ss

    zero = jnp.zeros((1, cout), jnp.float32)
    s, ss = jax.lax.fori_loop(0, th // ch, body, (zero, zero))
    stats_ref[0:1, :] = s
    stats_ref[1:2, :] = ss


# ---------------------------------------------------------------------------
# Conv #1: builds padded input = [nearest-up(x) ++ skip] in VMEM at t==0
#          (height repeat + concat + halo fused in-kernel), then conv + stats.
# ---------------------------------------------------------------------------
def _conv1_kernel(xw_ref, skip_ref, w_ref, y_ref, stats_ref, pad_ref, col_ref,
                  *, th, ch, height, width, cx, cs, cout):
    cin = cx + cs

    @pl.when(pl.program_id(1) == 0)
    def _build_padded_input():
        pad_ref[...] = jnp.zeros(pad_ref.shape, pad_ref.dtype)
        # x rows per prologue chunk (2*xc output rows); xc divides height//2.
        xc = ch // 2 if ch % 2 == 0 else ch

        def pbody(c, _):
            xr = pl.multiple_of(c * xc, xc)
            xv = xw_ref[pl.ds(xr, xc), :, :]                      # (xc, W, cx)
            # nearest height-repeat: leading-dim broadcast + merge (layout-free)
            up = jnp.broadcast_to(xv[:, None], (xc, 2, width, cx))
            up = up.reshape(2 * xc, width, cx)
            pad_ref[pl.ds(2 * xr + 1, 2 * xc), pl.ds(1, width), pl.ds(0, cx)] = up
            sk = skip_ref[pl.ds(2 * xr, 2 * xc), :, :]            # (2*xc, W, cs)
            pad_ref[pl.ds(2 * xr + 1, 2 * xc), pl.ds(1, width), pl.ds(cx, cs)] = sk
            return 0

        jax.lax.fori_loop(0, (height // 2) // xc, pbody, 0)

    _conv_core(pad_ref, col_ref, w_ref, y_ref, stats_ref,
               th=th, ch=ch, width=width, cin=cin, cout=cout)


# ---------------------------------------------------------------------------
# Conv #2: builds padded input = relu(y1*scale1 + bias1) (conv1's folded BN+ReLU)
#          in VMEM at t==0 -- a1 never touches HBM -- then conv + stats.
# ---------------------------------------------------------------------------
def _conv2_kernel(y1_ref, s1_ref, b1_ref, w_ref, y_ref, stats_ref, pad_ref, col_ref,
                  *, th, ch, height, width, cin, cout):
    @pl.when(pl.program_id(1) == 0)
    def _build_padded_input():
        pad_ref[...] = jnp.zeros(pad_ref.shape, pad_ref.dtype)
        sv = s1_ref[...]                                          # (1, cin) f32
        bv = b1_ref[...]

        def pbody(c, _):
            r = pl.multiple_of(c * ch, ch)
            a = y1_ref[pl.ds(r, ch), :, :].astype(jnp.float32) * sv + bv
            a = jnp.maximum(a, 0.0)
            pad_ref[pl.ds(r + 1, ch), pl.ds(1, width), :] = a.astype(pad_ref.dtype)
            return 0

        jax.lax.fori_loop(0, height // ch, pbody, 0)

    _conv_core(pad_ref, col_ref, w_ref, y_ref, stats_ref,
               th=th, ch=ch, width=width, cin=cin, cout=cout)


# ---------------------------------------------------------------------------
# pallas_call wrappers
# ---------------------------------------------------------------------------
def _conv1_bn_stats(xw, skip, w_flat, *, th, ch):
    n, h0, width, cx = xw.shape
    _, height, _, cs = skip.shape
    cin = cx + cs
    cout = w_flat.shape[-1]
    t_tiles = height // th
    kern = functools.partial(_conv1_kernel, th=th, ch=ch, height=height,
                             width=width, cx=cx, cs=cs, cout=cout)
    return pl.pallas_call(
        kern,
        out_shape=(jax.ShapeDtypeStruct((n, height, width, cout), jnp.bfloat16),
                   jax.ShapeDtypeStruct((n, t_tiles, 2, cout), jnp.float32)),
        grid=(n, t_tiles),
        in_specs=[
            pl.BlockSpec((None, h0, width, cx), lambda i, t: (i, 0, 0, 0)),
            pl.BlockSpec((None, height, width, cs), lambda i, t: (i, 0, 0, 0)),
            pl.BlockSpec((9 * cin, cout), lambda i, t: (0, 0)),
        ],
        out_specs=(
            pl.BlockSpec((None, th, width, cout), lambda i, t: (i, t, 0, 0)),
            pl.BlockSpec((None, None, 2, cout), lambda i, t: (i, t, 0, 0)),
        ),
        scratch_shapes=[
            pltpu.VMEM((height + 2, width + 2, cin), jnp.bfloat16),   # padded image
            pltpu.VMEM((ch * width, 9 * cin), jnp.bfloat16),          # im2col chunk
        ],
        compiler_params=_CONV_PARAMS,
    )(xw, skip, w_flat)


def _conv2_bn_stats(y1, scale1, bias1, w_flat, *, th, ch):
    n, height, width, cin = y1.shape
    cout = w_flat.shape[-1]
    t_tiles = height // th
    kern = functools.partial(_conv2_kernel, th=th, ch=ch, height=height,
                             width=width, cin=cin, cout=cout)
    return pl.pallas_call(
        kern,
        out_shape=(jax.ShapeDtypeStruct((n, height, width, cout), jnp.bfloat16),
                   jax.ShapeDtypeStruct((n, t_tiles, 2, cout), jnp.float32)),
        grid=(n, t_tiles),
        in_specs=[
            pl.BlockSpec((None, height, width, cin), lambda i, t: (i, 0, 0, 0)),
            pl.BlockSpec((1, cin), lambda i, t: (0, 0)),
            pl.BlockSpec((1, cin), lambda i, t: (0, 0)),
            pl.BlockSpec((9 * cin, cout), lambda i, t: (0, 0)),
        ],
        out_specs=(
            pl.BlockSpec((None, th, width, cout), lambda i, t: (i, t, 0, 0)),
            pl.BlockSpec((None, None, 2, cout), lambda i, t: (i, t, 0, 0)),
        ),
        scratch_shapes=[
            pltpu.VMEM((height + 2, width + 2, cin), jnp.bfloat16),
            pltpu.VMEM((ch * width, 9 * cin), jnp.bfloat16),
        ],
        compiler_params=_CONV_PARAMS,
    )(y1, scale1, bias1, w_flat)


# ---------------------------------------------------------------------------
# Final fused BN+ReLU (only needed for the last conv), on a lane-dense
# (N, H, W*C) view so stores are unmasked.
# ---------------------------------------------------------------------------
def _bn_relu_kernel(y_ref, s_ref, b_ref, o_ref):
    y = y_ref[...].astype(jnp.float32)
    o_ref[...] = jnp.maximum(y * s_ref[...] + b_ref[...], 0.0).astype(o_ref.dtype)


def _bn_relu(y, scale, bias, *, th):
    n, height, width, c = y.shape
    wc = width * c
    th3 = th if (th % 8 == 0 or th == height) else height
    t_tiles = height // th3
    yv = y.reshape(n, height, wc)
    st = jnp.tile(scale.reshape(1, c), (1, width))      # (1, W*C), channel-minor
    bt = jnp.tile(bias.reshape(1, c), (1, width))
    out = pl.pallas_call(
        _bn_relu_kernel,
        out_shape=jax.ShapeDtypeStruct((n, height, wc), jnp.float32),
        grid=(n, t_tiles),
        in_specs=[
            pl.BlockSpec((None, th3, wc), lambda i, t: (i, t, 0)),
            pl.BlockSpec((1, wc), lambda i, t: (0, 0)),
            pl.BlockSpec((1, wc), lambda i, t: (0, 0)),
        ],
        out_specs=pl.BlockSpec((None, th3, wc), lambda i, t: (i, t, 0)),
        compiler_params=_EW_PARAMS,
    )(yv, st, bt)
    return out.reshape(n, height, width, c)


# ---------------------------------------------------------------------------
# BN fold from per-tile partial sums (Chan-style combine to avoid the global
# E[x^2]-E[x]^2 cancellation).
# ---------------------------------------------------------------------------
def _fold_bn(stats, gamma, beta, tile_count, total_count):
    s = stats[:, :, 0, :]                       # (N, T, C)
    ss = stats[:, :, 1, :]
    mt = s / tile_count
    m2t = jnp.maximum(ss - tile_count * mt * mt, 0.0)
    mean = jnp.sum(s, axis=(0, 1)) / total_count
    m2 = jnp.sum(m2t, axis=(0, 1)) + tile_count * jnp.sum(jnp.square(mt - mean), axis=(0, 1))
    var = m2 / total_count
    scale = gamma.astype(jnp.float32) * jax.lax.rsqrt(var + EPS)
    bias = beta.astype(jnp.float32) - mean * scale
    return scale.reshape(1, -1), bias.reshape(1, -1)


# ---------------------------------------------------------------------------
# DecoderBlock.forward((x, skip)) -- PyTorch NCHW at the boundary
# ---------------------------------------------------------------------------
def decoder_block_forward(x_nchw, skip_nchw, params, *, target_rows=1024):
    w1, g1, b1, w2, g2, b2 = params
    n, cx, h0, w0 = x_nchw.shape
    cs = skip_nchw.shape[1]
    height, width = 2 * h0, 2 * w0
    assert skip_nchw.shape[2] == height and skip_nchw.shape[3] == width
    assert width % 8 == 0, "W must be a multiple of 8"
    cin1 = cx + cs
    cmid = w1.shape[-1]
    cout = w2.shape[-1]

    th = _pick_tile_h(height, width, target_rows)       # grid row-tile
    ch = _pick_chunk_h(th, width, _CHUNK_ROWS)          # in-kernel compute chunk

    # NCHW -> NHWC (boundary layout plumbing); cast MXU inputs to bf16.
    x = jnp.transpose(x_nchw, (0, 2, 3, 1)).astype(jnp.bfloat16)
    skip = jnp.transpose(skip_nchw, (0, 2, 3, 1)).astype(jnp.bfloat16)
    # Width-direction nearest repeat left to XLA (quarter-size tensor, fuses with
    # the transpose); height repeat + concat + pad halo fused in conv1's kernel.
    xw = jnp.repeat(x, 2, axis=2)                        # (N, h0, W, cx)

    # Weights (3,3,Cin,Cout) -> (9*Cin, Cout) bf16, tap-major / channel-minor.
    w1f = w1.reshape(9 * cin1, cmid).astype(jnp.bfloat16)
    w2f = w2.reshape(9 * cmid, cout).astype(jnp.bfloat16)

    count = n * height * width

    # Conv #1: raw conv output (bf16) + BN partial sums from the f32 accumulator.
    y1, stats1 = _conv1_bn_stats(xw, skip, w1f, th=th, ch=ch)
    scale1, bias1 = _fold_bn(stats1, g1, b1, th * width, count)

    # Conv #2: BN1+ReLU folded into the input build (no a1 HBM round trip).
    y2, stats2 = _conv2_bn_stats(y1, scale1, bias1, w2f, th=th, ch=ch)
    scale2, bias2 = _fold_bn(stats2, g2, b2, th * width, count)

    # Final BN+ReLU, then back to NCHW (attention2 = Identity).
    out = _bn_relu(y2, scale2, bias2, th=th)
    return jnp.transpose(out, (0, 3, 1, 2))


# ---------------------------------------------------------------------------
# Pure-JAX reference (same bf16 matmul inputs / f32 accumulation as the kernel)
# ---------------------------------------------------------------------------
def _ref_conv_bn_relu(a_nhwc, w_hwio, gamma, beta):
    y = jax.lax.conv_general_dilated(
        a_nhwc.astype(jnp.bfloat16), w_hwio.astype(jnp.bfloat16),
        window_strides=(1, 1), padding="SAME",
        dimension_numbers=("NHWC", "HWIO", "NHWC"),
        preferred_element_type=jnp.float32)
    mean = jnp.mean(y, axis=(0, 1, 2), keepdims=True)
    var = jnp.mean(jnp.square(y - mean), axis=(0, 1, 2), keepdims=True)
    out = (y - mean) * jax.lax.rsqrt(var + EPS)
    out = out * gamma.reshape(1, 1, 1, -1) + beta.reshape(1, 1, 1, -1)
    return jnp.maximum(out, 0.0)


def _ref_forward(x_nchw, skip_nchw, params):
    w1, g1, b1, w2, g2, b2 = params
    x = jnp.transpose(x_nchw, (0, 2, 3, 1))
    skip = jnp.transpose(skip_nchw, (0, 2, 3, 1))
    x = jnp.repeat(jnp.repeat(x, 2, axis=1), 2, axis=2)
    a0 = jnp.concatenate([x, skip], axis=-1)
    a1 = _ref_conv_bn_relu(a0, w1, g1, b1).astype(jnp.bfloat16)   # kernel keeps a1 bf16
    a2 = _ref_conv_bn_relu(a1, w2, g2, b2)
    return jnp.transpose(a2, (0, 3, 1, 2))


# ---------------------------------------------------------------------------
if __name__ == "__main__":
    # x (2, 4, 16, 16), skip (2, 4, 32, 32) in NCHW.
    # After upsample + concat: in_channels = 4 + 4 = 8; out_channels = 8.
    N, CX, H0, W0 = 2, 4, 16, 16
    CS, COUT = 4, 8
    CIN = CX + CS

    key = jax.random.PRNGKey(0)
    kx, ks, kw1, kg1, kb1, kw2, kg2, kb2 = jax.random.split(key, 8)

    x = jax.random.normal(kx, (N, CX, H0, W0), dtype=jnp.float32)
    skip = jax.random.normal(ks, (N, CS, 2 * H0, 2 * W0), dtype=jnp.float32)

    w1 = 0.1 * jax.random.normal(kw1, (3, 3, CIN, COUT), dtype=jnp.float32)
    g1 = 1.0 + 0.1 * jax.random.normal(kg1, (COUT,), dtype=jnp.float32)
    b1 = 0.1 * jax.random.normal(kb1, (COUT,), dtype=jnp.float32)
    w2 = 0.1 * jax.random.normal(kw2, (3, 3, COUT, COUT), dtype=jnp.float32)
    g2 = 1.0 + 0.1 * jax.random.normal(kg2, (COUT,), dtype=jnp.float32)
    b2 = 0.1 * jax.random.normal(kb2, (COUT,), dtype=jnp.float32)
    params = (w1, g1, b1, w2, g2, b2)

    out = jax.block_until_ready(jax.jit(decoder_block_forward)(x, skip, params))
    ref = jax.block_until_ready(_ref_forward(x, skip, params))

    assert out.shape == (N, COUT, 2 * H0, 2 * W0), out.shape
    # bf16 MXU inputs in both paths; tolerance covers accumulation-order noise
    # and the bf16 storage of the intermediate conv outputs.
    assert bool(jnp.allclose(out, ref, atol=5e-2, rtol=5e-2)), \
        float(jnp.max(jnp.abs(out - ref)))

    print("KERNEL_OK")
</pallas_src>

<mosaic_0001>
module attributes {stable_mosaic.version = 11 : i64} {
  func.func @_conv1_kernel(%arg0: i32, %arg1: i32, %arg2: memref<1x16x32x4xbf16, #tpu.memory_space<vmem>>, %arg3: memref<1x32x32x4xbf16, #tpu.memory_space<vmem>>, %arg4: memref<72x8xbf16, #tpu.memory_space<vmem>>, %arg5: memref<1x32x32x8xbf16, #tpu.memory_space<vmem>>, %arg6: memref<1x1x2x8xf32, #tpu.memory_space<vmem>>, %arg7: memref<34x34x8xbf16, #tpu.memory_space<vmem>>, %arg8: memref<128x72xbf16, #tpu.memory_space<vmem>>) attributes {dimension_semantics = [#tpu.dimension_semantics<parallel>, #tpu.dimension_semantics<arbitrary>], iteration_bounds = array<i64: 2, 1>, scalar_prefetch = 0 : i64, scratch_operands = 2 : i64, tpu.core_type = #tpu.core_type<tc>, window_params = [{transform_indices = @transform_0, window_bounds = array<i64: 1, 16, 32, 4>}, {transform_indices = @transform_1, window_bounds = array<i64: 1, 32, 32, 4>}, {pipeline_mode = #tpu.pipeline_mode<synchronous>, transform_indices = @transform_2, window_bounds = array<i64: 72, 8>}, {transform_indices = @transform_3, window_bounds = array<i64: 1, 32, 32, 8>}, {transform_indices = @transform_4, window_bounds = array<i64: 1, 1, 2, 8>}]} {
    %c0_i32 = arith.constant 0 : i32
    %0 = arith.cmpi eq, %arg1, %c0_i32 : i32
    %1 = arith.extui %0 : i1 to i32
    %c0_i32_0 = arith.constant 0 : i32
    %2 = arith.cmpi ne, %1, %c0_i32_0 : i32
    scf.if %2 {
      %cst_11 = arith.constant 0.000000e+00 : bf16
      %14 = vector.broadcast %cst_11 : bf16 to vector<34x34x8xbf16>
      %c0_12 = arith.constant 0 : index
      %c0_13 = arith.constant 0 : index
      %c0_14 = arith.constant 0 : index
      %15 = vector.load %arg7[%c0_12, %c0_13, %c0_14] : memref<34x34x8xbf16, #tpu.memory_space<vmem>>, vector<34x34x8xbf16>
      tpu.vector_store %arg7[%c0_12, %c0_13, %c0_14], %14 {strides = array<i32>} : memref<34x34x8xbf16, #tpu.memory_space<vmem>>, vector<34x34x8xbf16>,
      %c0_i32_15 = arith.constant 0 : i32
      %c8_i32_16 = arith.constant 8 : i32
      %16 = arith.addi %c0_i32_15, %c8_i32_16 : i32
      %c1_i32_17 = arith.constant 1 : i32
      scf.for %arg9 = %c0_i32_15 to %16 step %c1_i32_17  : i32 {
        %c2_i32 = arith.constant 2 : i32
        %17 = arith.muli %arg9, %c2_i32 : i32
        %18 = tpu.assume_multiple %17, 2 : i32
        %c0_19 = arith.constant 0 : index
        %19 = arith.index_cast %18 : i32 to index
        %c0_20 = arith.constant 0 : index
        %c0_21 = arith.constant 0 : index
        %20 = vector.load %arg2[%c0_19, %19, %c0_20, %c0_21] : memref<1x16x32x4xbf16, #tpu.memory_space<vmem>>, vector<1x2x32x4xbf16>
        %21 = vector.shape_cast %20 : vector<1x2x32x4xbf16> to vector<2x32x4xbf16>
        %22 = vector.shape_cast %21 : vector<2x32x4xbf16> to vector<2x1x32x4xbf16>
        %23 = vector.shape_cast %22 : vector<2x1x32x4xbf16> to vector<2x1x32x4xbf16>
        %24 = vector.broadcast %23 : vector<2x1x32x4xbf16> to vector<2x2x32x4xbf16>
        %25 = vector.shape_cast %24 : vector<2x2x32x4xbf16> to vector<4x32x4xbf16>
        %c2_i32_22 = arith.constant 2 : i32
        %26 = arith.muli %c2_i32_22, %18 : i32
        %c1_i32_23 = arith.constant 1 : i32
        %27 = arith.addi %26, %c1_i32_23 : i32
        %28 = arith.index_cast %27 : i32 to index
        %c1_24 = arith.constant 1 : index
        %c0_25 = arith.constant 0 : index
        %29 = vector.load %arg7[%28, %c1_24, %c0_25] : memref<34x34x8xbf16, #tpu.memory_space<vmem>>, vector<4x32x4xbf16>
        tpu.vector_store %arg7[%28, %c1_24, %c0_25], %25 {strides = array<i32>} : memref<34x34x8xbf16, #tpu.memory_space<vmem>>, vector<4x32x4xbf16>,
        %c2_i32_26 = arith.constant 2 : i32
        %30 = arith.muli %c2_i32_26, %18 : i32
        %c0_27 = arith.constant 0 : index
        %31 = arith.index_cast %30 : i32 to index
        %c0_28 = arith.constant 0 : index
        %c0_29 = arith.constant 0 : index
        %32 = vector.load %arg3[%c0_27, %31, %c0_28, %c0_29] : memref<1x32x32x4xbf16, #tpu.memory_space<vmem>>, vector<1x4x32x4xbf16>
        %33 = vector.shape_cast %32 : vector<1x4x32x4xbf16> to vector<4x32x4xbf16>
        %c2_i32_30 = arith.constant 2 : i32
        %34 = arith.muli %c2_i32_30, %18 : i32
        %c1_i32_31 = arith.constant 1 : i32
        %35 = arith.addi %34, %c1_i32_31 : i32
        %36 = arith.index_cast %35 : i32 to index
        %c1_32 = arith.constant 1 : index
        %c4 = arith.constant 4 : index
        %37 = vector.load %arg7[%36, %c1_32, %c4] : memref<34x34x8xbf16, #tpu.memory_space<vmem>>, vector<4x32x4xbf16>
        tpu.vector_store %arg7[%36, %c1_32, %c4], %33 {strides = array<i32>} : memref<34x34x8xbf16, #tpu.memory_space<vmem>>, vector<4x32x4xbf16>,
      }
      %c8_i32_18 = arith.constant 8 : i32
    } else {
    }
    %c32_i32 = arith.constant 32 : i32
    %3 = arith.muli %arg1, %c32_i32 : i32
    %c0 = arith.constant 0 : index
    %c0_1 = arith.constant 0 : index
    %4 = vector.load %arg4[%c0, %c0_1] : memref<72x8xbf16, #tpu.memory_space<vmem>>, vector<72x8xbf16>
    %cst = arith.constant 0.000000e+00 : f32
    %5 = vector.broadcast %cst : f32 to vector<1x8xf32>
    %c0_i32_2 = arith.constant 0 : i32
    %c8_i32 = arith.constant 8 : i32
    %6 = arith.addi %c0_i32_2, %c8_i32 : i32
    %c1_i32 = arith.constant 1 : i32
    %7:2 = scf.for %arg9 = %c0_i32_2 to %6 step %c1_i32 iter_args(%arg10 = %5, %arg11 = %5) -> (vector<1x8xf32>, vector<1x8xf32>)  : i32 {
      %c4_i32 = arith.constant 4 : i32
      %14 = arith.muli %arg9, %c4_i32 : i32
      %15 = tpu.assume_multiple %14, 4 : i32
      %16 = arith.addi %3, %15 : i32
      %c0_i32_11 = arith.constant 0 : i32
      %17 = arith.addi %16, %c0_i32_11 : i32
      %18 = arith.index_cast %17 : i32 to index
      %c0_12 = arith.constant 0 : index
      %c0_13 = arith.constant 0 : index
      %19 = vector.load %arg7[%18, %c0_12, %c0_13] : memref<34x34x8xbf16, #tpu.memory_space<vmem>>, vector<4x32x8xbf16>
      %20 = vector.shape_cast %19 : vector<4x32x8xbf16> to vector<128x8xbf16>
      %c0_14 = arith.constant 0 : index
      %c0_15 = arith.constant 0 : index
      %21 = vector.load %arg8[%c0_14, %c0_15] : memref<128x72xbf16, #tpu.memory_space<vmem>>, vector<128x8xbf16>
      tpu.vector_store %arg8[%c0_14, %c0_15], %20 {strides = array<i32>} : memref<128x72xbf16, #tpu.memory_space<vmem>>, vector<128x8xbf16>,
      %c0_i32_16 = arith.constant 0 : i32
      %22 = arith.addi %16, %c0_i32_16 : i32
      %23 = arith.index_cast %22 : i32 to index
      %c1_17 = arith.constant 1 : index
      %c0_18 = arith.constant 0 : index
      %24 = vector.load %arg7[%23, %c1_17, %c0_18] : memref<34x34x8xbf16, #tpu.memory_space<vmem>>, vector<4x32x8xbf16>
      %25 = vector.shape_cast %24 : vector<4x32x8xbf16> to vector<128x8xbf16>
      %c0_19 = arith.constant 0 : index
      %c8 = arith.constant 8 : index
      %26 = vector.load %arg8[%c0_19, %c8] : memref<128x72xbf16, #tpu.memory_space<vmem>>, vector<128x8xbf16>
      tpu.vector_store %arg8[%c0_19, %c8], %25 {strides = array<i32>} : memref<128x72xbf16, #tpu.memory_space<vmem>>, vector<128x8xbf16>,
      %c0_i32_20 = arith.constant 0 : i32
      %27 = arith.addi %16, %c0_i32_20 : i32
      %28 = arith.index_cast %27 : i32 to index
      %c2 = arith.constant 2 : index
      %c0_21 = arith.constant 0 : index
      %29 = vector.load %arg7[%28, %c2, %c0_21] : memref<34x34x8xbf16, #tpu.memory_space<vmem>>, vector<4x32x8xbf16>
      %30 = vector.shape_cast %29 : vector<4x32x8xbf16> to vector<128x8xbf16>
      %c0_22 = arith.constant 0 : index
      %c16 = arith.constant 16 : index
      %31 = vector.load %arg8[%c0_22, %c16] : memref<128x72xbf16, #tpu.memory_space<vmem>>, vector<128x8xbf16>
      tpu.vector_store %arg8[%c0_22, %c16], %30 {strides = array<i32>} : memref<128x72xbf16, #tpu.memory_space<vmem>>, vector<128x8xbf16>,
      %c1_i32_23 = arith.constant 1 : i32
      %32 = arith.addi %16, %c1_i32_23 : i32
      %33 = arith.index_cast %32 : i32 to index
      %c0_24 = arith.constant 0 : index
      %c0_25 = arith.constant 0 : index
      %34 = vector.load %arg7[%33, %c0_24, %c0_25] : memref<34x34x8xbf16, #tpu.memory_space<vmem>>, vector<4x32x8xbf16>
      %35 = vector.shape_cast %34 : vector<4x32x8xbf16> to vector<128x8xbf16>
      %c0_26 = arith.constant 0 : index
      %c24 = arith.constant 24 : index
      %36 = vector.load %arg8[%c0_26, %c24] : memref<128x72xbf16, #tpu.memory_space<vmem>>, vector<128x8xbf16>
      tpu.vector_store %arg8[%c0_26, %c24], %35 {strides = array<i32>} : memref<128x72xbf16, #tpu.memory_space<vmem>>, vector<128x8xbf16>,
      %c1_i32_27 = arith.constant 1 : i32
      %37 = arith.addi %16, %c1_i32_27 : i32
      %38 = arith.index_cast %37 : i32 to index
      %c1_28 = arith.constant 1 : index
      %c0_29 = arith.constant 0 : index
      %39 = vector.load %arg7[%38, %c1_28, %c0_29] : memref<34x34x8xbf16, #tpu.memory_space<vmem>>, vector<4x32x8xbf16>
      %40 = vector.shape_cast %39 : vector<4x32x8xbf16> to vector<128x8xbf16>
      %c0_30 = arith.constant 0 : index
      %c32 = arith.constant 32 : index
      %41 = vector.load %arg8[%c0_30, %c32] : memref<128x72xbf16, #tpu.memory_space<vmem>>, vector<128x8xbf16>
      tpu.vector_store %arg8[%c0_30, %c32], %40 {strides = array<i32>} : memref<128x72xbf16, #tpu.memory_space<vmem>>, vector<128x8xbf16>,
      %c1_i32_31 = arith.constant 1 : i32
      %42 = arith.addi %16, %c1_i32_31 : i32
      %43 = arith.index_cast %42 : i32 to index
      %c2_32 = arith.constant 2 : index
      %c0_33 = arith.constant 0 : index
      %44 = vector.load %arg7[%43, %c2_32, %c0_33] : memref<34x34x8xbf16, #tpu.memory_space<vmem>>, vector<4x32x8xbf16>
      %45 = vector.shape_cast %44 : vector<4x32x8xbf16> to vector<128x8xbf16>
      %c0_34 = arith.constant 0 : index
      %c40 = arith.constant 40 : index
      %46 = vector.load %arg8[%c0_34, %c40] : memref<128x72xbf16, #tpu.memory_space<vmem>>, vector<128x8xbf16>
      tpu.vector_store %arg8[%c0_34, %c40], %45 {strides = array<i32>} : memref<128x72xbf16, #tpu.memory_space<vmem>>, vector<128x8xbf16>,
      %c2_i32 = arith.constant 2 : i32
      %47 = arith.addi %16, %c2_i32 : i32
      %48 = arith.index_cast %47 : i32 to index
      %c0_35 = arith.constant 0 : index
      %c0_36 = arith.constant 0 : index
      %49 = vector.load %arg7[%48, %c0_35, %c0_36] : memref<34x34x8xbf16, #tpu.memory_space<vmem>>, vector<4x32x8xbf16>
      %50 = vector.shape_cast %49 : vector<4x32x8xbf16> to vector<128x8xbf16>
      %c0_37 = arith.constant 0 : index
      %c48 = arith.constant 48 : index
      %51 = vector.load %arg8[%c0_37, %c48] : memref<128x72xbf16, #tpu.memory_space<vmem>>, vector<128x8xbf16>
      tpu.vector_store %arg8[%c0_37, %c48], %50 {strides = array<i32>} : memref<128x72xbf16, #tpu.memory_space<vmem>>, vector<128x8xbf16>,
      %c2_i32_38 = arith.constant 2 : i32
      %52 = arith.addi %16, %c2_i32_38 : i32
      %53 = arith.index_cast %52 : i32 to index
      %c1_39 = arith.constant 1 : index
      %c0_40 = arith.constant 0 : index
      %54 = vector.load %arg7[%53, %c1_39, %c0_40] : memref<34x34x8xbf16, #tpu.memory_space<vmem>>, vector<4x32x8xbf16>
      %55 = vector.shape_cast %54 : vector<4x32x8xbf16> to vector<128x8xbf16>
      %c0_41 = arith.constant 0 : index
      %c56 = arith.constant 56 : index
      %56 = vector.load %arg8[%c0_41, %c56] : memref<128x72xbf16, #tpu.memory_space<vmem>>, vector<128x8xbf16>
      tpu.vector_store %arg8[%c0_41, %c56], %55 {strides = array<i32>} : memref<128x72xbf16, #tpu.memory_space<vmem>>, vector<128x8xbf16>,
      %c2_i32_42 = arith.constant 2 : i32
      %57 = arith.addi %16, %c2_i32_42 : i32
      %58 = arith.index_cast %57 : i32 to index
      %c2_43 = arith.constant 2 : index
      %c0_44 = arith.constant 0 : index
      %59 = vector.load %arg7[%58, %c2_43, %c0_44] : memref<34x34x8xbf16, #tpu.memory_space<vmem>>, vector<4x32x8xbf16>
      %60 = vector.shape_cast %59 : vector<4x32x8xbf16> to vector<128x8xbf16>
      %c0_45 = arith.constant 0 : index
      %c64 = arith.constant 64 : index
      %61 = vector.load %arg8[%c0_45, %c64] : memref<128x72xbf16, #tpu.memory_space<vmem>>, vector<128x8xbf16>
      tpu.vector_store %arg8[%c0_45, %c64], %60 {strides = array<i32>} : memref<128x72xbf16, #tpu.memory_space<vmem>>, vector<128x8xbf16>,
      %c0_46 = arith.constant 0 : index
      %c0_47 = arith.constant 0 : index
      %62 = vector.load %arg8[%c0_46, %c0_47] : memref<128x72xbf16, #tpu.memory_space<vmem>>, vector<128x72xbf16>
      %cst_48 = arith.constant dense<0.000000e+00> : vector<128x8xf32>
      %63 = tpu.matmul %62, %4, %cst_48 {dimension_numbers = #tpu.dot_dimension_numbers<[1], [0], [0], [1], [0, 0, 1, 1], [], []>} : vector<128x72xbf16>, vector<72x8xbf16>, vector<128x8xf32> -> vector<128x8xf32>
      %64 = vector.shape_cast %63 : vector<128x8xf32> to vector<4x32x8xf32>
      %65 = arith.truncf %64 : vector<4x32x8xf32> to vector<4x32x8xbf16>
      %c0_49 = arith.constant 0 : index
      %66 = arith.index_cast %15 : i32 to index
      %c0_50 = arith.constant 0 : index
      %c0_51 = arith.constant 0 : index
      %67 = vector.load %arg5[%c0_49, %66, %c0_50, %c0_51] : memref<1x32x32x8xbf16, #tpu.memory_space<vmem>>, vector<1x4x32x8xbf16>
      %68 = vector.shape_cast %67 : vector<1x4x32x8xbf16> to vector<4x32x8xbf16>
      %69 = vector.shape_cast %65 : vector<4x32x8xbf16> to vector<1x4x32x8xbf16>
      tpu.vector_store %arg5[%c0_49, %66, %c0_50, %c0_51], %69 {strides = array<i32>} : memref<1x32x32x8xbf16, #tpu.memory_space<vmem>>, vector<1x4x32x8xbf16>,
      %cst_52 = arith.constant dense<0.000000e+00> : vector<8xf32>
      %70 = vector.multi_reduction <add>, %63, %cst_52 [0] : vector<128x8xf32> to vector<8xf32>
      %71 = vector.shape_cast %70 : vector<8xf32> to vector<1x8xf32>
      %72 = arith.addf %arg10, %71 : vector<1x8xf32>
      %73 = arith.mulf %63, %63 : vector<128x8xf32>
      %cst_53 = arith.constant dense<0.000000e+00> : vector<8xf32>
      %74 = vector.multi_reduction <add>, %73, %cst_53 [0] : vector<128x8xf32> to vector<8xf32>
      %75 = vector.shape_cast %74 : vector<8xf32> to vector<1x8xf32>
      %76 = arith.addf %arg11, %75 : vector<1x8xf32>
      scf.yield %72, %76 : vector<1x8xf32>, vector<1x8xf32>
    }
    %c8_i32_3 = arith.constant 8 : i32
    %c0_4 = arith.constant 0 : index
    %c0_5 = arith.constant 0 : index
    %c0_6 = arith.constant 0 : index
    %c0_7 = arith.constant 0 : index
    %8 = vector.load %arg6[%c0_4, %c0_5, %c0_6, %c0_7] : memref<1x1x2x8xf32, #tpu.memory_space<vmem>>, vector<1x1x1x8xf32>
    %9 = vector.shape_cast %8 : vector<1x1x1x8xf32> to vector<1x8xf32>
    %10 = vector.shape_cast %7#0 : vector<1x8xf32> to vector<1x1x1x8xf32>
    tpu.vector_store %arg6[%c0_4, %c0_5, %c0_6, %c0_7], %10 {strides = array<i32>} : memref<1x1x2x8xf32, #tpu.memory_space<vmem>>, vector<1x1x1x8xf32>,
    %c0_8 = arith.constant 0 : index
    %c0_9 = arith.constant 0 : index
    %c1 = arith.constant 1 : index
    %c0_10 = arith.constant 0 : index
    %11 = vector.load %arg6[%c0_8, %c0_9, %c1, %c0_10] : memref<1x1x2x8xf32, #tpu.memory_space<vmem>>, vector<1x1x1x8xf32>
    %12 = vector.shape_cast %11 : vector<1x1x1x8xf32> to vector<1x8xf32>
    %13 = vector.shape_cast %7#1 : vector<1x8xf32> to vector<1x1x1x8xf32>
    tpu.vector_store %arg6[%c0_8, %c0_9, %c1, %c0_10], %13 {strides = array<i32>} : memref<1x1x2x8xf32, #tpu.memory_space<vmem>>, vector<1x1x1x8xf32>,
    return
  }
  func.func @transform_0(%arg0: i32, %arg1: i32) -> (i32, i32, i32, i32) {
    %c0_i32 = arith.constant 0 : i32
    %c0_i32_0 = arith.constant 0 : i32
    %c0_i32_1 = arith.constant 0 : i32
    %c0_i32_2 = arith.constant 0 : i32
    return %arg0, %c0_i32, %c0_i32_0, %c0_i32_1 : i32, i32, i32, i32
  }
  func.func @transform_1(%arg0: i32, %arg1: i32) -> (i32, i32, i32, i32) {
    %c0_i32 = arith.constant 0 : i32
    %c0_i32_0 = arith.constant 0 : i32
    %c0_i32_1 = arith.constant 0 : i32
    %c0_i32_2 = arith.constant 0 : i32
    return %arg0, %c0_i32, %c0_i32_0, %c0_i32_1 : i32, i32, i32, i32
  }
  func.func @transform_2(%arg0: i32, %arg1: i32) -> (i32, i32) {
    %c0_i32 = arith.constant 0 : i32
    %c0_i32_0 = arith.constant 0 : i32
    %c0_i32_1 = arith.constant 0 : i32
    return %c0_i32, %c0_i32_0 : i32, i32
  }
  func.func @transform_3(%arg0: i32, %arg1: i32) -> (i32, i32, i32, i32) {
    %c0_i32 = arith.constant 0 : i32
    %c0_i32_0 = arith.constant 0 : i32
    %c0_i32_1 = arith.constant 0 : i32
    return %arg0, %arg1, %c0_i32, %c0_i32_0 : i32, i32, i32, i32
  }
  func.func @transform_4(%arg0: i32, %arg1: i32) -> (i32, i32, i32, i32) {
    %c0_i32 = arith.constant 0 : i32
    %c0_i32_0 = arith.constant 0 : i32
    %c0_i32_1 = arith.constant 0 : i32
    return %arg0, %arg1, %c0_i32, %c0_i32_0 : i32, i32, i32, i32
  }
}

module attributes {stable_mosaic.version = 11 : i64} {
  func.func @_conv2_kernel(%arg0: i32, %arg1: i32, %arg2: memref<1x32x32x8xbf16, #tpu.memory_space<vmem>>, %arg3: memref<1x8xf32, #tpu.memory_space<vmem>>, %arg4: memref<1x8xf32, #tpu.memory_space<vmem>>, %arg5: memref<72x8xbf16, #tpu.memory_space<vmem>>, %arg6: memref<1x32x32x8xbf16, #tpu.memory_space<vmem>>, %arg7: memref<1x1x2x8xf32, #tpu.memory_space<vmem>>, %arg8: memref<34x34x8xbf16, #tpu.memory_space<vmem>>, %arg9: memref<128x72xbf16, #tpu.memory_space<vmem>>) attributes {dimension_semantics = [#tpu.dimension_semantics<parallel>, #tpu.dimension_semantics<arbitrary>], iteration_bounds = array<i64: 2, 1>, scalar_prefetch = 0 : i64, scratch_operands = 2 : i64, tpu.core_type = #tpu.core_type<tc>, window_params = [{transform_indices = @transform_0, window_bounds = array<i64: 1, 32, 32, 8>}, {pipeline_mode = #tpu.pipeline_mode<synchronous>, transform_indices = @transform_1, window_bounds = array<i64: 1, 8>}, {pipeline_mode = #tpu.pipeline_mode<synchronous>, transform_indices = @transform_2, window_bounds = array<i64: 1, 8>}, {pipeline_mode = #tpu.pipeline_mode<synchronous>, transform_indices = @transform_3, window_bounds = array<i64: 72, 8>}, {transform_indices = @transform_4, window_bounds = array<i64: 1, 32, 32, 8>}, {transform_indices = @transform_5, window_bounds = array<i64: 1, 1, 2, 8>}]} {
    %c0_i32 = arith.constant 0 : i32
    %0 = arith.cmpi eq, %arg1, %c0_i32 : i32
    %1 = arith.extui %0 : i1 to i32
    %c0_i32_0 = arith.constant 0 : i32
    %2 = arith.cmpi ne, %1, %c0_i32_0 : i32
    scf.if %2 {
      %cst_11 = arith.constant 0.000000e+00 : bf16
      %14 = vector.broadcast %cst_11 : bf16 to vector<34x34x8xbf16>
      %c0_12 = arith.constant 0 : index
      %c0_13 = arith.constant 0 : index
      %c0_14 = arith.constant 0 : index
      %15 = vector.load %arg8[%c0_12, %c0_13, %c0_14] : memref<34x34x8xbf16, #tpu.memory_space<vmem>>, vector<34x34x8xbf16>
      tpu.vector_store %arg8[%c0_12, %c0_13, %c0_14], %14 {strides = array<i32>} : memref<34x34x8xbf16, #tpu.memory_space<vmem>>, vector<34x34x8xbf16>,
      %c0_15 = arith.constant 0 : index
      %c0_16 = arith.constant 0 : index
      %16 = vector.load %arg3[%c0_15, %c0_16] : memref<1x8xf32, #tpu.memory_space<vmem>>, vector<1x8xf32>
      %c0_17 = arith.constant 0 : index
      %c0_18 = arith.constant 0 : index
      %17 = vector.load %arg4[%c0_17, %c0_18] : memref<1x8xf32, #tpu.memory_space<vmem>>, vector<1x8xf32>
      %c0_i32_19 = arith.constant 0 : i32
      %c8_i32_20 = arith.constant 8 : i32
      %18 = arith.addi %c0_i32_19, %c8_i32_20 : i32
      %c1_i32_21 = arith.constant 1 : i32
      scf.for %arg10 = %c0_i32_19 to %18 step %c1_i32_21  : i32 {
        %c4_i32 = arith.constant 4 : i32
        %19 = arith.muli %arg10, %c4_i32 : i32
        %20 = tpu.assume_multiple %19, 4 : i32
        %c0_23 = arith.constant 0 : index
        %21 = arith.index_cast %20 : i32 to index
        %c0_24 = arith.constant 0 : index
        %c0_25 = arith.constant 0 : index
        %22 = vector.load %arg2[%c0_23, %21, %c0_24, %c0_25] : memref<1x32x32x8xbf16, #tpu.memory_space<vmem>>, vector<1x4x32x8xbf16>
        %23 = vector.shape_cast %22 : vector<1x4x32x8xbf16> to vector<4x32x8xbf16>
        %24 = arith.extf %23 : vector<4x32x8xbf16> to vector<4x32x8xf32>
        %25 = vector.shape_cast %16 : vector<1x8xf32> to vector<1x1x8xf32>
        %26 = vector.broadcast %25 : vector<1x1x8xf32> to vector<4x32x8xf32>
        %27 = arith.mulf %24, %26 : vector<4x32x8xf32>
        %28 = vector.shape_cast %17 : vector<1x8xf32> to vector<1x1x8xf32>
        %29 = vector.broadcast %28 : vector<1x1x8xf32> to vector<4x32x8xf32>
        %30 = arith.addf %27, %29 : vector<4x32x8xf32>
        %cst_26 = arith.constant 0.000000e+00 : f32
        %31 = vector.broadcast %cst_26 : f32 to vector<4x32x8xf32>
        %32 = arith.maximumf %30, %31 : vector<4x32x8xf32>
        %33 = arith.truncf %32 : vector<4x32x8xf32> to vector<4x32x8xbf16>
        %c1_i32_27 = arith.constant 1 : i32
        %34 = arith.addi %20, %c1_i32_27 : i32
        %35 = arith.index_cast %34 : i32 to index
        %c1_28 = arith.constant 1 : index
        %c0_29 = arith.constant 0 : index
        %36 = vector.load %arg8[%35, %c1_28, %c0_29] : memref<34x34x8xbf16, #tpu.memory_space<vmem>>, vector<4x32x8xbf16>
        tpu.vector_store %arg8[%35, %c1_28, %c0_29], %33 {strides = array<i32>} : memref<34x34x8xbf16, #tpu.memory_space<vmem>>, vector<4x32x8xbf16>,
      }
      %c8_i32_22 = arith.constant 8 : i32
    } else {
    }
    %c32_i32 = arith.constant 32 : i32
    %3 = arith.muli %arg1, %c32_i32 : i32
    %c0 = arith.constant 0 : index
    %c0_1 = arith.constant 0 : index
    %4 = vector.load %arg5[%c0, %c0_1] : memref<72x8xbf16, #tpu.memory_space<vmem>>, vector<72x8xbf16>
    %cst = arith.constant 0.000000e+00 : f32
    %5 = vector.broadcast %cst : f32 to vector<1x8xf32>
    %c0_i32_2 = arith.constant 0 : i32
    %c8_i32 = arith.constant 8 : i32
    %6 = arith.addi %c0_i32_2, %c8_i32 : i32
    %c1_i32 = arith.constant 1 : i32
    %7:2 = scf.for %arg10 = %c0_i32_2 to %6 step %c1_i32 iter_args(%arg11 = %5, %arg12 = %5) -> (vector<1x8xf32>, vector<1x8xf32>)  : i32 {
      %c4_i32 = arith.constant 4 : i32
      %14 = arith.muli %arg10, %c4_i32 : i32
      %15 = tpu.assume_multiple %14, 4 : i32
      %16 = arith.addi %3, %15 : i32
      %c0_i32_11 = arith.constant 0 : i32
      %17 = arith.addi %16, %c0_i32_11 : i32
      %18 = arith.index_cast %17 : i32 to index
      %c0_12 = arith.constant 0 : index
      %c0_13 = arith.constant 0 : index
      %19 = vector.load %arg8[%18, %c0_12, %c0_13] : memref<34x34x8xbf16, #tpu.memory_space<vmem>>, vector<4x32x8xbf16>
      %20 = vector.shape_cast %19 : vector<4x32x8xbf16> to vector<128x8xbf16>
      %c0_14 = arith.constant 0 : index
      %c0_15 = arith.constant 0 : index
      %21 = vector.load %arg9[%c0_14, %c0_15] : memref<128x72xbf16, #tpu.memory_space<vmem>>, vector<128x8xbf16>
      tpu.vector_store %arg9[%c0_14, %c0_15], %20 {strides = array<i32>} : memref<128x72xbf16, #tpu.memory_space<vmem>>, vector<128x8xbf16>,
      %c0_i32_16 = arith.constant 0 : i32
      %22 = arith.addi %16, %c0_i32_16 : i32
      %23 = arith.index_cast %22 : i32 to index
      %c1_17 = arith.constant 1 : index
      %c0_18 = arith.constant 0 : index
      %24 = vector.load %arg8[%23, %c1_17, %c0_18] : memref<34x34x8xbf16, #tpu.memory_space<vmem>>, vector<4x32x8xbf16>
      %25 = vector.shape_cast %24 : vector<4x32x8xbf16> to vector<128x8xbf16>
      %c0_19 = arith.constant 0 : index
      %c8 = arith.constant 8 : index
      %26 = vector.load %arg9[%c0_19, %c8] : memref<128x72xbf16, #tpu.memory_space<vmem>>, vector<128x8xbf16>
      tpu.vector_store %arg9[%c0_19, %c8], %25 {strides = array<i32>} : memref<128x72xbf16, #tpu.memory_space<vmem>>, vector<128x8xbf16>,
      %c0_i32_20 = arith.constant 0 : i32
      %27 = arith.addi %16, %c0_i32_20 : i32
      %28 = arith.index_cast %27 : i32 to index
      %c2 = arith.constant 2 : index
      %c0_21 = arith.constant 0 : index
      %29 = vector.load %arg8[%28, %c2, %c0_21] : memref<34x34x8xbf16, #tpu.memory_space<vmem>>, vector<4x32x8xbf16>
      %30 = vector.shape_cast %29 : vector<4x32x8xbf16> to vector<128x8xbf16>
      %c0_22 = arith.constant 0 : index
      %c16 = arith.constant 16 : index
      %31 = vector.load %arg9[%c0_22, %c16] : memref<128x72xbf16, #tpu.memory_space<vmem>>, vector<128x8xbf16>
      tpu.vector_store %arg9[%c0_22, %c16], %30 {strides = array<i32>} : memref<128x72xbf16, #tpu.memory_space<vmem>>, vector<128x8xbf16>,
      %c1_i32_23 = arith.constant 1 : i32
      %32 = arith.addi %16, %c1_i32_23 : i32
      %33 = arith.index_cast %32 : i32 to index
      %c0_24 = arith.constant 0 : index
      %c0_25 = arith.constant 0 : index
      %34 = vector.load %arg8[%33, %c0_24, %c0_25] : memref<34x34x8xbf16, #tpu.memory_space<vmem>>, vector<4x32x8xbf16>
      %35 = vector.shape_cast %34 : vector<4x32x8xbf16> to vector<128x8xbf16>
      %c0_26 = arith.constant 0 : index
      %c24 = arith.constant 24 : index
      %36 = vector.load %arg9[%c0_26, %c24] : memref<128x72xbf16, #tpu.memory_space<vmem>>, vector<128x8xbf16>
      tpu.vector_store %arg9[%c0_26, %c24], %35 {strides = array<i32>} : memref<128x72xbf16, #tpu.memory_space<vmem>>, vector<128x8xbf16>,
      %c1_i32_27 = arith.constant 1 : i32
      %37 = arith.addi %16, %c1_i32_27 : i32
      %38 = arith.index_cast %37 : i32 to index
      %c1_28 = arith.constant 1 : index
      %c0_29 = arith.constant 0 : index
      %39 = vector.load %arg8[%38, %c1_28, %c0_29] : memref<34x34x8xbf16, #tpu.memory_space<vmem>>, vector<4x32x8xbf16>
      %40 = vector.shape_cast %39 : vector<4x32x8xbf16> to vector<128x8xbf16>
      %c0_30 = arith.constant 0 : index
      %c32 = arith.constant 32 : index
      %41 = vector.load %arg9[%c0_30, %c32] : memref<128x72xbf16, #tpu.memory_space<vmem>>, vector<128x8xbf16>
      tpu.vector_store %arg9[%c0_30, %c32], %40 {strides = array<i32>} : memref<128x72xbf16, #tpu.memory_space<vmem>>, vector<128x8xbf16>,
      %c1_i32_31 = arith.constant 1 : i32
      %42 = arith.addi %16, %c1_i32_31 : i32
      %43 = arith.index_cast %42 : i32 to index
      %c2_32 = arith.constant 2 : index
      %c0_33 = arith.constant 0 : index
      %44 = vector.load %arg8[%43, %c2_32, %c0_33] : memref<34x34x8xbf16, #tpu.memory_space<vmem>>, vector<4x32x8xbf16>
      %45 = vector.shape_cast %44 : vector<4x32x8xbf16> to vector<128x8xbf16>
      %c0_34 = arith.constant 0 : index
      %c40 = arith.constant 40 : index
      %46 = vector.load %arg9[%c0_34, %c40] : memref<128x72xbf16, #tpu.memory_space<vmem>>, vector<128x8xbf16>
      tpu.vector_store %arg9[%c0_34, %c40], %45 {strides = array<i32>} : memref<128x72xbf16, #tpu.memory_space<vmem>>, vector<128x8xbf16>,
      %c2_i32 = arith.constant 2 : i32
      %47 = arith.addi %16, %c2_i32 : i32
      %48 = arith.index_cast %47 : i32 to index
      %c0_35 = arith.constant 0 : index
      %c0_36 = arith.constant 0 : index
      %49 = vector.load %arg8[%48, %c0_35, %c0_36] : memref<34x34x8xbf16, #tpu.memory_space<vmem>>, vector<4x32x8xbf16>
      %50 = vector.shape_cast %49 : vector<4x32x8xbf16> to vector<128x8xbf16>
      %c0_37 = arith.constant 0 : index
      %c48 = arith.constant 48 : index
      %51 = vector.load %arg9[%c0_37, %c48] : memref<128x72xbf16, #tpu.memory_space<vmem>>, vector<128x8xbf16>
      tpu.vector_store %arg9[%c0_37, %c48], %50 {strides = array<i32>} : memref<128x72xbf16, #tpu.memory_space<vmem>>, vector<128x8xbf16>,
      %c2_i32_38 = arith.constant 2 : i32
      %52 = arith.addi %16, %c2_i32_38 : i32
      %53 = arith.index_cast %52 : i32 to index
      %c1_39 = arith.constant 1 : index
      %c0_40 = arith.constant 0 : index
      %54 = vector.load %arg8[%53, %c1_39, %c0_40] : memref<34x34x8xbf16, #tpu.memory_space<vmem>>, vector<4x32x8xbf16>
      %55 = vector.shape_cast %54 : vector<4x32x8xbf16> to vector<128x8xbf16>
      %c0_41 = arith.constant 0 : index
      %c56 = arith.constant 56 : index
      %56 = vector.load %arg9[%c0_41, %c56] : memref<128x72xbf16, #tpu.memory_space<vmem>>, vector<128x8xbf16>
      tpu.vector_store %arg9[%c0_41, %c56], %55 {strides = array<i32>} : memref<128x72xbf16, #tpu.memory_space<vmem>>, vector<128x8xbf16>,
      %c2_i32_42 = arith.constant 2 : i32
      %57 = arith.addi %16, %c2_i32_42 : i32
      %58 = arith.index_cast %57 : i32 to index
      %c2_43 = arith.constant 2 : index
      %c0_44 = arith.constant 0 : index
      %59 = vector.load %arg8[%58, %c2_43, %c0_44] : memref<34x34x8xbf16, #tpu.memory_space<vmem>>, vector<4x32x8xbf16>
      %60 = vector.shape_cast %59 : vector<4x32x8xbf16> to vector<128x8xbf16>
      %c0_45 = arith.constant 0 : index
      %c64 = arith.constant 64 : index
      %61 = vector.load %arg9[%c0_45, %c64] : memref<128x72xbf16, #tpu.memory_space<vmem>>, vector<128x8xbf16>
      tpu.vector_store %arg9[%c0_45, %c64], %60 {strides = array<i32>} : memref<128x72xbf16, #tpu.memory_space<vmem>>, vector<128x8xbf16>,
      %c0_46 = arith.constant 0 : index
      %c0_47 = arith.constant 0 : index
      %62 = vector.load %arg9[%c0_46, %c0_47] : memref<128x72xbf16, #tpu.memory_space<vmem>>, vector<128x72xbf16>
      %cst_48 = arith.constant dense<0.000000e+00> : vector<128x8xf32>
      %63 = tpu.matmul %62, %4, %cst_48 {dimension_numbers = #tpu.dot_dimension_numbers<[1], [0], [0], [1], [0, 0, 1, 1], [], []>} : vector<128x72xbf16>, vector<72x8xbf16>, vector<128x8xf32> -> vector<128x8xf32>
      %64 = vector.shape_cast %63 : vector<128x8xf32> to vector<4x32x8xf32>
      %65 = arith.truncf %64 : vector<4x32x8xf32> to vector<4x32x8xbf16>
      %c0_49 = arith.constant 0 : index
      %66 = arith.index_cast %15 : i32 to index
      %c0_50 = arith.constant 0 : index
      %c0_51 = arith.constant 0 : index
      %67 = vector.load %arg6[%c0_49, %66, %c0_50, %c0_51] : memref<1x32x32x8xbf16, #tpu.memory_space<vmem>>, vector<1x4x32x8xbf16>
      %68 = vector.shape_cast %67 : vector<1x4x32x8xbf16> to vector<4x32x8xbf16>
      %69 = vector.shape_cast %65 : vector<4x32x8xbf16> to vector<1x4x32x8xbf16>
      tpu.vector_store %arg6[%c0_49, %66, %c0_50, %c0_51], %69 {strides = array<i32>} : memref<1x32x32x8xbf16, #tpu.memory_space<vmem>>, vector<1x4x32x8xbf16>,
      %cst_52 = arith.constant dense<0.000000e+00> : vector<8xf32>
      %70 = vector.multi_reduction <add>, %63, %cst_52 [0] : vector<128x8xf32> to vector<8xf32>
      %71 = vector.shape_cast %70 : vector<8xf32> to vector<1x8xf32>
      %72 = arith.addf %arg11, %71 : vector<1x8xf32>
      %73 = arith.mulf %63, %63 : vector<128x8xf32>
      %cst_53 = arith.constant dense<0.000000e+00> : vector<8xf32>
      %74 = vector.multi_reduction <add>, %73, %cst_53 [0] : vector<128x8xf32> to vector<8xf32>
      %75 = vector.shape_cast %74 : vector<8xf32> to vector<1x8xf32>
      %76 = arith.addf %arg12, %75 : vector<1x8xf32>
      scf.yield %72, %76 : vector<1x8xf32>, vector<1x8xf32>
    }
    %c8_i32_3 = arith.constant 8 : i32
    %c0_4 = arith.constant 0 : index
    %c0_5 = arith.constant 0 : index
    %c0_6 = arith.constant 0 : index
    %c0_7 = arith.constant 0 : index
    %8 = vector.load %arg7[%c0_4, %c0_5, %c0_6, %c0_7] : memref<1x1x2x8xf32, #tpu.memory_space<vmem>>, vector<1x1x1x8xf32>
    %9 = vector.shape_cast %8 : vector<1x1x1x8xf32> to vector<1x8xf32>
    %10 = vector.shape_cast %7#0 : vector<1x8xf32> to vector<1x1x1x8xf32>
    tpu.vector_store %arg7[%c0_4, %c0_5, %c0_6, %c0_7], %10 {strides = array<i32>} : memref<1x1x2x8xf32, #tpu.memory_space<vmem>>, vector<1x1x1x8xf32>,
    %c0_8 = arith.constant 0 : index
    %c0_9 = arith.constant 0 : index
    %c1 = arith.constant 1 : index
    %c0_10 = arith.constant 0 : index
    %11 = vector.load %arg7[%c0_8, %c0_9, %c1, %c0_10] : memref<1x1x2x8xf32, #tpu.memory_space<vmem>>, vector<1x1x1x8xf32>
    %12 = vector.shape_cast %11 : vector<1x1x1x8xf32> to vector<1x8xf32>
    %13 = vector.shape_cast %7#1 : vector<1x8xf32> to vector<1x1x1x8xf32>
    tpu.vector_store %arg7[%c0_8, %c0_9, %c1, %c0_10], %13 {strides = array<i32>} : memref<1x1x2x8xf32, #tpu.memory_space<vmem>>, vector<1x1x1x8xf32>,
    return
  }
  func.func @transform_0(%arg0: i32, %arg1: i32) -> (i32, i32, i32, i32) {
    %c0_i32 = arith.constant 0 : i32
    %c0_i32_0 = arith.constant 0 : i32
    %c0_i32_1 = arith.constant 0 : i32
    %c0_i32_2 = arith.constant 0 : i32
    return %arg0, %c0_i32, %c0_i32_0, %c0_i32_1 : i32, i32, i32, i32
  }
  func.func @transform_1(%arg0: i32, %arg1: i32) -> (i32, i32) {
    %c0_i32 = arith.constant 0 : i32
    %c0_i32_0 = arith.constant 0 : i32
    %c0_i32_1 = arith.constant 0 : i32
    return %c0_i32, %c0_i32_0 : i32, i32
  }
  func.func @transform_2(%arg0: i32, %arg1: i32) -> (i32, i32) {
    %c0_i32 = arith.constant 0 : i32
    %c0_i32_0 = arith.constant 0 : i32
    %c0_i32_1 = arith.constant 0 : i32
    return %c0_i32, %c0_i32_0 : i32, i32
  }
  func.func @transform_3(%arg0: i32, %arg1: i32) -> (i32, i32) {
    %c0_i32 = arith.constant 0 : i32
    %c0_i32_0 = arith.constant 0 : i32
    %c0_i32_1 = arith.constant 0 : i32
    return %c0_i32, %c0_i32_0 : i32, i32
  }
  func.func @transform_4(%arg0: i32, %arg1: i32) -> (i32, i32, i32, i32) {
    %c0_i32 = arith.constant 0 : i32
    %c0_i32_0 = arith.constant 0 : i32
    %c0_i32_1 = arith.constant 0 : i32
    return %arg0, %arg1, %c0_i32, %c0_i32_0 : i32, i32, i32, i32
  }
  func.func @transform_5(%arg0: i32, %arg1: i32) -> (i32, i32, i32, i32) {
    %c0_i32 = arith.constant 0 : i32
    %c0_i32_0 = arith.constant 0 : i32
    %c0_i32_1 = arith.constant 0 : i32
    return %arg0, %arg1, %c0_i32, %c0_i32_0 : i32, i32, i32, i32
  }
}

module attributes {stable_mosaic.version = 11 : i64} {
  func.func @_bn_relu_kernel(%arg0: i32, %arg1: i32, %arg2: memref<1x32x256xbf16, #tpu.memory_space<vmem>>, %arg3: memref<1x256xf32, #tpu.memory_space<vmem>>, %arg4: memref<1x256xf32, #tpu.memory_space<vmem>>, %arg5: memref<1x32x256xf32, #tpu.memory_space<vmem>>) attributes {dimension_semantics = [#tpu.dimension_semantics<parallel>, #tpu.dimension_semantics<parallel>], iteration_bounds = array<i64: 2, 1>, scalar_prefetch = 0 : i64, scratch_operands = 0 : i64, tpu.core_type = #tpu.core_type<tc>, window_params = [{transform_indices = @transform_0, window_bounds = array<i64: 1, 32, 256>}, {pipeline_mode = #tpu.pipeline_mode<synchronous>, transform_indices = @transform_1, window_bounds = array<i64: 1, 256>}, {pipeline_mode = #tpu.pipeline_mode<synchronous>, transform_indices = @transform_2, window_bounds = array<i64: 1, 256>}, {transform_indices = @transform_3, window_bounds = array<i64: 1, 32, 256>}]} {
    %c0 = arith.constant 0 : index
    %c0_0 = arith.constant 0 : index
    %c0_1 = arith.constant 0 : index
    %0 = vector.load %arg2[%c0, %c0_0, %c0_1] : memref<1x32x256xbf16, #tpu.memory_space<vmem>>, vector<1x32x256xbf16>
    %1 = vector.shape_cast %0 : vector<1x32x256xbf16> to vector<32x256xbf16>
    %2 = arith.extf %1 : vector<32x256xbf16> to vector<32x256xf32>
    %c0_2 = arith.constant 0 : index
    %c0_3 = arith.constant 0 : index
    %3 = vector.load %arg3[%c0_2, %c0_3] : memref<1x256xf32, #tpu.memory_space<vmem>>, vector<1x256xf32>
    %4 = vector.broadcast %3 : vector<1x256xf32> to vector<32x256xf32>
    %5 = arith.mulf %2, %4 : vector<32x256xf32>
    %c0_4 = arith.constant 0 : index
    %c0_5 = arith.constant 0 : index
    %6 = vector.load %arg4[%c0_4, %c0_5] : memref<1x256xf32, #tpu.memory_space<vmem>>, vector<1x256xf32>
    %7 = vector.broadcast %6 : vector<1x256xf32> to vector<32x256xf32>
    %8 = arith.addf %5, %7 : vector<32x256xf32>
    %cst = arith.constant 0.000000e+00 : f32
    %9 = vector.broadcast %cst : f32 to vector<32x256xf32>
    %10 = arith.maximumf %8, %9 : vector<32x256xf32>
    %c0_6 = arith.constant 0 : index
    %c0_7 = arith.constant 0 : index
    %c0_8 = arith.constant 0 : index
    %11 = vector.load %arg5[%c0_6, %c0_7, %c0_8] : memref<1x32x256xf32, #tpu.memory_space<vmem>>, vector<1x32x256xf32>
    %12 = vector.shape_cast %11 : vector<1x32x256xf32> to vector<32x256xf32>
    %13 = vector.shape_cast %10 : vector<32x256xf32> to vector<1x32x256xf32>
    tpu.vector_store %arg5[%c0_6, %c0_7, %c0_8], %13 {strides = array<i32>} : memref<1x32x256xf32, #tpu.memory_space<vmem>>, vector<1x32x256xf32>,
    return
  }
  func.func @transform_0(%arg0: i32, %arg1: i32) -> (i32, i32, i32) {
    %c0_i32 = arith.constant 0 : i32
    %c0_i32_0 = arith.constant 0 : i32
    return %arg0, %arg1, %c0_i32 : i32, i32, i32
  }
  func.func @transform_1(%arg0: i32, %arg1: i32) -> (i32, i32) {
    %c0_i32 = arith.constant 0 : i32
    %c0_i32_0 = arith.constant 0 : i32
    %c0_i32_1 = arith.constant 0 : i32
    return %c0_i32, %c0_i32_0 : i32, i32
  }
  func.func @transform_2(%arg0: i32, %arg1: i32) -> (i32, i32) {
    %c0_i32 = arith.constant 0 : i32
    %c0_i32_0 = arith.constant 0 : i32
    %c0_i32_1 = arith.constant 0 : i32
    return %c0_i32, %c0_i32_0 : i32, i32
  }
  func.func @transform_3(%arg0: i32, %arg1: i32) -> (i32, i32, i32) {
    %c0_i32 = arith.constant 0 : i32
    %c0_i32_0 = arith.constant 0 : i32
    return %arg0, %arg1, %c0_i32 : i32, i32, i32
  }
}

</mosaic_0001>

<bundles_post_ra>
// kernel: decoder_block_forward.5
= control target key start
LH: loop header
LB: loop body
LE: loop exit
PB: predicated region body
PF: predicated region fallthrough
CT: control target
= control target key end

     0   :  { %s460_s12 = smov 0   ;;  %s462_s13 = smov 0   ;;  %s503_s0 = inlined_call_operand.vmem [shape: bf16[2,32,256], index: 0, kind: input, shape index: {}]   ;;  %s504_s1 = inlined_call_operand.vmem [shape: f32[1,256], index: 1, kind: input, shape index: {}]   ;;  %s505_s2 = inlined_call_operand.vmem [shape: f32[1,256], index: 2, kind: input, shape index: {}]   ;;  %s506_s3 = inlined_call_operand.vmem [shape: f32[2,32,256], index: 3, kind: output, shape index: {}]  }
   0x1   :  { %s464_s14 = smov 0  }
   0x2 LB: > { %s25_s15 = sadd.s32 1, %s434_s13  ;;  %p383_p0 = scmp.ge.s32.totalorder %s438_s14, 1  ;;  %s438_s14 = sphi %s464_s14, %s13_s14   ;;  %s434_s13 = sphi %s462_s13, %s508_s13   ;;  %s430_s12 = sphi %s460_s12, %s507_s12  }
   0x3   : > { %p27_p1 = scmp.ge.s32.totalorder %s25_s15, 2  ;;  %p159_p2 = scmp.lt.s32.totalorder %s438_s14, 3 }
   0x5   : > { %s510_s15 = smov (%p27_p1, %s25_s15), 0  ;;  %p160_p3 = pnand %p383_p0, %p159_p2 }
   0x6   : > { %p194_p4 = scmp.lt.s32.totalorder (!%p160_p3), %s430_s12, 1  ;;  %v229_v0 = vlaneseq (!%p160_p3)  ;;  %v227_v2 = vld [vmem:[%s504_s1] sm:$0x3] (!%p160_p3) }
   0x7   : > { %163 = sbr.rel (%p160_p3) target bundleno = 30 (0x1e), region = 32  ;;  %v247_v3 = vld [vmem:[%s505_s2] sm:$0x3] (!%p160_p3) }
   0x8   : > { %v230_v1 = vshrl.u32 (!%p160_p3), %v229_v0, 7 }
   0xa   : > { %v231_v4 = vsub.s32 (!%p160_p3), 0, %v230_v1  ;;  %v235_v5 = vsub.s32 (!%p160_p3), 1, %v230_v1 }
   0xc   : > { %v232_v7 = vrot.slane (!%p160_p3), %v227_v2, %v231_v4  ;;  %v252_v8 = vrot.slane (!%p160_p3), %v247_v3, %v231_v4  ;;  %v236_v9 = vrot.slane (!%p160_p3), %v227_v2, %v235_v5  ;;  %v256_v10 = vrot.slane (!%p160_p3), %v247_v3, %v235_v5 }
   0xe   : > { %s512_s12 = smov (!%p194_p4, %s430_s12), 1 }
   0xf   : > { %s390_s20 = sshll.u32 %s512_s12, 5  ;;  %s391_s24 = sshll.u32 %s512_s12, 6 }
  0x10   : > { %s202_s23 = scalar_lea.vmem %s503_s0, %s390_s20  ;;  %s213_s27 = scalar_lea.vmem %s506_s3, %s391_s24 }
  0x11   : > { %v215_v6 = vld [vmem:[%s202_s23] sm:$0xff]  ;;  %v216_v11 = vld [vmem:[%s202_s23 + $0x8] sm:$0xff]  ;;  %v217_v12 = vld [vmem:[%s202_s23 + $0x10] sm:$0xff] }
  0x12   : > { %v219_v13 = vunpack.c.l.bf16 %v215_v6  ;;  %v220_v14 = vunpack.c.h.bf16 %v215_v6  ;;  %v221_v15 = vunpack.c.l.bf16 %v216_v11  ;;  %v222_v16 = vunpack.c.h.bf16 %v216_v11  ;;  %v218_v17 = vld [vmem:[%s202_s23 + $0x18] sm:$0xff] }
  0x13   : > { %v223_v18 = vunpack.c.l.bf16 %v217_v12  ;;  %v224_v19 = vunpack.c.h.bf16 %v217_v12  ;;  %v225_v20 = vunpack.c.l.bf16 %v218_v17  ;;  %v226_v21 = vunpack.c.h.bf16 %v218_v17 }
  0x14   : > { %v239_v22 = vmul.f32 %v232_v7, %v219_v13  ;;  %v240_v23 = vmul.f32 %v236_v9, %v220_v14  ;;  %v241_v24 = vmul.f32 %v232_v7, %v221_v15  ;;  %v242_v25 = vmul.f32 %v236_v9, %v222_v16 }
  0x15   : > { %v243_v26 = vmul.f32 %v232_v7, %v223_v18  ;;  %v244_v27 = vmul.f32 %v236_v9, %v224_v19  ;;  %v245_v28 = vmul.f32 %v232_v7, %v225_v20  ;;  %v246_v29 = vmul.f32 %v236_v9, %v226_v21 }
  0x16   : > { %v259_v30 = vadd.f32 %v252_v8, %v239_v22  ;;  %v260_v31 = vadd.f32 %v256_v10, %v240_v23  ;;  %v261_v32 = vadd.f32 %v252_v8, %v241_v24  ;;  %v262_v33 = vadd.f32 %v256_v10, %v242_v25 }
  0x17   : > { %v263_v34 = vadd.f32 %v252_v8, %v243_v26  ;;  %v264_v35 = vadd.f32 %v256_v10, %v244_v27  ;;  %v265_v36 = vadd.f32 %v252_v8, %v245_v28  ;;  %v266_v37 = vadd.f32 %v256_v10, %v246_v29 }
  0x18   : > { %v267_v38 = vmax.f32 %v259_v30, 0.0  ;;  %v268_v39 = vmax.f32 %v260_v31, 0.0  ;;  %v269_v40 = vmax.f32 %v261_v32, 0.0  ;;  %v270_v41 = vmax.f32 %v262_v33, 0.0 }
  0x19   : > { %v271_v42 = vmax.f32 %v263_v34, 0.0  ;;  %v272_v43 = vmax.f32 %v264_v35, 0.0  ;;  %v273_v44 = vmax.f32 %v265_v36, 0.0  ;;  %v274_v45 = vmax.f32 %v266_v37, 0.0 }
  0x1a   : > { %275 = vst [vmem:[%s213_s27] sm:$0xff] %v267_v38  ;;  %276 = vst [vmem:[%s213_s27 + $0x8] sm:$0xff] %v268_v39 }
  0x1b   : > { %277 = vst [vmem:[%s213_s27 + $0x10] sm:$0xff] %v269_v40  ;;  %278 = vst [vmem:[%s213_s27 + $0x18] sm:$0xff] %v270_v41 }
  0x1c   : > { %279 = vst [vmem:[%s213_s27 + $0x20] sm:$0xff] %v271_v42  ;;  %280 = vst [vmem:[%s213_s27 + $0x28] sm:$0xff] %v272_v43 }
  0x1d   : > { %281 = vst [vmem:[%s213_s27 + $0x30] sm:$0xff] %v273_v44  ;;  %282 = vst [vmem:[%s213_s27 + $0x38] sm:$0xff] %v274_v45 }
  0x1e PF: > { %s13_s14 = sadd.s32 1, %s438_s14   ;;  %s507_s12 = smov %s434_s13 }
  0x1f   : > { %p10_p5 = scmp.ge.s32.totalorder %s13_s14, 4   ;;  %s508_s13 = smov %s510_s15 }
  0x21   :  { %12 = sbr.rel (!%p10_p5) target bundleno = 2 (0x2), region = 62 }

// kernel: decoder_block_forward.4
= control target key start
LH: loop header
LB: loop body
LE: loop exit
PB: predicated region body
PF: predicated region fallthrough
CT: control target
= control target key end

     0   :  { %s3419_s18 = smov 0   ;;  %s3421_s19 = smov 0   ;;  %s4643_s0 = inlined_call_operand.vmem [shape: bf16[2,32,32,8], index: 0, kind: input, shape index: {}]   ;;  %s4644_s1 = inlined_call_operand.vmem [shape: f32[1,8], index: 1, kind: input, shape index: {}]   ;;  %s4645_s2 = inlined_call_operand.vmem [shape: f32[1,8], index: 2, kind: input, shape index: {}]   ;;  %s4646_s3 = inlined_call_operand.vmem [shape: bf16[72,8], index: 3, kind: input, shape index: {}]   ;;  %s4647_s4 = inlined_call_operand.vmem [shape: bf16[2,32,32,8], index: 4, kind: output, shape index: {0}]   ;;  %s4648_s5 = inlined_call_operand.vmem [shape: f32[2,1,2,8], index: 5, kind: output, shape index: {1}]  }
   0x1   :  { %s3423_s20 = smov 0  }
   0x2 LB: > { %s28_s21 = sadd.s32 1, %s3358_s19  ;;  %p2813_p0 = scmp.ge.s32.totalorder %s3362_s20, 1  ;;  %s3362_s20 = sphi %s3423_s20, %s16_s20   ;;  %s3358_s19 = sphi %s3421_s19, %s4662_s19   ;;  %s3354_s18 = sphi %s3419_s18, %s4661_s18  }
   0x3   : > { %p30_p1 = scmp.ge.s32.totalorder %s28_s21, 2  ;;  %p206_p2 = scmp.lt.s32.totalorder %s3362_s20, 3 }
   0x5   : > { %s4664_s21 = smov (%p30_p1, %s28_s21), 0  ;;  %p207_p3 = pnand %p2813_p0, %p206_p2 }
   0x6   : > { %p246_p4 = scmp.lt.s32.totalorder (!%p207_p3), %s3354_s18, 1  ;;  %vm274_vm0 = vcmask (!%p207_p3), 60416   ;;  %v3443_v0 = vld [vmem:[%s4644_s1] ss:$0 sm:$0xff] (!%p207_p3)  ;;  %vm279_vm1 = vcmask (!%p207_p3), 57344   ;;  %v3380_v1 = vmov (!%p207_p3), 0  }
   0x7   : > { %210 = sbr.rel (%p207_p3) target bundleno = 665 (0x299), region = 36  ;;  %275 = vst.msk [vmem:[#allocation2] sm:$0xf] (!%p207_p3), %vm274_vm0, %v3380_v1  ;;  %276 = vst.msk [vmem:[#allocation2 + $0x4] sm:$0xf] (!%p207_p3), %vm274_vm0, %v3380_v1  ;;  %s3808_s12 = smov (!%p207_p3), 0  }
   0x8   : > { %277 = vst.msk [vmem:[#allocation2 + $0x8] sm:$0xf] (!%p207_p3), %vm274_vm0, %v3380_v1  ;;  %278 = vst.msk [vmem:[#allocation2 + $0xc] sm:$0xf] (!%p207_p3), %vm274_vm0, %v3380_v1  ;;  %v3720_v2 = vld [vmem:[%s4645_s2] ss:$0 sm:$0xff] (!%p207_p3) }
   0x9   : > { %281 = vst.msk [vmem:[#allocation2 + $0x14] sm:$0xf] (!%p207_p3), %vm274_vm0, %v3380_v1  ;;  %282 = vst.msk [vmem:[#allocation2 + $0x18] sm:$0xf] (!%p207_p3), %vm274_vm0, %v3380_v1 }
   0xa   : > { %283 = vst.msk [vmem:[#allocation2 + $0x1c] sm:$0xf] (!%p207_p3), %vm274_vm0, %v3380_v1  ;;  %284 = vst.msk [vmem:[#allocation2 + $0x20] sm:$0xf] (!%p207_p3), %vm274_vm0, %v3380_v1 }
   0xb   : > { %286 = vst.msk [vmem:[#allocation2 + $0x28] sm:$0xf] (!%p207_p3), %vm274_vm0, %v3380_v1  ;;  %287 = vst.msk [vmem:[#allocation2 + $0x2c] sm:$0xf] (!%p207_p3), %vm274_vm0, %v3380_v1 }
   0xc   : > { %288 = vst.msk [vmem:[#allocation2 + $0x30] sm:$0xf] (!%p207_p3), %vm274_vm0, %v3380_v1  ;;  %289 = vst.msk [vmem:[#allocation2 + $0x34] sm:$0xf] (!%p207_p3), %vm274_vm0, %v3380_v1 }
   0xd   : > { %291 = vst.msk [vmem:[#allocation2 + $0x3c] sm:$0xf] (!%p207_p3), %vm274_vm0, %v3380_v1  ;;  %292 = vst.msk [vmem:[#allocation2 + $0x40] sm:$0xf] (!%p207_p3), %vm274_vm0, %v3380_v1 }
   0xe   : > { %293 = vst.msk [vmem:[#allocation2 + $0x44] sm:$0xf] %vm274_vm0, %v3380_v1  ;;  %294 = vst.msk [vmem:[#allocation2 + $0x48] sm:$0xf] %vm274_vm0, %v3380_v1  ;;  %s4666_s18 = smov (!%p246_p4, %s3354_s18), 1 }
   0xf   : > { %296 = vst.msk [vmem:[#allocation2 + $0x50] sm:$0xf] %vm274_vm0, %v3380_v1  ;;  %297 = vst.msk [vmem:[#allocation2 + $0x54] sm:$0xf] %vm274_vm0, %v3380_v1  ;;  %s3106_s26 = sshll.u32 %s4666_s18, 9  ;;  %s2818_s27 = sshll.u32 %s4666_s18, 1 }
  0x10   : > { %298 = vst.msk [vmem:[#allocation2 + $0x58] sm:$0xf] %vm274_vm0, %v3380_v1  ;;  %299 = vst.msk [vmem:[#allocation2 + $0x5c] sm:$0xf] %vm274_vm0, %v3380_v1  ;;  %s3796_s30 = scalar_lea.vmem %s4643_s0, %s3106_s26  ;;  %s3801_s8 = scalar_lea.vmem %s4647_s4, %s3106_s26 }
  0x11   : > { %301 = vst.msk [vmem:[#allocation2 + $0x64] sm:$0xf] %vm274_vm0, %v3380_v1  ;;  %302 = vst.msk [vmem:[#allocation2 + $0x68] sm:$0xf] %vm274_vm0, %v3380_v1  ;;  %s3806_s11 = scalar_lea.vmem %s4648_s5, %s2818_s27 }
  0x12   : > { %303 = vst.msk [vmem:[#allocation2 + $0x6c] sm:$0xf] %vm274_vm0, %v3380_v1  ;;  %304 = vst.msk [vmem:[#allocation2 + $0x70] sm:$0xf] %vm274_vm0, %v3380_v1 }
  0x13   : > { %306 = vst.msk [vmem:[#allocation2 + $0x78] sm:$0xf] %vm274_vm0, %v3380_v1  ;;  %307 = vst.msk [vmem:[#allocation2 + $0x7c] sm:$0xf] %vm274_vm0, %v3380_v1 }
  0x14   : > { %308 = vst.msk [vmem:[#allocation2 + $0x80] sm:$0xf] %vm274_vm0, %v3380_v1  ;;  %309 = vst.msk [vmem:[#allocation2 + $0x84] sm:$0xf] %vm274_vm0, %v3380_v1 }
  0x15   : > { %311 = vst.msk [vmem:[#allocation2 + $0x8c] sm:$0xf] %vm274_vm0, %v3380_v1  ;;  %312 = vst.msk [vmem:[#allocation2 + $0x90] sm:$0xf] %vm274_vm0, %v3380_v1 }
  0x16   : > { %313 = vst.msk [vmem:[#allocation2 + $0x94] sm:$0xf] %vm274_vm0, %v3380_v1  ;;  %314 = vst.msk [vmem:[#allocation2 + $0x98] sm:$0xf] %vm274_vm0, %v3380_v1 }
  0x17   : > { %316 = vst.msk [vmem:[#allocation2 + $0xa0] sm:$0xf] %vm274_vm0, %v3380_v1  ;;  %317 = vst.msk [vmem:[#allocation2 + $0xa4] sm:$0xf] %vm274_vm0, %v3380_v1 }
  0x18   : > { %318 = vst.msk [vmem:[#allocation2 + $0xa8] sm:$0xf] %vm274_vm0, %v3380_v1  ;;  %319 = vst.msk [vmem:[#allocation2 + $0xac] sm:$0xf] %vm274_vm0, %v3380_v1 }
  0x19   : > { %321 = vst.msk [vmem:[#allocation2 + $0xb4] sm:$0xf] %vm274_vm0, %v3380_v1  ;;  %322 = vst.msk [vmem:[#allocation2 + $0xb8] sm:$0xf] %vm274_vm0, %v3380_v1 }
  0x1a   : > { %323 = vst.msk [vmem:[#allocation2 + $0xbc] sm:$0xf] %vm274_vm0, %v3380_v1  ;;  %324 = vst.msk [vmem:[#allocation2 + $0xc0] sm:$0xf] %vm274_vm0, %v3380_v1 }
  0x1b   : > { %326 = vst.msk [vmem:[#allocation2 + $0xc8] sm:$0xf] %vm274_vm0, %v3380_v1  ;;  %327 = vst.msk [vmem:[#allocation2 + $0xcc] sm:$0xf] %vm274_vm0, %v3380_v1 }
  0x1c   : > { %328 = vst.msk [vmem:[#allocation2 + $0xd0] sm:$0xf] %vm274_vm0, %v3380_v1  ;;  %329 = vst.msk [vmem:[#allocation2 + $0xd4] sm:$0xf] %vm274_vm0, %v3380_v1 }
  0x1d   : > { %331 = vst.msk [vmem:[#allocation2 + $0xdc] sm:$0xf] %vm274_vm0, %v3380_v1  ;;  %332 = vst.msk [vmem:[#allocation2 + $0xe0] sm:$0xf] %vm274_vm0, %v3380_v1 }
  0x1e   : > { %333 = vst.msk [vmem:[#allocation2 + $0xe4] sm:$0xf] %vm274_vm0, %v3380_v1  ;;  %334 = vst.msk [vmem:[#allocation2 + $0xe8] sm:$0xf] %vm274_vm0, %v3380_v1 }
  0x1f   : > { %336 = vst.msk [vmem:[#allocation2 + $0xf0] sm:$0xf] %vm274_vm0, %v3380_v1  ;;  %337 = vst.msk [vmem:[#allocation2 + $0xf4] sm:$0xf] %vm274_vm0, %v3380_v1 }
  0x20   : > { %338 = vst.msk [vmem:[#allocation2 + $0xf8] sm:$0xf] %vm274_vm0, %v3380_v1  ;;  %339 = vst.msk [vmem:[#allocation2 + $0xfc] sm:$0xf] %vm274_vm0, %v3380_v1 }
  0x21   : > { %341 = vst.msk [vmem:[#allocation2 + $0x104] sm:$0xf] %vm274_vm0, %v3380_v1  ;;  %342 = vst.msk [vmem:[#allocation2 + $0x108] sm:$0xf] %vm274_vm0, %v3380_v1 }
  0x22   : > { %343 = vst.msk [vmem:[#allocation2 + $0x10c] sm:$0xf] %vm274_vm0, %v3380_v1  ;;  %344 = vst.msk [vmem:[#allocation2 + $0x110] sm:$0xf] %vm274_vm0, %v3380_v1 }
  0x23   : > { %346 = vst.msk [vmem:[#allocation2 + $0x118] sm:$0xf] %vm274_vm0, %v3380_v1  ;;  %347 = vst.msk [vmem:[#allocation2 + $0x11c] sm:$0xf] %vm274_vm0, %v3380_v1 }
  0x24   : > { %348 = vst.msk [vmem:[#allocation2 + $0x120] sm:$0xf] %vm274_vm0, %v3380_v1  ;;  %349 = vst.msk [vmem:[#allocation2 + $0x124] sm:$0xf] %vm274_vm0, %v3380_v1 }
  0x25   : > { %351 = vst.msk [vmem:[#allocation2 + $0x12c] sm:$0xf] %vm274_vm0, %v3380_v1  ;;  %352 = vst.msk [vmem:[#allocation2 + $0x130] sm:$0xf] %vm274_vm0, %v3380_v1 }
  0x26   : > { %353 = vst.msk [vmem:[#allocation2 + $0x134] sm:$0xf] %vm274_vm0, %v3380_v1  ;;  %354 = vst.msk [vmem:[#allocation2 + $0x138] sm:$0xf] %vm274_vm0, %v3380_v1 }
  0x27   : > { %356 = vst.msk [vmem:[#allocation2 + $0x140] sm:$0xf] %vm274_vm0, %v3380_v1  ;;  %357 = vst.msk [vmem:[#allocation2 + $0x144] sm:$0xf] %vm274_vm0, %v3380_v1 }
  0x28   : > { %358 = vst.msk [vmem:[#allocation2 + $0x148] sm:$0xf] %vm274_vm0, %v3380_v1  ;;  %359 = vst.msk [vmem:[#allocation2 + $0x14c] sm:$0xf] %vm274_vm0, %v3380_v1 }
  0x29   : > { %361 = vst.msk [vmem:[#allocation2 + $0x154] sm:$0xf] %vm274_vm0, %v3380_v1  ;;  %362 = vst.msk [vmem:[#allocation2 + $0x158] sm:$0xf] %vm274_vm0, %v3380_v1 }
  0x2a   : > { %363 = vst.msk [vmem:[#allocation2 + $0x15c] sm:$0xf] %vm274_vm0, %v3380_v1  ;;  %364 = vst.msk [vmem:[#allocation2 + $0x160] sm:$0xf] %vm274_vm0, %v3380_v1 }
  0x2b   : > { %366 = vst.msk [vmem:[#allocation2 + $0x168] sm:$0xf] %vm274_vm0, %v3380_v1  ;;  %367 = vst.msk [vmem:[#allocation2 + $0x16c] sm:$0xf] %vm274_vm0, %v3380_v1 }
  0x2c   : > { %368 = vst.msk [vmem:[#allocation2 + $0x170] sm:$0xf] %vm274_vm0, %v3380_v1  ;;  %369 = vst.msk [vmem:[#allocation2 + $0x174] sm:$0xf] %vm274_vm0, %v3380_v1 }
  0x2d   : > { %371 = vst.msk [vmem:[#allocation2 + $0x17c] sm:$0xf] %vm274_vm0, %v3380_v1  ;;  %372 = vst.msk [vmem:[#allocation2 + $0x180] sm:$0xf] %vm274_vm0, %v3380_v1 }
  0x2e   : > { %373 = vst.msk [vmem:[#allocation2 + $0x184] sm:$0xf] %vm274_vm0, %v3380_v1  ;;  %374 = vst.msk [vmem:[#allocation2 + $0x188] sm:$0xf] %vm274_vm0, %v3380_v1 }
  0x2f   : > { %376 = vst.msk [vmem:[#allocation2 + $0x190] sm:$0xf] %vm274_vm0, %v3380_v1  ;;  %377 = vst.msk [vmem:[#allocation2 + $0x194] sm:$0xf] %vm274_vm0, %v3380_v1 }
  0x30   : > { %378 = vst.msk [vmem:[#allocation2 + $0x198] sm:$0xf] %vm274_vm0, %v3380_v1  ;;  %379 = vst.msk [vmem:[#allocation2 + $0x19c] sm:$0xf] %vm274_vm0, %v3380_v1 }
  0x31   : > { %381 = vst.msk [vmem:[#allocation2 + $0x1a4] sm:$0xf] %vm274_vm0, %v3380_v1  ;;  %382 = vst.msk [vmem:[#allocation2 + $0x1a8] sm:$0xf] %vm274_vm0, %v3380_v1 }
  0x32   : > { %383 = vst.msk [vmem:[#allocation2 + $0x1ac] sm:$0xf] %vm274_vm0, %v3380_v1  ;;  %384 = vst.msk [vmem:[#allocation2 + $0x1b0] sm:$0xf] %vm274_vm0, %v3380_v1 }
  0x33   : > { %386 = vst.msk [vmem:[#allocation2 + $0x1b8] sm:$0xf] %vm274_vm0, %v3380_v1  ;;  %387 = vst.msk [vmem:[#allocation2 + $0x1bc] sm:$0xf] %vm274_vm0, %v3380_v1 }
  0x34   : > { %388 = vst.msk [vmem:[#allocation2 + $0x1c0] sm:$0xf] %vm274_vm0, %v3380_v1  ;;  %389 = vst.msk [vmem:[#allocation2 + $0x1c4] sm:$0xf] %vm274_vm0, %v3380_v1 }
  0x35   : > { %391 = vst.msk [vmem:[#allocation2 + $0x1cc] sm:$0xf] %vm274_vm0, %v3380_v1  ;;  %392 = vst.msk [vmem:[#allocation2 + $0x1d0] sm:$0xf] %vm274_vm0, %v3380_v1 }
  0x36   : > { %393 = vst.msk [vmem:[#allocation2 + $0x1d4] sm:$0xf] %vm274_vm0, %v3380_v1  ;;  %394 = vst.msk [vmem:[#allocation2 + $0x1d8] sm:$0xf] %vm274_vm0, %v3380_v1 }
  0x37   : > { %396 = vst.msk [vmem:[#allocation2 + $0x1e0] sm:$0xf] %vm274_vm0, %v3380_v1  ;;  %397 = vst.msk [vmem:[#allocation2 + $0x1e4] sm:$0xf] %vm274_vm0, %v3380_v1 }
  0x38   : > { %398 = vst.msk [vmem:[#allocation2 + $0x1e8] sm:$0xf] %vm274_vm0, %v3380_v1  ;;  %399 = vst.msk [vmem:[#allocation2 + $0x1ec] sm:$0xf] %vm274_vm0, %v3380_v1 }
  0x39   : > { %401 = vst.msk [vmem:[#allocation2 + $0x1f4] sm:$0xf] %vm274_vm0, %v3380_v1  ;;  %402 = vst.msk [vmem:[#allocation2 + $0x1f8] sm:$0xf] %vm274_vm0, %v3380_v1 }
  0x3a   : > { %403 = vst.msk [vmem:[#allocation2 + $0x1fc] sm:$0xf] %vm274_vm0, %v3380_v1  ;;  %404 = vst.msk [vmem:[#allocation2 + $0x200] sm:$0xf] %vm274_vm0, %v3380_v1 }
  0x3b   : > { %406 = vst.msk [vmem:[#allocation2 + $0x208] sm:$0xf] %vm274_vm0, %v3380_v1  ;;  %407 = vst.msk [vmem:[#allocation2 + $0x20c] sm:$0xf] %vm274_vm0, %v3380_v1 }
  0x3c   : > { %408 = vst.msk [vmem:[#allocation2 + $0x210] sm:$0xf] %vm274_vm0, %v3380_v1  ;;  %409 = vst.msk [vmem:[#allocation2 + $0x214] sm:$0xf] %vm274_vm0, %v3380_v1 }
  0x3d   : > { %411 = vst.msk [vmem:[#allocation2 + $0x21c] sm:$0xf] %vm274_vm0, %v3380_v1  ;;  %412 = vst.msk [vmem:[#allocation2 + $0x220] sm:$0xf] %vm274_vm0, %v3380_v1 }
  0x3e   : > { %413 = vst.msk [vmem:[#allocation2 + $0x224] sm:$0xf] %vm274_vm0, %v3380_v1  ;;  %414 = vst.msk [vmem:[#allocation2 + $0x228] sm:$0xf] %vm274_vm0, %v3380_v1 }
  0x3f   : > { %416 = vst.msk [vmem:[#allocation2 + $0x230] sm:$0xf] %vm274_vm0, %v3380_v1  ;;  %417 = vst.msk [vmem:[#allocation2 + $0x234] sm:$0xf] %vm274_vm0, %v3380_v1 }
  0x40   : > { %418 = vst.msk [vmem:[#allocation2 + $0x238] sm:$0xf] %vm274_vm0, %v3380_v1  ;;  %419 = vst.msk [vmem:[#allocation2 + $0x23c] sm:$0xf] %vm274_vm0, %v3380_v1 }
  0x41   : > { %421 = vst.msk [vmem:[#allocation2 + $0x244] sm:$0xf] %vm274_vm0, %v3380_v1  ;;  %422 = vst.msk [vmem:[#allocation2 + $0x248] sm:$0xf] %vm274_vm0, %v3380_v1 }
  0x42   : > { %423 = vst.msk [vmem:[#allocation2 + $0x24c] sm:$0xf] %vm274_vm0, %v3380_v1  ;;  %424 = vst.msk [vmem:[#allocation2 + $0x250] sm:$0xf] %vm274_vm0, %v3380_v1 }
  0x43   : > { %426 = vst.msk [vmem:[#allocation2 + $0x258] sm:$0xf] %vm274_vm0, %v3380_v1  ;;  %427 = vst.msk [vmem:[#allocation2 + $0x25c] sm:$0xf] %vm274_vm0, %v3380_v1 }
  0x44   : > { %428 = vst.msk [vmem:[#allocation2 + $0x260] sm:$0xf] %vm274_vm0, %v3380_v1  ;;  %429 = vst.msk [vmem:[#allocation2 + $0x264] sm:$0xf] %vm274_vm0, %v3380_v1 }
  0x45   : > { %431 = vst.msk [vmem:[#allocation2 + $0x26c] sm:$0xf] %vm274_vm0, %v3380_v1  ;;  %432 = vst.msk [vmem:[#allocation2 + $0x270] sm:$0xf] %vm274_vm0, %v3380_v1 }
  0x46   : > { %433 = vst.msk [vmem:[#allocation2 + $0x274] sm:$0xf] %vm274_vm0, %v3380_v1  ;;  %434 = vst.msk [vmem:[#allocation2 + $0x278] sm:$0xf] %vm274_vm0, %v3380_v1 }
  0x47   : > { %436 = vst.msk [vmem:[#allocation2 + $0x280] sm:$0xf] %vm274_vm0, %v3380_v1  ;;  %437 = vst.msk [vmem:[#allocation2 + $0x284] sm:$0xf] %vm274_vm0, %v3380_v1 }
  0x48   : > { %438 = vst.msk [vmem:[#allocation2 + $0x288] sm:$0xf] %vm274_vm0, %v3380_v1  ;;  %439 = vst.msk [vmem:[#allocation2 + $0x28c] sm:$0xf] %vm274_vm0, %v3380_v1 }
  0x49   : > { %441 = vst.msk [vmem:[#allocation2 + $0x294] sm:$0xf] %vm274_vm0, %v3380_v1  ;;  %442 = vst.msk [vmem:[#allocation2 + $0x298] sm:$0xf] %vm274_vm0, %v3380_v1 }
  0x4a   : > { %443 = vst.msk [vmem:[#allocation2 + $0x29c] sm:$0xf] %vm274_vm0, %v3380_v1  ;;  %444 = vst.msk [vmem:[#allocation2 + $0x2a0] sm:$0xf] %vm274_vm0, %v3380_v1 }
  0x4b   : > { %280 = vst.msk [vmem:[#allocation2 + $0x10] sm:$0x1] %vm279_vm1, %v3380_v1  ;;  %285 = vst.msk [vmem:[#allocation2 + $0x24] sm:$0x1] %vm279_vm1, %v3380_v1 }
  0x4c   : > { %290 = vst.msk [vmem:[#allocation2 + $0x38] sm:$0x1] %vm279_vm1, %v3380_v1  ;;  %295 = vst.msk [vmem:[#allocation2 + $0x4c] sm:$0x1] %vm279_vm1, %v3380_v1 }
  0x4d   : > { %300 = vst.msk [vmem:[#allocation2 + $0x60] sm:$0x1] %vm279_vm1, %v3380_v1  ;;  %305 = vst.msk [vmem:[#allocation2 + $0x74] sm:$0x1] %vm279_vm1, %v3380_v1 }
  0x4e   : > { %310 = vst.msk [vmem:[#allocation2 + $0x88] sm:$0x1] %vm279_vm1, %v3380_v1  ;;  %315 = vst.msk [vmem:[#allocation2 + $0x9c] sm:$0x1] %vm279_vm1, %v3380_v1 }
  0x4f   : > { %320 = vst.msk [vmem:[#allocation2 + $0xb0] sm:$0x1] %vm279_vm1, %v3380_v1  ;;  %325 = vst.msk [vmem:[#allocation2 + $0xc4] sm:$0x1] %vm279_vm1, %v3380_v1 }
  0x50   : > { %330 = vst.msk [vmem:[#allocation2 + $0xd8] sm:$0x1] %vm279_vm1, %v3380_v1  ;;  %335 = vst.msk [vmem:[#allocation2 + $0xec] sm:$0x1] %vm279_vm1, %v3380_v1 }
  0x51   : > { %340 = vst.msk [vmem:[#allocation2 + $0x100] sm:$0x1] %vm279_vm1, %v3380_v1  ;;  %345 = vst.msk [vmem:[#allocation2 + $0x114] sm:$0x1] %vm279_vm1, %v3380_v1 }
  0x52   : > { %350 = vst.msk [vmem:[#allocation2 + $0x128] sm:$0x1] %vm279_vm1, %v3380_v1  ;;  %355 = vst.msk [vmem:[#allocation2 + $0x13c] sm:$0x1] %vm279_vm1, %v3380_v1 }
  0x53   : > { %360 = vst.msk [vmem:[#allocation2 + $0x150] sm:$0x1] %vm279_vm1, %v3380_v1  ;;  %365 = vst.msk [vmem:[#allocation2 + $0x164] sm:$0x1] %vm279_vm1, %v3380_v1 }
  0x54   : > { %370 = vst.msk [vmem:[#allocation2 + $0x178] sm:$0x1] %vm279_vm1, %v3380_v1  ;;  %375 = vst.msk [vmem:[#allocation2 + $0x18c] sm:$0x1] %vm279_vm1, %v3380_v1 }
  0x55   : > { %380 = vst.msk [vmem:[#allocation2 + $0x1a0] sm:$0x1] %vm279_vm1, %v3380_v1  ;;  %385 = vst.msk [vmem:[#allocation2 + $0x1b4] sm:$0x1] %vm279_vm1, %v3380_v1 }
  0x56   : > { %390 = vst.msk [vmem:[#allocation2 + $0x1c8] sm:$0x1] %vm279_vm1, %v3380_v1  ;;  %395 = vst.msk [vmem:[#allocation2 + $0x1dc] sm:$0x1] %vm279_vm1, %v3380_v1 }
  0x57   : > { %400 = vst.msk [vmem:[#allocation2 + $0x1f0] sm:$0x1] %vm279_vm1, %v3380_v1  ;;  %405 = vst.msk [vmem:[#allocation2 + $0x204] sm:$0x1] %vm279_vm1, %v3380_v1 }
  0x58   : > { %410 = vst.msk [vmem:[#allocation2 + $0x218] sm:$0x1] %vm279_vm1, %v3380_v1  ;;  %415 = vst.msk [vmem:[#allocation2 + $0x22c] sm:$0x1] %vm279_vm1, %v3380_v1 }
  0x59   : > { %420 = vst.msk [vmem:[#allocation2 + $0x240] sm:$0x1] %vm279_vm1, %v3380_v1  ;;  %425 = vst.msk [vmem:[#allocation2 + $0x254] sm:$0x1] %vm279_vm1, %v3380_v1 }
  0x5a   : > { %430 = vst.msk [vmem:[#allocation2 + $0x268] sm:$0x1] %vm279_vm1, %v3380_v1  ;;  %435 = vst.msk [vmem:[#allocation2 + $0x27c] sm:$0x1] %vm279_vm1, %v3380_v1 }
  0x5b   : > { %440 = vst.msk [vmem:[#allocation2 + $0x290] sm:$0x1] %vm279_vm1, %v3380_v1  ;;  %445 = vst.msk [vmem:[#allocation2 + $0x2a4] sm:$0x1] %vm279_vm1, %v3380_v1 }
  0x5c LB: >> { %s3109_s13 = sshll.u32 %s3366_s12, 6  ;;  %vm766_vm2 = vsmask.f32 7938  ;;  %vm599_vm3 = vsmask.f32 256  ;;  %s2841_s15 = smul.u32 80, %s3366_s12  ;;  %s3366_s12 = sphi %s3808_s12, %s453_s12  }
  0x5d   : >> { %s3815_s14 = scalar_lea.vmem %s3796_s30, %s3109_s13  ;;  %vm600_vm4 = vsmask.f32 4368  ;;  %vm3840_vm5 = vmand %vm274_vm0, %vm766_vm2  ;;  %s453_s12 = sadd.s32 1, %s3366_s12  }
  0x5e   : >> { %v3146_v3 = vld [vmem:[%s3815_s14] sm:$0xff]   ;;  %v3177_v4 = vld [vmem:[%s3815_s14 + $0x8] sm:$0xff]   ;;  %v3178_v5 = vld [vmem:[%s3815_s14 + $0x10] sm:$0xff]   ;;  %s3844_s16 = scalar_lea.vmem [#allocation2], %s2841_s15  ;;  %p450_p5 = scmp.ge.s32.totalorder %s453_s12, 8  }
  0x5f   : >> { %v3147_v6 = vunpack.c.l.bf16 %v3146_v3  ;;  %v3148_v7 = vunpack.c.h.bf16 %v3146_v3  ;;  %v3151_v8 = vunpack.c.l.bf16 %v3177_v4  ;;  %v3152_v9 = vunpack.c.h.bf16 %v3177_v4  ;;  %v3179_v12 = vld [vmem:[%s3815_s14 + $0x18] sm:$0xff]   ;;  %vm3849_vm6 = vmor %vm599_vm3, %vm600_vm4  ;;  %v3969_v59 = vld [vmem:[%s4646_s3 + $0x4] sm:$0xf] (%p450_p5)  ;;  %s4010_s15 = smov (%p450_p5), 0  }
  0x60   : >> { %v3155_v10 = vunpack.c.l.bf16 %v3178_v5  ;;  %v3156_v11 = vunpack.c.h.bf16 %v3178_v5  ;;  %v3159_v19 = vunpack.c.l.bf16 %v3179_v12  ;;  %v3160_v20 = vunpack.c.h.bf16 %v3179_v12  ;;  %vm3855_vm7 = vmand %vm279_vm1, %vm599_vm3 }
  0x61   : >> { %v496_v13 = vmul.f32 %v3147_v6, %v3443_v0  ;;  %v497_v14 = vmul.f32 %v3148_v7, %v3443_v0  ;;  %v498_v15 = vmul.f32 %v3151_v8, %v3443_v0  ;;  %v499_v16 = vmul.f32 %v3152_v9, %v3443_v0  ;;  %v3974_v6 = vld [vmem:[%s4646_s3 + $0x8] sm:$0xf] (%p450_p5) }
  0x62   : >> { %v500_v17 = vmul.f32 %v3155_v10, %v3443_v0  ;;  %v501_v18 = vmul.f32 %v3156_v11, %v3443_v0  ;;  %v502_v27 = vmul.f32 %v3159_v19, %v3443_v0  ;;  %v503_v28 = vmul.f32 %v3160_v20, %v3443_v0  ;;  %v2842_v58 = vld [vmem:[%s3844_s16 + $0x14] sm:$0xf]  ;;  %v2847_v7 = vld [vmem:[%s3844_s16 + $0x24] sm:$0x1]  ;;  %v2849_v20 = vld [vmem:[%s3844_s16 + $0x28] sm:$0xf] }
  0x63   : >> { %v518_v21 = vadd.f32 %v3720_v2, %v496_v13  ;;  %v519_v22 = vadd.f32 %v3720_v2, %v497_v14  ;;  %v520_v23 = vadd.f32 %v3720_v2, %v498_v15  ;;  %v521_v24 = vadd.f32 %v3720_v2, %v499_v16  ;;  %v3180_v16 = vld [vmem:[%s3815_s14 + $0x20] sm:$0xff]  }
  0x64   : >> { %v522_v25 = vadd.f32 %v3720_v2, %v500_v17  ;;  %v523_v26 = vadd.f32 %v3720_v2, %v501_v18  ;;  %v524_v35 = vadd.f32 %v3720_v2, %v502_v27  ;;  %v525_v36 = vadd.f32 %v3720_v2, %v503_v28 }
  0x65   : >> { %v534_v29 = vmax.f32 %v518_v21, 0.0  ;;  %v535_v30 = vmax.f32 %v519_v22, 0.0  ;;  %v536_v31 = vmax.f32 %v520_v23, 0.0  ;;  %v537_v32 = vmax.f32 %v521_v24, 0.0  ;;  %v3181_v22 = vld [vmem:[%s3815_s14 + $0x28] sm:$0xff]  }
  0x66   : >> { %v538_v33 = vmax.f32 %v522_v25, 0.0  ;;  %v539_v34 = vmax.f32 %v523_v26, 0.0  ;;  %v540_v43 = vmax.f32 %v524_v35, 0.0  ;;  %v541_v44 = vmax.f32 %v525_v36, 0.0 }
  0x67   : >> { %v3110_v37 = vpack.c.bf16 %v534_v29, %v534_v29  ;;  %v3111_v38 = vpack.c.bf16 %v535_v30, %v535_v30  ;;  %v3112_v39 = vpack.c.bf16 %v536_v31, %v536_v31  ;;  %v3113_v40 = vpack.c.bf16 %v537_v32, %v537_v32  ;;  %v3182_v31 = vld [vmem:[%s3815_s14 + $0x30] sm:$0xff]  }
  0x68   : >> { %v3114_v41 = vpack.c.bf16 %v538_v33, %v538_v33  ;;  %v3115_v42 = vpack.c.bf16 %v539_v34, %v539_v34  ;;  %v3116_v21 = vpack.c.bf16 %v540_v43, %v540_v43  ;;  %v3117_v29 = vpack.c.bf16 %v541_v44, %v541_v44 }
  0x69   : >> { %v603_v45 = vshrl.u32 %v3110_v37, 16  ;;  %v606_v46 = vshll.u32 %v3110_v37, 16  ;;  %v611_v47 = vshrl.u32 %v3111_v38, 16  ;;  %v614_v48 = vshll.u32 %v3111_v38, 16 }
  0x6a   : >> { %v620_v49 = vshrl.u32 %v3112_v39, 16  ;;  %v623_v50 = vshll.u32 %v3112_v39, 16  ;;  %v629_v51 = vshrl.u32 %v3113_v40, 16  ;;  %v632_v52 = vshll.u32 %v3113_v40, 16 }
  0x6b   : >> { %v605_v53 = vrot.slane %v603_v45, 7  ;;  %v613_v55 = vrot.slane %v611_v47, 7  ;;  %v638_v56 = vshrl.u32 %v3114_v41, 16  ;;  %v641_v57 = vshll.u32 %v3114_v41, 16 }
  0x6c   : >> { %v622_v60 = vrot.slane %v620_v49, 7  ;;  %v631_v61 = vrot.slane %v629_v51, 7  ;;  %v646_v62 = vshrl.u32 %v3115_v42, 16  ;;  %v649_v63 = vshll.u32 %v3115_v42, 16 }
  0x6d   : >> { %v608_v1 = vor.u32 %v606_v46, %v605_v53  ;;  %v609_v3 = vrot.slane %v605_v53, 4  ;;  %v616_v4 = vor.u32 %v614_v48, %v613_v55  ;;  %v618_v5 = vrot.slane %v613_v55, 4  ;;  %v2854_v48 = vld [vmem:[%s3844_s16 + $0x38] sm:$0x1] }
  0x6e   : >> { %v625_v8 = vor.u32 %v623_v50, %v622_v60  ;;  %v627_v9 = vrot.slane %v622_v60, 4  ;;  %v634_v10 = vor.u32 %v632_v52, %v631_v61  ;;  %v636_v11 = vrot.slane %v631_v61, 4 }
  0x6f   : >> { %v769_v12 = vsel %vm3840_vm5, %v608_v1, %v2842_v58  ;;  %v617_v13 = vsel %vm3849_vm6, %v609_v3, %v616_v4  ;;  %v640_v14 = vrot.slane %v638_v56, 7  ;;  %v648_v15 = vrot.slane %v646_v62, 7 }
  0x70   : >> { %2843 = vst [vmem:[%s3844_s16 + $0x14] sm:$0xf] %v769_v12  ;;  %2844 = vst.msk [vmem:[%s3844_s16 + $0x18] sm:$0xf] %vm274_vm0, %v617_v13  ;;  %v626_v17 = vsel %vm3849_vm6, %v618_v5, %v625_v8  ;;  %v635_v18 = vsel %vm3849_vm6, %v627_v9, %v634_v10  ;;  %v777_v19 = vsel %vm3855_vm7, %v636_v11, %v2847_v7  ;;  %v655_v27 = vshrl.u32 %v3116_v21, 16 }
  0x71   : >> { %2845 = vst.msk [vmem:[%s3844_s16 + $0x1c] sm:$0xf] %vm274_vm0, %v626_v17  ;;  %2846 = vst.msk [vmem:[%s3844_s16 + $0x20] sm:$0xf] %vm274_vm0, %v635_v18  ;;  %v643_v23 = vor.u32 %v641_v57, %v640_v14  ;;  %v644_v24 = vrot.slane %v640_v14, 4  ;;  %v651_v25 = vor.u32 %v649_v63, %v648_v15  ;;  %v653_v26 = vrot.slane %v648_v15, 4 }
  0x72   : >> { %2848 = vst [vmem:[%s3844_s16 + $0x24] sm:$0x1] %v777_v19  ;;  %v658_v28 = vshll.u32 %v3116_v21, 16  ;;  %v3163_v30 = vunpack.c.l.bf16 %v3180_v16  ;;  %v3164_v34 = vunpack.c.h.bf16 %v3180_v16  ;;  %v3167_v35 = vunpack.c.l.bf16 %v3181_v22  ;;  %v3183_v63 = vld [vmem:[%s3815_s14 + $0x38] sm:$0xff]  }
  0x73   : >> { %v780_v32 = vsel %vm3840_vm5, %v643_v23, %v2849_v20  ;;  %v652_v33 = vsel %vm3849_vm6, %v644_v24, %v651_v25  ;;  %v657_v36 = vrot.slane %v655_v27, 7  ;;  %v664_v37 = vshrl.u32 %v3117_v29, 16  ;;  %v2856_v23 = vld [vmem:[%s3844_s16 + $0x3c] sm:$0xf] }
  0x74   : >> { %2850 = vst [vmem:[%s3844_s16 + $0x28] sm:$0xf] %v780_v32  ;;  %2851 = vst.msk [vmem:[%s3844_s16 + $0x2c] sm:$0xf] %vm274_vm0, %v652_v33  ;;  %v667_v38 = vshll.u32 %v3117_v29, 16  ;;  %v504_v39 = vmul.f32 %v3163_v30, %v3443_v0  ;;  %v505_v40 = vmul.f32 %v3164_v34, %v3443_v0  ;;  %v506_v41 = vmul.f32 %v3167_v35, %v3443_v0 }
  0x75   : >> { %v3168_v42 = vunpack.c.h.bf16 %v3181_v22  ;;  %v3171_v43 = vunpack.c.l.bf16 %v3182_v31  ;;  %v660_v44 = vor.u32 %v658_v28, %v657_v36  ;;  %v662_v45 = vrot.slane %v657_v36, 4 }
  0x76   : >> { %v666_v46 = vrot.slane %v664_v37, 7  ;;  %v526_v47 = vadd.f32 %v3720_v2, %v504_v39  ;;  %v527_v49 = vadd.f32 %v3720_v2, %v505_v40  ;;  %v528_v50 = vadd.f32 %v3720_v2, %v506_v41 }
  0x77   : >> { %v507_v51 = vmul.f32 %v3168_v42, %v3443_v0  ;;  %v508_v52 = vmul.f32 %v3171_v43, %v3443_v0  ;;  %v661_v53 = vsel %vm3849_vm6, %v653_v26, %v660_v44  ;;  %v3172_v5 = vunpack.c.h.bf16 %v3182_v31  ;;  %v2861_v42 = vld [vmem:[%s3844_s16 + $0x4c] sm:$0x1] }
  0x78   : >> { %v669_v55 = vor.u32 %v667_v38, %v666_v46  ;;  %v671_v56 = vrot.slane %v666_v46, 4  ;;  %v542_v57 = vmax.f32 %v526_v47, 0.0  ;;  %2852 = vst.msk [vmem:[%s3844_s16 + $0x30] sm:$0xf] %vm274_vm0, %v661_v53  ;;  %v543_v58 = vmax.f32 %v527_v49, 0.0 }
  0x79   : >> { %v544_v60 = vmax.f32 %v528_v50, 0.0  ;;  %v529_v61 = vadd.f32 %v3720_v2, %v507_v51  ;;  %v530_v62 = vadd.f32 %v3720_v2, %v508_v52  ;;  %v509_v13 = vmul.f32 %v3172_v5, %v3443_v0  ;;  %v2863_v49 = vld [vmem:[%s3844_s16 + $0x50] sm:$0xf] }
  0x7a   : >> { %v670_v1 = vsel %vm3849_vm6, %v662_v45, %v669_v55  ;;  %v786_v3 = vsel %vm3855_vm7, %v671_v56, %v2854_v48  ;;  %v3118_v4 = vpack.c.bf16 %v542_v57, %v542_v57  ;;  %v3119_v7 = vpack.c.bf16 %v543_v58, %v543_v58 }
  0x7b   : >> { %2853 = vst.msk [vmem:[%s3844_s16 + $0x34] sm:$0xf] %vm274_vm0, %v670_v1  ;;  %2855 = vst [vmem:[%s3844_s16 + $0x38] sm:$0x1] %v786_v3  ;;  %v3120_v8 = vpack.c.bf16 %v544_v60, %v544_v60  ;;  %v545_v9 = vmax.f32 %v529_v61, 0.0  ;;  %v546_v10 = vmax.f32 %v530_v62, 0.0  ;;  %v3175_v14 = vunpack.c.l.bf16 %v3183_v63 }
  0x7c   : >> { %v673_v11 = vshrl.u32 %v3118_v4, 16  ;;  %v676_v12 = vshll.u32 %v3118_v4, 16  ;;  %v681_v15 = vshrl.u32 %v3119_v7, 16  ;;  %v684_v16 = vshll.u32 %v3119_v7, 16 }
  0x7d   : >> { %v690_v17 = vshrl.u32 %v3120_v8, 16  ;;  %v693_v18 = vshll.u32 %v3120_v8, 16  ;;  %v3121_v20 = vpack.c.bf16 %v545_v9, %v545_v9  ;;  %v3122_v21 = vpack.c.bf16 %v546_v10, %v546_v10 }
  0x7e   : >> { %v675_v19 = vrot.slane %v673_v11, 7  ;;  %v531_v22 = vadd.f32 %v3720_v2, %v509_v13  ;;  %v683_v24 = vrot.slane %v681_v15, 7  ;;  %v510_v26 = vmul.f32 %v3175_v14, %v3443_v0 }
  0x7f   : >> { %v692_v25 = vrot.slane %v690_v17, 7  ;;  %v3176_v27 = vunpack.c.h.bf16 %v3183_v63  ;;  %v699_v30 = vshrl.u32 %v3121_v20, 16  ;;  %v702_v31 = vshll.u32 %v3121_v20, 16 }
  0x80   : >> { %v678_v28 = vor.u32 %v676_v12, %v675_v19  ;;  %v679_v29 = vrot.slane %v675_v19, 4  ;;  %v686_v32 = vor.u32 %v684_v16, %v683_v24  ;;  %v688_v33 = vrot.slane %v683_v24, 4  ;;  %v2868_v16 = vld [vmem:[%s3844_s16 + $0x60] sm:$0x1]  ;;  %v3999_v24 = vld [vmem:[%s4646_s3 + $0x1c] sm:$0xf] (%p450_p5) }
  0x81   : >> { %v695_v34 = vor.u32 %v693_v18, %v692_v25  ;;  %v697_v35 = vrot.slane %v692_v25, 4  ;;  %v701_v37 = vrot.slane %v699_v30, 7  ;;  %v708_v38 = vshrl.u32 %v3122_v21, 16  ;;  %v4004_v25 = vld [vmem:[%s4646_s3 + $0x20] sm:$0xf] (%p450_p5) }
  0x82   : >> { %v789_v36 = vsel %vm3840_vm5, %v678_v28, %v2856_v23  ;;  %v711_v39 = vshll.u32 %v3122_v21, 16  ;;  %v687_v40 = vsel %vm3849_vm6, %v679_v29, %v686_v32  ;;  %v547_v43 = vmax.f32 %v531_v22, 0.0  ;;  %v3964_v21 = vld [vmem:[%s4646_s3] sm:$0xf] (%p450_p5)  ;;  %v3979_v22 = vld [vmem:[%s4646_s3 + $0xc] sm:$0xf] (%p450_p5) }
  0x83   : >> { %2857 = vst [vmem:[%s3844_s16 + $0x3c] sm:$0xf] %v789_v36  ;;  %v696_v41 = vsel %vm3849_vm6, %v688_v33, %v695_v34  ;;  %v532_v44 = vadd.f32 %v3720_v2, %v510_v26  ;;  %2858 = vst.msk [vmem:[%s3844_s16 + $0x40] sm:$0xf] %vm274_vm0, %v687_v40  ;;  %v704_v45 = vor.u32 %v702_v31, %v701_v37  ;;  %v706_v46 = vrot.slane %v701_v37, 4 }
  0x84   : >> { %2859 = vst.msk [vmem:[%s3844_s16 + $0x44] sm:$0xf] %vm274_vm0, %v696_v41  ;;  %v710_v47 = vrot.slane %v708_v38, 7  ;;  %v511_v48 = vmul.f32 %v3176_v27, %v3443_v0  ;;  %v3123_v50 = vpack.c.bf16 %v547_v43, %v547_v43  ;;  %v3984_v0 = vld [vmem:[%s4646_s3 + $0x10] sm:$0xf] (%p450_p5)  ;;  %v4006_v26 = vmov (%p450_p5), 0.0  }
  0x85   : >> { %v548_v51 = vmax.f32 %v532_v44, 0.0  ;;  %v705_v52 = vsel %vm3849_vm6, %v697_v35, %v704_v45  ;;  %v795_v53 = vsel %vm3855_vm7, %v706_v46, %v2861_v42  ;;  %v3994_v23 = vld [vmem:[%s4646_s3 + $0x18] sm:$0xf] (%p450_p5)  ;;  %v4008_v27 = vmov (%p450_p5), 0.0  }
  0x86   : >> { %v713_v55 = vor.u32 %v711_v39, %v710_v47  ;;  %2860 = vst.msk [vmem:[%s3844_s16 + $0x48] sm:$0xf] %vm274_vm0, %v705_v52  ;;  %2862 = vst [vmem:[%s3844_s16 + $0x4c] sm:$0x1] %v795_v53  ;;  %v716_v56 = vshrl.u32 %v3123_v50, 16  ;;  %v719_v57 = vshll.u32 %v3123_v50, 16  ;;  %v533_v60 = vadd.f32 %v3720_v2, %v511_v48 }
  0x87   : >> { %v3124_v58 = vpack.c.bf16 %v548_v51, %v548_v51  ;;  %v714_v62 = vrot.slane %v710_v47, 4  ;;  %v3989_v2 = vld [vmem:[%s4646_s3 + $0x14] sm:$0xf] (%p450_p5) }
  0x88   : >> { %v798_v61 = vsel %vm3840_vm5, %v713_v55, %v2863_v49  ;;  %v718_v63 = vrot.slane %v716_v56, 7  ;;  %v549_v4 = vmax.f32 %v533_v60, 0.0 }
  0x89   : >> { %2864 = vst [vmem:[%s3844_s16 + $0x50] sm:$0xf] %v798_v61  ;;  %v725_v1 = vshrl.u32 %v3124_v58, 16  ;;  %v728_v3 = vshll.u32 %v3124_v58, 16 }
  0x8a   : >> { %v721_v5 = vor.u32 %v719_v57, %v718_v63  ;;  %v723_v7 = vrot.slane %v718_v63, 4  ;;  %v3125_v9 = vpack.c.bf16 %v549_v4, %v549_v4 }
  0x8b   : >> { %v727_v8 = vrot.slane %v725_v1, 7 }
  0x8c   : >> { %v722_v10 = vsel %vm3849_vm6, %v714_v62, %v721_v5  ;;  %v734_v54 = vshrl.u32 %v3125_v9, 16  ;;  %v737_v12 = vshll.u32 %v3125_v9, 16 }
  0x8d   : >> { %v730_v11 = vor.u32 %v728_v3, %v727_v8  ;;  %2865 = vst.msk [vmem:[%s3844_s16 + $0x54] sm:$0xf] %vm274_vm0, %v722_v10  ;;  %v732_v14 = vrot.slane %v727_v8, 4  ;;  %452 = sbr.rel (!%p450_p5) target bundleno = 92 (0x5c), region = 102 }
  0x8e   : >> { %v736_v15 = vrot.slane %v734_v54, 7 }
  0x8f   : >> { %v731_v13 = vsel %vm3849_vm6, %v723_v7, %v730_v11 }
  0x90   : >> { %2866 = vst.msk [vmem:[%s3844_s16 + $0x58] sm:$0xf] %vm274_vm0, %v731_v13  ;;  %v739_v17 = vor.u32 %v737_v12, %v736_v15  ;;  %v741_v18 = vrot.slane %v736_v15, 4 }
  0x92   : >> { %v740_v19 = vsel %vm3849_vm6, %v732_v14, %v739_v17  ;;  %v804_v20 = vsel %vm3855_vm7, %v741_v18, %v2868_v16 }
  0x93   : >> { %2867 = vst.msk [vmem:[%s3844_s16 + $0x5c] sm:$0xf] %vm274_vm0, %v740_v19  ;;  %2869 = vst [vmem:[%s3844_s16 + $0x60] sm:$0x1] %v804_v20 }
  0x94 LB: >> { %vm1198_vm8 = vcmask 1042432   ;;  %vm1199_vm9 = vcmask 1046532   ;;  %s3126_s16 = smul.u32 80, %s3378_s15  ;;  %s3381_s18 = smov 24   ;;  %vm922_vm11 = vsmask.f32 3328  ;;  %s3378_s15 = sphi %s4010_s15, %s821_s15   ;;  %v3374_v27 = vphi %v4008_v27, %v4660_v27   ;;  %v3370_v26 = vphi %v4006_v26, %v4659_v26  }
  0x95   : >> { %vm4022_vm10 = vmor %vm1198_vm8, %vm1199_vm9  ;;  %vm923_vm12 = vsmask.f32 7440  ;;  %s3382_s22 = smov 40   ;;  %s3383_s23 = smov 16   ;;  %vm893_vm14 = vcmask 64512   ;;  %vm1149_vm15 = vcmask 130112  }
  0x96   : >> { %s4026_s17 = scalar_lea.vmem [#allocation2], %s3126_s16  ;;  %vm4064_vm13 = vmor %vm922_vm11, %vm923_vm12  ;;  %s3384_s24 = smov 8   ;;  %vm1301_vm2 = vcmask 195712   ;;  %vm1394_vm3 = vcmask 261312   ;;  %vm1647_vm4 = vcmask 326912   ;;  %vm1796_vm5 = vcmask 392512  }
  0x97   : >> { %s3385_s25 = smov 32   ;;  %s3386_s26 = smov 48   ;;  %vm1889_vm6 = vcmask 458112   ;;  %vm2142_vm7 = vcmask 523712   ;;  %vm2360_vm8 = vcmask 1043456   ;;  %vm2291_vm9 = vcmask 589312  }
  0x98   : >> { %s3387_s27 = smov 56   ;;  %s3388_s28 = smov 64  }
  0x99   : >> { %s3144_s29 = sshll.u32 %s3378_s15, 6  ;;  %s821_s15 = sadd.s32 1, %s3378_s15  }
  0x9a   : >> { %v3300_v29 = vld [vmem:[%s4026_s17 + $0x1c] sm:$0xff]   ;;  %v3301_v30 = vld [vmem:[%s4026_s17 + $0x14] sm:$0xff]   ;;  %v1159_v38 = vld [vmem:[%s4026_s17 + $0x4] sm:$0xf]  ;;  %s4555_s30 = scalar_lea.vmem %s3801_s8, %s3144_s29  ;;  %p818_p6 = scmp.ge.s32.totalorder %s821_s15, 8  }
  0x9b   : >> { %1372 = vrot.lane.b32.xlu1 %v3300_v29, %s3381_s18  ;;  %v2955_v31 = vld [vmem:[%s4026_s17 + $0x14] sm:$0xe]  ;;  %v2956_v32 = vld [vmem:[%s4026_s17 + $0x18] sm:$0xf]  ;;  %v2957_v33 = vld [vmem:[%s4026_s17 + $0x1c] sm:$0xf] }
  0x9c   : >> { %1370 = vrot.lane.b32.xlu0 %v3301_v30, %s3381_s18  ;;  %v2975_v34 = vrot.slane %v2955_v31, 9  ;;  %v1698_v35 = vrot.slane %v2956_v32, 5  ;;  %v1701_v36 = vrot.slane %v2957_v33, 5  ;;  %v1158_v37 = vld [vmem:[%s4026_s17] sm:$0xe]  ;;  %v1203_v43 = vrot.slane %v1159_v38, 5 }
  0x9d   : >> { %v1160_v39 = vld [vmem:[%s4026_s17 + $0x8] sm:$0xf]  ;;  %v2889_v40 = vrot.slane %v1158_v37, 9  ;;  %v1161_v45 = vld [vmem:[%s4026_s17 + $0xc] sm:$0xf] }
  0x9e   : >> { %v1699_v41 = vsel %vm4022_vm10, %v2975_v34, %v1698_v35  ;;  %v1700_v42 = vrot.slane %v1698_v35, 4  ;;  %v1206_v44 = vrot.slane %v1160_v39, 5  ;;  %v1162_v46 = vld [vmem:[%s4026_s17 + $0x10] sm:$0x1]  ;;  %v1209_v47 = vrot.slane %v1161_v45, 5 }
  0x9f   : >> { %v902_v48 = vld [vmem:[%s4026_s17] sm:$0xf]  ;;  %v1703_v49 = vrot.slane %v1701_v36, 4  ;;  %v1204_v51 = vsel %vm4022_vm10, %v2889_v40, %v1203_v43  ;;  %v1205_v52 = vrot.slane %v1203_v43, 4  ;;  %v903_v55 = vld [vmem:[%s4026_s17 + $0x4] sm:$0xf] }
  0xa0   : >> { %v1702_v50 = vsel %vm4022_vm10, %v1700_v42, %v1701_v36  ;;  %v1208_v53 = vrot.slane %v1206_v44, 4  ;;  %v1211_v57 = vrot.slane %v1209_v47, 4  ;;  %v1212_v58 = vrot.slane %v1162_v46, 5  ;;  %v904_v60 = vld [vmem:[%s4026_s17 + $0x8] sm:$0xf] }
  0xa1   : >> { %v2979_v56 = vcombine.low %v1699_v41, %v1702_v50  ;;  %v926_v61 = vshrl.u32 %v902_v48, 16  ;;  %v1207_v62 = vsel %vm4022_vm10, %v1205_v52, %v1206_v44  ;;  %v929_v1 = vshll.u32 %v902_v48, 16  ;;  %v2958_v4 = vld [vmem:[%s4026_s17 + $0x20] sm:$0xf]  ;;  %v2959_v5 = vld [vmem:[%s4026_s17 + $0x24] sm:$0x1] }
  0xa2   : >> { %v1210_v63 = vsel %vm4022_vm10, %v1208_v53, %v1209_v47  ;;  %v935_v3 = vshll.u32 %v903_v55, 16  ;;  %v2893_v7 = vcombine.low %v1204_v51, %v1207_v62  ;;  %v1213_v8 = vsel %vm4022_vm10, %v1211_v57, %v1212_v58  ;;  %v905_v11 = vld [vmem:[%s4026_s17 + $0xc] sm:$0xf]  ;;  %v906_v19 = vld [vmem:[%s4026_s17 + $0x10] sm:$0x1] }
  0xa3   : >> { %1772 = vrot.lane.b32.xlu0 %v2979_v56, %s3382_s22  ;;  %v928_v9 = vrot.slane %v926_v61, 4  ;;  %v939_v10 = vshrl.u32 %v903_v55, 16  ;;  %v2894_v54 = vcombine.low %v1210_v63, %v1213_v8  ;;  %v931_v12 = vrot.slane %v929_v1, 5  ;;  %v2929_v32 = vld [vmem:[%s4026_s17 + $0x1c] sm:$0xf] }
  0xa4   : >> { %v937_v13 = vrot.slane %v935_v3, 5  ;;  %v945_v14 = vshll.u32 %v904_v60, 16  ;;  %1277 = vrot.lane.b32.xlu1 %v2893_v7, %s3383_s23  ;;  %v949_v16 = vshrl.u32 %v904_v60, 16  ;;  %v1704_v17 = vrot.slane %v2958_v4, 5  ;;  %v2930_v38 = vld [vmem:[%s4026_s17 + $0x20] sm:$0xf] }
  0xa5   : >> { %v941_v15 = vrot.slane %v939_v10, 4  ;;  %v1707_v18 = vrot.slane %v2959_v5, 5  ;;  %v932_v20 = vor.u32 %v931_v12, %v928_v9  ;;  %v955_v30 = vshll.u32 %v905_v11, 16  ;;  %v2931_v51 = vld [vmem:[%s4026_s17 + $0x24] sm:$0x1] }
  0xa6   : >> { %v947_v29 = vrot.slane %v945_v14, 5  ;;  %v959_v31 = vshrl.u32 %v905_v11, 16  ;;  %v1705_v35 = vsel %vm4022_vm10, %v1703_v49, %v1704_v17  ;;  %v1706_v36 = vrot.slane %v1704_v17, 4  ;;  %v2927_v52 = vld [vmem:[%s4026_s17 + $0x14] sm:$0xf] }
  0xa7   : >> { %v942_v34 = vor.u32 %v941_v15, %v937_v13  ;;  %v951_v37 = vrot.slane %v949_v16, 4  ;;  %v933_v39 = vrot.slane %v932_v20, 4  ;;  %v957_v40 = vrot.slane %v955_v30, 5  ;;  %v2928_v63 = vld [vmem:[%s4026_s17 + $0x18] sm:$0xf] }
  0xa8   : >> { %v961_v41 = vrot.slane %v959_v31, 4  ;;  %v965_v42 = vshll.u32 %v906_v19, 16  ;;  %1279 = vrot.lane.b32.xlu1 %v2894_v54, %s3383_s23  ;;  %v1708_v44 = vsel %vm4022_vm10, %v1706_v36, %v1707_v18  ;;  %v1443_v46 = vshll.u32 %v2929_v32, 16  ;;  %v3013_v7 = vld [vmem:[%s4026_s17 + $0x28] sm:$0xf] }
  0xa9   : >> { %v943_v43 = vrot.slane %v942_v34, 4  ;;  %v952_v45 = vor.u32 %v951_v37, %v947_v29  ;;  %v938_v47 = vsel %vm4064_vm13, %v933_v39, %v937_v13  ;;  %v2980_v48 = vcombine.low %v1705_v35, %v1708_v44  ;;  %v3014_v54 = vld [vmem:[%s4026_s17 + $0x2c] sm:$0xf]  ;;  %v3015_v37 = vld [vmem:[%s4026_s17 + $0x30] sm:$0xf] }
  0xaa   : >> { %v962_v49 = vor.u32 %v961_v41, %v957_v40  ;;  %v967_v50 = vrot.slane %v965_v42, 5  ;;  %v4080_v56 = vrot.slane %v1443_v46, 5  ;;  %v1447_v57 = vshrl.u32 %v2929_v32, 16  ;;  %v3016_v42 = vld [vmem:[%s4026_s17 + $0x34] sm:$0xf] }
  0xab   : >> { %v948_v53 = vsel %vm4064_vm13, %v943_v43, %v947_v29  ;;  %v953_v55 = vrot.slane %v952_v45, 4  ;;  %v1453_v61 = vshll.u32 %v2930_v38, 16  ;;  %v1457_v62 = vshrl.u32 %v2930_v38, 16 }
  0xac   : >> { %v2881_v58 = vcombine.low %v938_v47, %v948_v53  ;;  %v963_v60 = vrot.slane %v962_v49, 4  ;;  %1774 = vrot.lane.b32.xlu1 %v2980_v48, %s3382_s22  ;;  %v1449_v3 = vrot.slane %v1447_v57, 4  ;;  %v1463_v4 = vshll.u32 %v2931_v51, 16  ;;  %v3017_v51 = vld [vmem:[%s4026_s17 + $0x38] sm:$0x1] }
  0xad   : >> { %v958_v1 = vsel %vm4064_vm13, %v953_v55, %v957_v40  ;;  %v1424_v5 = vshrl.u32 %v2927_v52, 16  ;;  %v1455_v9 = vrot.slane %v1453_v61, 5  ;;  %v1459_v10 = vrot.slane %v1457_v62, 4  ;;  %v3303_v55 = vld [vmem:[%s4026_s17 + $0x30] sm:$0xff]  }
  0xae   : >> { %1125 = vrot.lane.b32.xlu0 %v2881_v58, %s3384_s24  ;;  %v968_v8 = vsel %vm4064_vm13, %v963_v60, %v967_v50  ;;  %v1427_v11 = vshll.u32 %v2927_v52, 16  ;;  %v1450_v13 = vor.u32 %v1449_v3, %v4080_v56  ;;  %v1465_v14 = vrot.slane %v1463_v4, 5  ;;  %v3041_v60 = vld [vmem:[%s4026_s17 + $0x28] sm:$0xe]  ;;  %v3042_v3 = vld [vmem:[%s4026_s17 + $0x2c] sm:$0xf] }
  0xaf   : >> { %v2882_v12 = vcombine.low %v958_v1, %v968_v8  ;;  %v1426_v15 = vrot.slane %v1424_v5, 4  ;;  %v1460_v16 = vor.u32 %v1459_v10, %v1455_v9  ;;  %v1433_v18 = vshll.u32 %v2928_v63, 16  ;;  %v907_v10 = vld [vmem:[%s4026_s17 + $0x14] sm:$0xf] }
  0xb0   : >> { %v1429_v17 = vrot.slane %v1427_v11, 5  ;;  %v1437_v19 = vshrl.u32 %v2928_v63, 16  ;;  %v1451_v20 = vrot.slane %v1450_v13, 4  ;;  %v1919_v29 = vshrl.u32 %v3013_v7, 16 }
  0xb1   : >> { %v1922_v30 = vshll.u32 %v3013_v7, 16  ;;  %v1928_v31 = vshll.u32 %v3014_v54, 16  ;;  %v1461_v32 = vrot.slane %v1460_v16, 4  ;;  %v1435_v35 = vrot.slane %v1433_v18, 5 }
  0xb2   : >> { %1127 = vrot.lane.b32.xlu0 %v2882_v12, %s3384_s24  ;;  %v1430_v34 = vor.u32 %v1429_v17, %v1426_v15  ;;  %v1439_v36 = vrot.slane %v1437_v19, 4  ;;  %v1456_v38 = vsel %vm4064_vm13, %v1451_v20, %v1455_v9  ;;  %v1921_v39 = vrot.slane %v1919_v29, 4  ;;  %v3043_v9 = vld [vmem:[%s4026_s17 + $0x30] sm:$0xf] }
  0xb3   : >> { %v1924_v40 = vrot.slane %v1922_v30, 5  ;;  %v1930_v41 = vrot.slane %v1928_v31, 5  ;;  %v1466_v43 = vsel %vm4064_vm13, %v1461_v32, %v1465_v14  ;;  %v1932_v46 = vshrl.u32 %v3014_v54, 16  ;;  %v908_v14 = vld [vmem:[%s4026_s17 + $0x18] sm:$0xf] }
  0xb4   : >> { %v1431_v44 = vrot.slane %v1430_v34, 4  ;;  %v1440_v45 = vor.u32 %v1439_v36, %v1435_v35  ;;  %v2948_v47 = vcombine.low %v1456_v38, %v1466_v43  ;;  %v1938_v49 = vshll.u32 %v3015_v37, 16 }
  0xb5   : >> { %v1925_v48 = vor.u32 %v1924_v40, %v1921_v39  ;;  %v1942_v50 = vshrl.u32 %v3015_v37, 16  ;;  %v1934_v57 = vrot.slane %v1932_v46, 4  ;;  %v1948_v58 = vshll.u32 %v3016_v42, 16  ;;  %v3045_v46 = vld [vmem:[%s4026_s17 + $0x38] sm:$0x1] }
  0xb6   : >> { %v1436_v52 = vsel %vm4064_vm13, %v1431_v44, %v1435_v35  ;;  %v1441_v53 = vrot.slane %v1440_v45, 4  ;;  %1625 = vrot.lane.b32.xlu1 %v2948_v47, %s3385_s25  ;;  %v1940_v62 = vrot.slane %v1938_v49, 5  ;;  %v1952_v1 = vshrl.u32 %v3016_v42, 16  ;;  %v909_v35 = vld [vmem:[%s4026_s17 + $0x1c] sm:$0xf] }
  0xb7   : >> { %v1926_v61 = vrot.slane %v1925_v48, 4  ;;  %v1944_v63 = vrot.slane %v1942_v50, 4  ;;  %v1935_v5 = vor.u32 %v1934_v57, %v1930_v41  ;;  %v1950_v7 = vrot.slane %v1948_v58, 5  ;;  %v911_v58 = vld [vmem:[%s4026_s17 + $0x24] sm:$0x1] }
  0xb8   : >> { %v1446_v4 = vsel %vm4064_vm13, %v1441_v53, %v4080_v56  ;;  %v1958_v8 = vshll.u32 %v3017_v51, 16  ;;  %v1954_v13 = vrot.slane %v1952_v1, 4  ;;  %v3061_v17 = vrot.slane %v3041_v60, 9  ;;  %v3302_v56 = vld [vmem:[%s4026_s17 + $0x28] sm:$0xff]   ;;  %v910_v51 = vld [vmem:[%s4026_s17 + $0x20] sm:$0xf] }
  0xb9   : >> { %v2947_v11 = vcombine.low %v1436_v52, %v1446_v4  ;;  %v1931_v54 = vsel %vm4064_vm13, %v1926_v61, %v1930_v41  ;;  %v1945_v12 = vor.u32 %v1944_v63, %v1940_v62  ;;  %v1936_v15 = vrot.slane %v1935_v5, 4  ;;  %v3044_v41 = vld [vmem:[%s4026_s17 + $0x34] sm:$0xf] }
  0xba   : >> { %v1960_v16 = vrot.slane %v1958_v8, 5  ;;  %v2193_v18 = vrot.slane %v3042_v3, 5  ;;  %1867 = vrot.lane.b32.xlu1 %v3303_v55, %s3386_s26  ;;  %v1955_v20 = vor.u32 %v1954_v13, %v1950_v7  ;;  %v2196_v29 = vrot.slane %v3043_v9, 5  ;;  %v1163_v60 = vld [vmem:[%s4026_s17 + $0x14] sm:$0xe] }
  0xbb   : >> { %1623 = vrot.lane.b32.xlu0 %v2947_v11, %s3385_s25  ;;  %v1946_v19 = vrot.slane %v1945_v12, 4  ;;  %v970_v30 = vshrl.u32 %v907_v10, 16  ;;  %v1941_v31 = vsel %vm4064_vm13, %v1936_v15, %v1940_v62  ;;  %v973_v36 = vshll.u32 %v907_v10, 16  ;;  %v1164_v3 = vld [vmem:[%s4026_s17 + $0x18] sm:$0xf] }
  0xbc   : >> { %v2194_v32 = vsel %vm4022_vm10, %v3061_v17, %v2193_v18  ;;  %v2195_v34 = vrot.slane %v2193_v18, 4  ;;  %v3033_v37 = vcombine.low %v1931_v54, %v1941_v31  ;;  %v1956_v39 = vrot.slane %v1955_v20, 4  ;;  %v1165_v9 = vld [vmem:[%s4026_s17 + $0x1c] sm:$0xf]  ;;  %v1166_v10 = vld [vmem:[%s4026_s17 + $0x20] sm:$0xf] }
  0xbd   : >> { %v1951_v38 = vsel %vm4064_vm13, %v1946_v19, %v1950_v7  ;;  %v972_v40 = vrot.slane %v970_v30, 4  ;;  %v975_v43 = vrot.slane %v973_v36, 5  ;;  %v979_v44 = vshll.u32 %v908_v14, 16 }
  0xbe   : >> { %v2197_v42 = vsel %vm4022_vm10, %v2195_v34, %v2196_v29  ;;  %v983_v45 = vshrl.u32 %v908_v14, 16  ;;  %v1961_v47 = vsel %vm4064_vm13, %v1956_v39, %v1960_v16  ;;  %v989_v49 = vshll.u32 %v909_v35, 16 }
  0xbf   : >> { %1865 = vrot.lane.b32.xlu0 %v3302_v56, %s3386_s26  ;;  %v3065_v48 = vcombine.low %v2194_v32, %v2197_v42  ;;  %v993_v50 = vshrl.u32 %v909_v35, 16  ;;  %v3034_v52 = vcombine.low %v1951_v38, %v1961_v47  ;;  %v976_v53 = vor.u32 %v975_v43, %v972_v40  ;;  %v2932_v35 = vld [vmem:[%s4026_s17 + $0x28] sm:$0xf]  ;;  %v2933_v40 = vld [vmem:[%s4026_s17 + $0x2c] sm:$0xf] }
  0xc0   : >> { %v981_v55 = vrot.slane %v979_v44, 5  ;;  %v985_v57 = vrot.slane %v983_v45, 4  ;;  %v991_v61 = vrot.slane %v989_v49, 5  ;;  %v2198_v62 = vrot.slane %v2196_v29, 4  ;;  %v1167_v29 = vld [vmem:[%s4026_s17 + $0x24] sm:$0x1] }
  0xc1   : >> { %v2199_v63 = vrot.slane %v3044_v41, 5  ;;  %v2202_v1 = vrot.slane %v3045_v46, 5  ;;  %2120 = vrot.lane.b32.xlu1 %v3034_v52, %s3387_s27  ;;  %v977_v4 = vrot.slane %v976_v53, 4  ;;  %v995_v7 = vrot.slane %v993_v50, 4  ;;  %v2934_v50 = vld [vmem:[%s4026_s17 + $0x30] sm:$0xf] }
  0xc2   : >> { %v986_v5 = vor.u32 %v985_v57, %v981_v55  ;;  %v999_v8 = vshll.u32 %v910_v51, 16  ;;  %v1003_v12 = vshrl.u32 %v910_v51, 16  ;;  %v1009_v13 = vshll.u32 %v911_v58, 16 }
  0xc3   : >> { %2118 = vrot.lane.b32.xlu0 %v3033_v37, %s3387_s27  ;;  %v2200_v11 = vsel %vm4022_vm10, %v2198_v62, %v2199_v63  ;;  %v2201_v54 = vrot.slane %v2199_v63, 4  ;;  %v982_v14 = vsel %vm4064_vm13, %v977_v4, %v981_v55  ;;  %v996_v16 = vor.u32 %v995_v7, %v991_v61  ;;  %v2936_v62 = vld [vmem:[%s4026_s17 + $0x38] sm:$0x1]  ;;  %v2961_v7 = vld [vmem:[%s4026_s17 + $0x2c] sm:$0xf] }
  0xc4   : >> { %v987_v15 = vrot.slane %v986_v5, 4  ;;  %v1001_v17 = vrot.slane %v999_v8, 5  ;;  %v1005_v56 = vrot.slane %v1003_v12, 4  ;;  %v1011_v19 = vrot.slane %v1009_v13, 5  ;;  %v2960_v5 = vld [vmem:[%s4026_s17 + $0x28] sm:$0xe] }
  0xc5   : >> { %v2203_v18 = vsel %vm4022_vm10, %v2201_v54, %v2202_v1  ;;  %v2890_v20 = vrot.slane %v1163_v60, 9  ;;  %v997_v32 = vrot.slane %v996_v16, 4  ;;  %v1216_v34 = vrot.slane %v1164_v3, 5  ;;  %v2962_v54 = vld [vmem:[%s4026_s17 + $0x30] sm:$0xf] }
  0xc6   : >> { %v992_v30 = vsel %vm4064_vm13, %v987_v15, %v991_v61  ;;  %v3066_v31 = vcombine.low %v2200_v11, %v2203_v18  ;;  %v1006_v37 = vor.u32 %v1005_v56, %v1001_v17  ;;  %v1219_v38 = vrot.slane %v1165_v9, 5  ;;  %v2935_v61 = vld [vmem:[%s4026_s17 + $0x34] sm:$0xf] }
  0xc7   : >> { %2267 = vrot.lane.b32.xlu0 %v3065_v48, %s3388_s28  ;;  %v2883_v36 = vcombine.low %v982_v14, %v992_v30  ;;  %v1222_v39 = vrot.slane %v1166_v10, 5  ;;  %v1002_v41 = vsel %vm4064_vm13, %v997_v32, %v1001_v17  ;;  %v1217_v42 = vsel %vm4022_vm10, %v2890_v20, %v1216_v34  ;;  %v2963_v16 = vld [vmem:[%s4026_s17 + $0x34] sm:$0xf]  ;;  %v3304_v17 = vld [vmem:[%s4026_s17 + $0x28] sm:$0xff]  }
  0xc8   : >> { %v1218_v43 = vrot.slane %v1216_v34, 4  ;;  %v1225_v44 = vrot.slane %v1167_v29, 5  ;;  %v1007_v45 = vrot.slane %v1006_v37, 4  ;;  %v1221_v46 = vrot.slane %v1219_v38, 4  ;;  %v2964_v29 = vld [vmem:[%s4026_s17 + $0x38] sm:$0x1] }
  0xc9   : >> { %1129 = vrot.lane.b32.xlu1 %v2883_v36, %s3384_s24  ;;  %v1224_v47 = vrot.slane %v1222_v39, 4  ;;  %v1468_v48 = vshrl.u32 %v2932_v35, 16  ;;  %v1471_v51 = vshll.u32 %v2932_v35, 16  ;;  %v1477_v52 = vshll.u32 %v2933_v40, 16  ;;  %v3305_v35 = vld [vmem:[%s4026_s17 + $0x30] sm:$0xff]  }
  0xca   : >> { %v1220_v49 = vsel %vm4022_vm10, %v1218_v43, %v1219_v38  ;;  %v1481_v53 = vshrl.u32 %v2933_v40, 16  ;;  %v1012_v55 = vsel %vm4064_vm13, %v1007_v45, %v1011_v19  ;;  %v1223_v58 = vsel %vm4022_vm10, %v1221_v46, %v1222_v39 }
  0xcb   : >> { %2269 = vrot.lane.b32.xlu0 %v3066_v31, %s3388_s28  ;;  %v2895_v57 = vcombine.low %v1217_v42, %v1220_v49  ;;  %v1226_v60 = vsel %vm4022_vm10, %v1224_v47, %v1225_v44  ;;  %v2884_v63 = vcombine.low %v1002_v41, %v1012_v55  ;;  %v1470_v3 = vrot.slane %v1468_v48, 4  ;;  %v3018_v44 = vld [vmem:[%s4026_s17 + $0x3c] sm:$0xf] }
  0xcc   : >> { %v2896_v1 = vcombine.low %v1223_v58, %v1226_v60  ;;  %v1473_v4 = vrot.slane %v1471_v51, 5  ;;  %v1479_v8 = vrot.slane %v1477_v52, 5  ;;  %v1483_v9 = vrot.slane %v1481_v53, 4  ;;  %v3020_v58 = vld [vmem:[%s4026_s17 + $0x44] sm:$0xf] }
  0xcd   : >> { %v1487_v10 = vshll.u32 %v2934_v50, 16  ;;  %v1491_v11 = vshrl.u32 %v2934_v50, 16  ;;  %1131 = vrot.lane.b32.xlu1 %v2884_v63, %s3384_s24  ;;  %v1497_v13 = vshll.u32 %v2935_v61, 16  ;;  %v1501_v14 = vshrl.u32 %v2935_v61, 16 }
  0xce   : >> { %v1474_v12 = vor.u32 %v1473_v4, %v1470_v3  ;;  %v1507_v15 = vshll.u32 %v2936_v62, 16  ;;  %v1484_v18 = vor.u32 %v1483_v9, %v1479_v8  ;;  %v2976_v20 = vrot.slane %v2960_v5, 9  ;;  %v3021_v4 = vld [vmem:[%s4026_s17 + $0x48] sm:$0xf]  ;;  %v3022_v5 = vld [vmem:[%s4026_s17 + $0x4c] sm:$0x1] }
  0xcf   : >> { %1281 = vrot.lane.b32.xlu0 %v2895_v57, %s3383_s23  ;;  %v1489_v56 = vrot.slane %v1487_v10, 5  ;;  %v1493_v19 = vrot.slane %v1491_v11, 4  ;;  %v1499_v31 = vrot.slane %v1497_v13, 5  ;;  %v1503_v32 = vrot.slane %v1501_v14, 4  ;;  %v3019_v57 = vld [vmem:[%s4026_s17 + $0x40] sm:$0xf] }
  0xd0   : >> { %v1475_v30 = vrot.slane %v1474_v12, 4  ;;  %v1509_v34 = vrot.slane %v1507_v15, 5  ;;  %v1485_v36 = vrot.slane %v1484_v18, 4  ;;  %v1711_v38 = vrot.slane %v2961_v7, 5  ;;  %v3046_v11 = vld [vmem:[%s4026_s17 + $0x3c] sm:$0xe] }
  0xd1   : >> { %v1494_v37 = vor.u32 %v1493_v19, %v1489_v56  ;;  %v1714_v39 = vrot.slane %v2962_v54, 5  ;;  %1283 = vrot.lane.b32.xlu1 %v2896_v1, %s3383_s23  ;;  %v1504_v41 = vor.u32 %v1503_v32, %v1499_v31  ;;  %v1717_v42 = vrot.slane %v2963_v16, 5  ;;  %v3047_v54 = vld [vmem:[%s4026_s17 + $0x40] sm:$0xf]  ;;  %v3048_v16 = vld [vmem:[%s4026_s17 + $0x44] sm:$0xf] }
  0xd2   : >> { %v1480_v40 = vsel %vm4064_vm13, %v1475_v30, %v1479_v8  ;;  %v1720_v43 = vrot.slane %v2964_v29, 5  ;;  %v1490_v45 = vsel %vm4064_vm13, %v1485_v36, %v1489_v56  ;;  %v1712_v47 = vsel %vm4022_vm10, %v2976_v20, %v1711_v38  ;;  %v912_v29 = vld [vmem:[%s4026_s17 + $0x28] sm:$0xf] }
  0xd3   : >> { %1374 = vrot.lane.b32.xlu0 %v3304_v17, %s3381_s18  ;;  %v1495_v46 = vrot.slane %v1494_v37, 4  ;;  %v1713_v48 = vrot.slane %v1711_v38, 4  ;;  %v2949_v49 = vcombine.low %v1480_v40, %v1490_v45  ;;  %v1505_v50 = vrot.slane %v1504_v41, 4  ;;  %v3306_v17 = vld [vmem:[%s4026_s17 + $0x3c] sm:$0xff]  }
  0xd4   : >> { %v1716_v51 = vrot.slane %v1714_v39, 4  ;;  %v1719_v52 = vrot.slane %v1717_v42, 4  ;;  %v1963_v60 = vshrl.u32 %v3018_v44, 16  ;;  %v1966_v61 = vshll.u32 %v3018_v44, 16 }
  0xd5   : >> { %v1500_v53 = vsel %vm4064_vm13, %v1495_v46, %v1499_v31  ;;  %v1715_v55 = vsel %vm4022_vm10, %v1713_v48, %v1714_v39  ;;  %1376 = vrot.lane.b32.xlu1 %v3305_v35, %s3381_s18  ;;  %v1510_v62 = vsel %vm4064_vm13, %v1505_v50, %v1509_v34  ;;  %v1972_v12 = vshll.u32 %v3019_v57, 16  ;;  %v913_v35 = vld [vmem:[%s4026_s17 + $0x2c] sm:$0xf]  ;;  %v3307_v48 = vld [vmem:[%s4026_s17 + $0x44] sm:$0xff]  }
  0xd6   : >> { %v2981_v63 = vcombine.low %v1712_v47, %v1715_v55  ;;  %v1718_v1 = vsel %vm4022_vm10, %v1716_v51, %v1717_v42  ;;  %v1721_v3 = vsel %vm4022_vm10, %v1719_v52, %v1720_v43  ;;  %v2950_v7 = vcombine.low %v1500_v53, %v1510_v62  ;;  %v914_v55 = vld [vmem:[%s4026_s17 + $0x30] sm:$0xf] }
  0xd7   : >> { %1627 = vrot.lane.b32.xlu0 %v2949_v49, %s3385_s25  ;;  %v2982_v8 = vcombine.low %v1718_v1, %v1721_v3  ;;  %v1965_v9 = vrot.slane %v1963_v60, 4  ;;  %v1968_v10 = vrot.slane %v1966_v61, 5  ;;  %v1976_v13 = vshrl.u32 %v3019_v57, 16  ;;  %v3049_v3 = vld [vmem:[%s4026_s17 + $0x48] sm:$0xf] }
  0xd8   : >> { %v1982_v14 = vshll.u32 %v3020_v58, 16  ;;  %v1986_v15 = vshrl.u32 %v3020_v58, 16  ;;  %v1992_v56 = vshll.u32 %v3021_v4, 16  ;;  %v1996_v19 = vshrl.u32 %v3021_v4, 16 }
  0xd9   : >> { %v1969_v18 = vor.u32 %v1968_v10, %v1965_v9  ;;  %v2002_v20 = vshll.u32 %v3022_v5, 16  ;;  %1629 = vrot.lane.b32.xlu1 %v2950_v7, %s3385_s25  ;;  %v1974_v30 = vrot.slane %v1972_v12, 5  ;;  %v1978_v31 = vrot.slane %v1976_v13, 4  ;;  %v3050_v9 = vld [vmem:[%s4026_s17 + $0x4c] sm:$0x1] }
  0xda   : >> { %v1984_v32 = vrot.slane %v1982_v14, 5  ;;  %v1988_v34 = vrot.slane %v1986_v15, 4  ;;  %v1994_v37 = vrot.slane %v1992_v56, 5  ;;  %v1998_v38 = vrot.slane %v1996_v19, 4  ;;  %v915_v10 = vld [vmem:[%s4026_s17 + $0x34] sm:$0xf] }
  0xdb   : >> { %1776 = vrot.lane.b32.xlu0 %v2981_v63, %s3382_s22  ;;  %v1970_v36 = vrot.slane %v1969_v18, 4  ;;  %v2004_v39 = vrot.slane %v2002_v20, 5  ;;  %v1979_v40 = vor.u32 %v1978_v31, %v1974_v30  ;;  %v3062_v42 = vrot.slane %v3046_v11, 9  ;;  %v916_v14 = vld [vmem:[%s4026_s17 + $0x38] sm:$0x1] }
  0xdc   : >> { %v1989_v41 = vor.u32 %v1988_v34, %v1984_v32  ;;  %v2206_v43 = vrot.slane %v3047_v54, 5  ;;  %v1999_v45 = vor.u32 %v1998_v38, %v1994_v37  ;;  %v2209_v46 = vrot.slane %v3048_v16, 5  ;;  %v1168_v56 = vld [vmem:[%s4026_s17 + $0x28] sm:$0xe]  ;;  %v1169_v31 = vld [vmem:[%s4026_s17 + $0x2c] sm:$0xf] }
  0xdd   : >> { %v1975_v44 = vsel %vm4064_vm13, %v1970_v36, %v1974_v30  ;;  %v1014_v47 = vshrl.u32 %v912_v29, 16  ;;  %1778 = vrot.lane.b32.xlu1 %v2982_v8, %s3382_s22  ;;  %v1980_v49 = vrot.slane %v1979_v40, 4  ;;  %v1017_v58 = vshll.u32 %v912_v29, 16 }
  0xde   : >> { %v1990_v50 = vrot.slane %v1989_v41, 4  ;;  %v2207_v51 = vsel %vm4022_vm10, %v3062_v42, %v2206_v43  ;;  %v2208_v52 = vrot.slane %v2206_v43, 4  ;;  %v2000_v53 = vrot.slane %v1999_v45, 4  ;;  %v1171_v42 = vld [vmem:[%s4026_s17 + $0x34] sm:$0xf] }
  0xdf   : >> { %1869 = vrot.lane.b32.xlu0 %v3306_v17, %s3386_s26  ;;  %v1016_v57 = vrot.slane %v1014_v47, 4  ;;  %v1023_v60 = vshll.u32 %v913_v35, 16  ;;  %v1985_v61 = vsel %vm4064_vm13, %v1980_v49, %v1984_v32  ;;  %v1027_v1 = vshrl.u32 %v913_v35, 16  ;;  %v1172_v47 = vld [vmem:[%s4026_s17 + $0x38] sm:$0x1] }
  0xe0   : >> { %v1995_v62 = vsel %vm4064_vm13, %v1990_v50, %v1994_v37  ;;  %v2210_v63 = vsel %vm4022_vm10, %v2208_v52, %v2209_v46  ;;  %v3035_v4 = vcombine.low %v1975_v44, %v1985_v61  ;;  %v2005_v5 = vsel %vm4064_vm13, %v2000_v53, %v2004_v39  ;;  %v1170_v37 = vld [vmem:[%s4026_s17 + $0x30] sm:$0xf] }
  0xe1   : >> { %v3067_v7 = vcombine.low %v2207_v51, %v2210_v63  ;;  %v1019_v8 = vrot.slane %v1017_v58, 5  ;;  %1871 = vrot.lane.b32.xlu1 %v3307_v48, %s3386_s26  ;;  %v3036_v11 = vcombine.low %v1995_v62, %v2005_v5  ;;  %v1025_v54 = vrot.slane %v1023_v60, 5  ;;  %v2937_v48 = vld [vmem:[%s4026_s17 + $0x3c] sm:$0xf]  ;;  %v2938_v63 = vld [vmem:[%s4026_s17 + $0x40] sm:$0xf] }
  0xe2   : >> { %v1029_v12 = vrot.slane %v1027_v1, 4  ;;  %v1033_v13 = vshll.u32 %v914_v55, 16  ;;  %v1037_v16 = vshrl.u32 %v914_v55, 16  ;;  %v2211_v17 = vrot.slane %v2209_v46, 4 }
  0xe3   : >> { %2122 = vrot.lane.b32.xlu0 %v3035_v4, %s3387_s27  ;;  %v1020_v15 = vor.u32 %v1019_v8, %v1016_v57  ;;  %v2212_v18 = vrot.slane %v3049_v3, 5  ;;  %v2215_v29 = vrot.slane %v3050_v9, 5  ;;  %v1043_v30 = vshll.u32 %v915_v10, 16  ;;  %v2939_v8 = vld [vmem:[%s4026_s17 + $0x44] sm:$0xf] }
  0xe4   : >> { %v1030_v19 = vor.u32 %v1029_v12, %v1025_v54  ;;  %v1035_v20 = vrot.slane %v1033_v13, 5  ;;  %v1039_v36 = vrot.slane %v1037_v16, 4  ;;  %v1047_v40 = vshrl.u32 %v915_v10, 16  ;;  %v2940_v9 = vld [vmem:[%s4026_s17 + $0x48] sm:$0xf] }
  0xe5   : >> { %v1021_v32 = vrot.slane %v1020_v15, 4  ;;  %v2213_v34 = vsel %vm4022_vm10, %v2211_v17, %v2212_v18  ;;  %v2214_v35 = vrot.slane %v2212_v18, 4  ;;  %2124 = vrot.lane.b32.xlu1 %v3036_v11, %s3387_s27  ;;  %v1045_v39 = vrot.slane %v1043_v30, 5  ;;  %v2941_v13 = vld [vmem:[%s4026_s17 + $0x4c] sm:$0x1] }
  0xe6   : >> { %v1031_v38 = vrot.slane %v1030_v19, 4  ;;  %v1053_v41 = vshll.u32 %v916_v14, 16  ;;  %v1040_v45 = vor.u32 %v1039_v36, %v1035_v20  ;;  %v2891_v46 = vrot.slane %v1168_v56, 9  ;;  %v3308_v36 = vld [vmem:[%s4026_s17 + $0x3c] sm:$0xff]  }
  0xe7   : >> { %2271 = vrot.lane.b32.xlu0 %v3067_v7, %s3388_s28  ;;  %v1026_v43 = vsel %vm4064_vm13, %v1021_v32, %v1025_v54  ;;  %v2216_v44 = vsel %vm4022_vm10, %v2214_v35, %v2215_v29  ;;  %v1049_v51 = vrot.slane %v1047_v40, 4  ;;  %v1229_v57 = vrot.slane %v1169_v31, 5  ;;  %v2965_v29 = vld [vmem:[%s4026_s17 + $0x3c] sm:$0xe]  ;;  %v2966_v35 = vld [vmem:[%s4026_s17 + $0x40] sm:$0xf] }
  0xe8   : >> { %v1036_v49 = vsel %vm4064_vm13, %v1031_v38, %v1035_v20  ;;  %v3068_v50 = vcombine.low %v2213_v34, %v2216_v44  ;;  %v1055_v52 = vrot.slane %v1053_v41, 5  ;;  %v1041_v55 = vrot.slane %v1040_v45, 4  ;;  %v2967_v41 = vld [vmem:[%s4026_s17 + $0x44] sm:$0xf] }
  0xe9   : >> { %v2885_v53 = vcombine.low %v1026_v43, %v1036_v49  ;;  %v1232_v58 = vrot.slane %v1170_v37, 5  ;;  %v1050_v60 = vor.u32 %v1049_v51, %v1045_v39  ;;  %v1235_v61 = vrot.slane %v1171_v42, 5 }
  0xea   : >> { %v1238_v62 = vrot.slane %v1172_v47, 5  ;;  %v1512_v1 = vshrl.u32 %v2937_v48, 16  ;;  %v1046_v3 = vsel %vm4064_vm13, %v1041_v55, %v1045_v39  ;;  %v1230_v4 = vsel %vm4022_vm10, %v2891_v46, %v1229_v57  ;;  %v2968_v46 = vld [vmem:[%s4026_s17 + $0x48] sm:$0xf] }
  0xeb   : >> { %1133 = vrot.lane.b32.xlu1 %v2885_v53, %s3384_s24  ;;  %2273 = vrot.lane.b32.xlu0 %v3068_v50, %s3388_s28  ;;  %v1231_v5 = vrot.slane %v1229_v57, 4  ;;  %v1234_v7 = vrot.slane %v1232_v58, 4  ;;  %v1051_v10 = vrot.slane %v1050_v60, 4  ;;  %v1237_v11 = vrot.slane %v1235_v61, 4 }
  0xec   : >> { %v1514_v54 = vrot.slane %v1512_v1, 4  ;;  %v1515_v12 = vshll.u32 %v2937_v48, 16  ;;  %v1521_v16 = vshll.u32 %v2938_v63, 16  ;;  %v1525_v17 = vshrl.u32 %v2938_v63, 16  ;;  %v3023_v63 = vld [vmem:[%s4026_s17 + $0x50] sm:$0xf] }
  0xed   : >> { %v1233_v14 = vsel %vm4022_vm10, %v1231_v5, %v1232_v58  ;;  %v1236_v15 = vsel %vm4022_vm10, %v1234_v7, %v1235_v61  ;;  %v1056_v18 = vsel %vm4064_vm13, %v1051_v10, %v1055_v52  ;;  %v1239_v19 = vsel %vm4022_vm10, %v1237_v11, %v1238_v62  ;;  %v2969_v61 = vld [vmem:[%s4026_s17 + $0x4c] sm:$0x1]  ;;  %v3309_v1 = vld [vmem:[%s4026_s17 + $0x44] sm:$0xff]  }
  0xee   : >> { %v2897_v56 = vcombine.low %v1230_v4, %v1233_v14  ;;  %v1517_v20 = vrot.slane %v1515_v12, 5  ;;  %v2886_v30 = vcombine.low %v1046_v3, %v1056_v18  ;;  %v2898_v31 = vcombine.low %v1236_v15, %v1239_v19  ;;  %v3025_v12 = vld [vmem:[%s4026_s17 + $0x58] sm:$0xf] }
  0xef   : >> { %v1523_v32 = vrot.slane %v1521_v16, 5  ;;  %v1527_v34 = vrot.slane %v1525_v17, 4  ;;  %v1531_v38 = vshll.u32 %v2939_v8, 16  ;;  %v1535_v39 = vshrl.u32 %v2939_v8, 16  ;;  %v3024_v8 = vld [vmem:[%s4026_s17 + $0x54] sm:$0xf] }
  0xf0   : >> { %1285 = vrot.lane.b32.xlu0 %v2897_v56, %s3383_s23  ;;  %v1518_v37 = vor.u32 %v1517_v20, %v1514_v54  ;;  %v1541_v40 = vshll.u32 %v2940_v9, 16  ;;  %1135 = vrot.lane.b32.xlu1 %v2886_v30, %s3384_s24  ;;  %v1545_v43 = vshrl.u32 %v2940_v9, 16  ;;  %v1551_v44 = vshll.u32 %v2941_v13, 16  ;;  %v3026_v20 = vld [vmem:[%s4026_s17 + $0x5c] sm:$0xf] }
  0xf1   : >> { %v1528_v42 = vor.u32 %v1527_v34, %v1523_v32  ;;  %v2977_v45 = vrot.slane %v2965_v29, 9  ;;  %v1533_v48 = vrot.slane %v1531_v38, 5  ;;  %v1537_v49 = vrot.slane %v1535_v39, 4  ;;  %v3027_v34 = vld [vmem:[%s4026_s17 + $0x60] sm:$0x1] }
  0xf2   : >> { %v1519_v47 = vrot.slane %v1518_v37, 4  ;;  %v1543_v50 = vrot.slane %v1541_v40, 5  ;;  %v1547_v52 = vrot.slane %v1545_v43, 4  ;;  %v1553_v53 = vrot.slane %v1551_v44, 5  ;;  %v3052_v40 = vld [vmem:[%s4026_s17 + $0x54] sm:$0xf] }
  0xf3   : >> { %v1529_v51 = vrot.slane %v1528_v42, 4  ;;  %v1724_v55 = vrot.slane %v2966_v35, 5  ;;  %v1538_v58 = vor.u32 %v1537_v49, %v1533_v48  ;;  %v1727_v60 = vrot.slane %v2967_v41, 5  ;;  %v3051_v35 = vld [vmem:[%s4026_s17 + $0x50] sm:$0xe] }
  0xf4   : >> { %1378 = vrot.lane.b32.xlu0 %v3308_v36, %s3381_s18  ;;  %v1524_v57 = vsel %vm4064_vm13, %v1519_v47, %v1523_v32  ;;  %v1730_v62 = vrot.slane %v2968_v46, 5  ;;  %1287 = vrot.lane.b32.xlu1 %v2898_v31, %s3383_s23  ;;  %v1548_v4 = vor.u32 %v1547_v52, %v1543_v50  ;;  %v1733_v15 = vrot.slane %v2969_v61, 5  ;;  %v4303_v41 = vld [vmem:[%s4026_s17 + $0x58] sm:$0xf]  ;;  %v917_v42 = vld [vmem:[%s4026_s17 + $0x3c] sm:$0xf] }
  0xf5   : >> { %v1534_v3 = vsel %vm4064_vm13, %v1529_v51, %v1533_v48  ;;  %v1725_v5 = vsel %vm4022_vm10, %v2977_v45, %v1724_v55  ;;  %v1726_v7 = vrot.slane %v1724_v55, 4  ;;  %v1539_v10 = vrot.slane %v1538_v58, 4  ;;  %v3310_v47 = vld [vmem:[%s4026_s17 + $0x50] sm:$0xff]  }
  0xf6   : >> { %v2951_v9 = vcombine.low %v1524_v57, %v1534_v3  ;;  %v1729_v11 = vrot.slane %v1727_v60, 4  ;;  %v1732_v54 = vrot.slane %v1730_v62, 4  ;;  %v1549_v13 = vrot.slane %v1548_v4, 4  ;;  %v918_v4 = vld [vmem:[%s4026_s17 + $0x40] sm:$0xf] }
  0xf7   : >> { %v1728_v14 = vsel %vm4022_vm10, %v1726_v7, %v1727_v60  ;;  %v2007_v16 = vshrl.u32 %v3023_v63, 16  ;;  %v1544_v17 = vsel %vm4064_vm13, %v1539_v10, %v1543_v50  ;;  %v2010_v19 = vshll.u32 %v3023_v63, 16  ;;  %v919_v10 = vld [vmem:[%s4026_s17 + $0x44] sm:$0xf] }
  0xf8   : >> { %1631 = vrot.lane.b32.xlu0 %v2951_v9, %s3385_s25  ;;  %v2983_v18 = vcombine.low %v1725_v5, %v1728_v14  ;;  %v1731_v56 = vsel %vm4022_vm10, %v1729_v11, %v1730_v62  ;;  %1380 = vrot.lane.b32.xlu1 %v3309_v1, %s3381_s18  ;;  %v1554_v29 = vsel %vm4064_vm13, %v1549_v13, %v1553_v53  ;;  %v2016_v32 = vshll.u32 %v3024_v8, 16 }
  0xf9   : >> { %v1734_v30 = vsel %vm4022_vm10, %v1732_v54, %v1733_v15  ;;  %v2009_v31 = vrot.slane %v2007_v16, 4  ;;  %v2952_v36 = vcombine.low %v1544_v17, %v1554_v29  ;;  %v2012_v38 = vrot.slane %v2010_v19, 5  ;;  %v3311_v54 = vld [vmem:[%s4026_s17 + $0x58] sm:$0xff]   ;;  %v3055_v17 = vld [vmem:[%s4026_s17 + $0x60] sm:$0x1] }
  0xfa   : >> { %v2984_v37 = vcombine.low %v1731_v56, %v1734_v30  ;;  %v2020_v39 = vshrl.u32 %v3024_v8, 16  ;;  %v2018_v43 = vrot.slane %v2016_v32, 5  ;;  %v2026_v44 = vshll.u32 %v3025_v12, 16  ;;  %v3054_v16 = vld [vmem:[%s4026_s17 + $0x5c] sm:$0xf] }
  0xfb   : >> { %v2030_v45 = vshrl.u32 %v3025_v12, 16  ;;  %v2036_v46 = vshll.u32 %v3026_v20, 16  ;;  %v2013_v48 = vor.u32 %v2012_v38, %v2009_v31  ;;  %v2040_v50 = vshrl.u32 %v3026_v20, 16  ;;  %v920_v29 = vld [vmem:[%s4026_s17 + $0x48] sm:$0xf] }
  0xfc   : >> { %1780 = vrot.lane.b32.xlu0 %v2983_v18, %s3382_s22  ;;  %v2022_v49 = vrot.slane %v2020_v39, 4  ;;  %v2046_v51 = vshll.u32 %v3027_v34, 16  ;;  %1633 = vrot.lane.b32.xlu1 %v2952_v36, %s3385_s25  ;;  %v2028_v52 = vrot.slane %v2026_v44, 5  ;;  %v3063_v57 = vrot.slane %v3051_v35, 9  ;;  %v921_v39 = vld [vmem:[%s4026_s17 + $0x4c] sm:$0x1] }
  0xfd   : >> { %v2032_v53 = vrot.slane %v2030_v45, 4  ;;  %v2038_v55 = vrot.slane %v2036_v46, 5  ;;  %v2014_v58 = vrot.slane %v2013_v48, 4  ;;  %v2042_v61 = vrot.slane %v2040_v50, 4  ;;  %v1173_v44 = vld [vmem:[%s4026_s17 + $0x3c] sm:$0xe] }
  0xfe   : >> { %v2023_v60 = vor.u32 %v2022_v49, %v2018_v43  ;;  %v2048_v62 = vrot.slane %v2046_v51, 5  ;;  %v2219_v1 = vrot.slane %v3052_v40, 5  ;;  %v2222_v3 = vrot.slane %v4303_v41, 5  ;;  %v1174_v45 = vld [vmem:[%s4026_s17 + $0x40] sm:$0xf] }
  0xff   : >> { %v2033_v63 = vor.u32 %v2032_v53, %v2028_v52  ;;  %v1058_v5 = vshrl.u32 %v917_v42, 16  ;;  %v2019_v7 = vsel %vm4064_vm13, %v2014_v58, %v2018_v43  ;;  %v2043_v9 = vor.u32 %v2042_v61, %v2038_v55  ;;  %v1175_v61 = vld [vmem:[%s4026_s17 + $0x44] sm:$0xf] }
 0x100   : >> { %1873 = vrot.lane.b32.xlu0 %v3310_v47, %s3386_s26  ;;  %v2024_v8 = vrot.slane %v2023_v60, 4  ;;  %v1061_v11 = vshll.u32 %v917_v42, 16  ;;  %1782 = vrot.lane.b32.xlu1 %v2984_v37, %s3382_s22  ;;  %v2220_v13 = vsel %vm4022_vm10, %v3063_v57, %v2219_v1  ;;  %v2221_v14 = vrot.slane %v2219_v1, 4 }
 0x101   : >> { %v2034_v12 = vrot.slane %v2033_v63, 4  ;;  %v1060_v15 = vrot.slane %v1058_v5, 4  ;;  %v2044_v56 = vrot.slane %v2043_v9, 4  ;;  %v1067_v20 = vshll.u32 %v918_v4, 16  ;;  %v1177_v63 = vld [vmem:[%s4026_s17 + $0x4c] sm:$0x1] }
 0x102   : >> { %v2029_v18 = vsel %vm4064_vm13, %v2024_v8, %v2028_v52  ;;  %v1063_v19 = vrot.slane %v1061_v11, 5  ;;  %v2223_v32 = vsel %vm4022_vm10, %v2221_v14, %v2222_v3  ;;  %v1071_v34 = vshrl.u32 %v918_v4, 16 }
 0x103   : >> { %v3037_v30 = vcombine.low %v2019_v7, %v2029_v18  ;;  %v2039_v31 = vsel %vm4064_vm13, %v2034_v12, %v2038_v55  ;;  %v2049_v35 = vsel %vm4064_vm13, %v2044_v56, %v2048_v62  ;;  %v3069_v36 = vcombine.low %v2220_v13, %v2223_v32  ;;  %v1176_v62 = vld [vmem:[%s4026_s17 + $0x48] sm:$0xf]  ;;  %v2942_v7 = vld [vmem:[%s4026_s17 + $0x50] sm:$0xf] }
 0x104   : >> { %v1064_v37 = vor.u32 %v1063_v19, %v1060_v15  ;;  %v1069_v38 = vrot.slane %v1067_v20, 5  ;;  %1875 = vrot.lane.b32.xlu1 %v3311_v54, %s3386_s26  ;;  %v3038_v40 = vcombine.low %v2039_v31, %v2049_v35  ;;  %v1073_v41 = vrot.slane %v1071_v34, 4  ;;  %v2943_v15 = vld [vmem:[%s4026_s17 + $0x54] sm:$0xf] }
 0x105   : >> { %2126 = vrot.lane.b32.xlu0 %v3037_v30, %s3387_s27  ;;  %v1077_v42 = vshll.u32 %v919_v10, 16  ;;  %v1081_v43 = vshrl.u32 %v919_v10, 16  ;;  %v2224_v47 = vrot.slane %v2222_v3, 4  ;;  %v2225_v48 = vrot.slane %v3054_v16, 5 }
 0x106   : >> { %v1065_v46 = vrot.slane %v1064_v37, 4  ;;  %v2228_v49 = vrot.slane %v3055_v17, 5  ;;  %v1074_v50 = vor.u32 %v1073_v41, %v1069_v38  ;;  %v1087_v53 = vshll.u32 %v920_v29, 16 }
 0x107   : >> { %v1079_v51 = vrot.slane %v1077_v42, 5  ;;  %v1083_v52 = vrot.slane %v1081_v43, 4  ;;  %v2226_v57 = vsel %vm4022_vm10, %v2224_v47, %v2225_v48  ;;  %v2227_v58 = vrot.slane %v2225_v48, 4 }
 0x108   : >> { %v1070_v55 = vsel %vm4064_vm13, %v1065_v46, %v1069_v38  ;;  %v1091_v60 = vshrl.u32 %v920_v29, 16  ;;  %2128 = vrot.lane.b32.xlu1 %v3038_v40, %s3387_s27  ;;  %v1075_v1 = vrot.slane %v1074_v50, 4  ;;  %v1089_v4 = vrot.slane %v1087_v53, 5  ;;  %v2946_v46 = vld [vmem:[%s4026_s17 + $0x60] sm:$0x1]  ;;  %v3312_v50 = vld [vmem:[%s4026_s17 + $0x50] sm:$0xff]  }
 0x109   : >> { %2275 = vrot.lane.b32.xlu0 %v3069_v36, %s3388_s28  ;;  %v1084_v3 = vor.u32 %v1083_v52, %v1079_v51  ;;  %v1097_v5 = vshll.u32 %v921_v39, 16  ;;  %v2229_v8 = vsel %vm4022_vm10, %v2227_v58, %v2228_v49  ;;  %v2892_v10 = vrot.slane %v1173_v44, 9  ;;  %v2944_v39 = vld [vmem:[%s4026_s17 + $0x58] sm:$0xf]  ;;  %v2970_v52 = vld [vmem:[%s4026_s17 + $0x50] sm:$0xe] }
 0x10a   : >> { %v1093_v9 = vrot.slane %v1091_v60, 4  ;;  %v1242_v11 = vrot.slane %v1174_v45, 5  ;;  %v1080_v54 = vsel %vm4064_vm13, %v1075_v1, %v1079_v51  ;;  %v3070_v12 = vcombine.low %v2226_v57, %v2229_v8  ;;  %v2945_v45 = vld [vmem:[%s4026_s17 + $0x5c] sm:$0xf] }
 0x10b   : >> { %v1085_v13 = vrot.slane %v1084_v3, 4  ;;  %v1099_v14 = vrot.slane %v1097_v5, 5  ;;  %v2887_v16 = vcombine.low %v1070_v55, %v1080_v54  ;;  %v1245_v20 = vrot.slane %v1175_v61, 5  ;;  %v2971_v61 = vld [vmem:[%s4026_s17 + $0x54] sm:$0xf] }
 0x10c   : >> { %v1094_v17 = vor.u32 %v1093_v9, %v1089_v4  ;;  %v1243_v18 = vsel %vm4022_vm10, %v2892_v10, %v1242_v11  ;;  %v1244_v56 = vrot.slane %v1242_v11, 4  ;;  %v1248_v29 = vrot.slane %v1176_v62, 5  ;;  %v2972_v62 = vld [vmem:[%s4026_s17 + $0x58] sm:$0xf]  ;;  %v2973_v5 = vld [vmem:[%s4026_s17 + $0x5c] sm:$0xf] }
 0x10d   : >> { %2277 = vrot.lane.b32.xlu0 %v3070_v12, %s3388_s28  ;;  %v1090_v19 = vsel %vm4064_vm13, %v1085_v13, %v1089_v4  ;;  %v1251_v30 = vrot.slane %v1177_v63, 5  ;;  %1137 = vrot.lane.b32.xlu1 %v2887_v16, %s3384_s24  ;;  %v1556_v32 = vshrl.u32 %v2942_v7, 16  ;;  %v1559_v34 = vshll.u32 %v2942_v7, 16  ;;  %v4369_v53 = vpop.permute.xlu1 %1372  ;;  %v2974_v11 = vld [vmem:[%s4026_s17 + $0x60] sm:$0x1] }
 0x10e   : >> { %v1095_v31 = vrot.slane %v1094_v17, 4  ;;  %v1565_v35 = vshll.u32 %v2943_v15, 16  ;;  %v1246_v36 = vsel %vm4022_vm10, %v1244_v56, %v1245_v20  ;;  %v1247_v37 = vrot.slane %v1245_v20, 4  ;;  %v4377_v54 = vpop.permute.xlu0 %1370 }
 0x10f   : >> { %v1250_v38 = vrot.slane %v1248_v29, 4  ;;  %v1569_v40 = vshrl.u32 %v2943_v15, 16  ;;  %v2899_v42 = vcombine.low %v1243_v18, %v1246_v36  ;;  %v1558_v43 = vrot.slane %v1556_v32, 4 }
 0x110   : >> { %v1100_v41 = vsel %vm4064_vm13, %v1095_v31, %v1099_v14  ;;  %v1561_v44 = vrot.slane %v1559_v34, 5  ;;  %v1249_v48 = vsel %vm4022_vm10, %v1247_v37, %v1248_v29  ;;  %v1567_v51 = vrot.slane %v1565_v35, 5  ;;  %v3028_v34 = vld [vmem:[%s4026_s17 + $0x64] sm:$0xf] }
 0x111   : >> { %v2888_v47 = vcombine.low %v1090_v19, %v1100_v41  ;;  %v1252_v49 = vsel %vm4022_vm10, %v1250_v38, %v1251_v30  ;;  %1289 = vrot.lane.b32.xlu0 %v2899_v42, %s3383_s23  ;;  %v1571_v58 = vrot.slane %v1569_v40, 4  ;;  %v1575_v60 = vshll.u32 %v2944_v39, 16  ;;  %v3313_v19 = vld [vmem:[%s4026_s17 + $0x58] sm:$0xff]  }
 0x112   : >> { %v2900_v55 = vcombine.low %v1249_v48, %v1252_v49  ;;  %v1562_v57 = vor.u32 %v1561_v44, %v1558_v43  ;;  %v1579_v63 = vshrl.u32 %v2944_v39, 16  ;;  %v1585_v1 = vshll.u32 %v2945_v45, 16  ;;  %v3029_v39 = vld [vmem:[%s4026_s17 + $0x68] sm:$0xf] }
 0x113   : >> { %1139 = vrot.lane.b32.xlu1 %v2888_v47, %s3384_s24  ;;  %v1589_v3 = vshrl.u32 %v2945_v45, 16  ;;  %v1595_v4 = vshll.u32 %v2946_v46, 16  ;;  %v1572_v8 = vor.u32 %v1571_v58, %v1567_v51  ;;  %v1577_v9 = vrot.slane %v1575_v60, 5  ;;  %v3030_v47 = vld [vmem:[%s4026_s17 + $0x6c] sm:$0xf] }
 0x114   : >> { %v1563_v7 = vrot.slane %v1562_v57, 4  ;;  %v2978_v10 = vrot.slane %v2970_v52, 9  ;;  %v1581_v12 = vrot.slane %v1579_v63, 4  ;;  %v1587_v13 = vrot.slane %v1585_v1, 5  ;;  %v3318_v52 = vld [vmem:[%s4026_s17 + $0x14] sm:$0xff]   ;;  %v3320_v57 = vld [vmem:[%s4026_s17 + $0x28] sm:$0xff]  }
 0x115   : >> { %v1591_v14 = vrot.slane %v1589_v3, 4  ;;  %v1597_v15 = vrot.slane %v1595_v4, 5  ;;  %1382 = vrot.lane.b32.xlu0 %v3312_v50, %s3381_s18  ;;  %v1573_v17 = vrot.slane %v1572_v8, 4  ;;  %v1737_v18 = vrot.slane %v2971_v61, 5  ;;  %v4398_v46 = vpop.permute.xlu0 %1772  ;;  %v3316_v50 = vld [vmem:[%s4026_s17] sm:$0xff]   ;;  %v3321_v1 = vld [vmem:[%s4026_s17 + $0x30] sm:$0xff]  }
 0x116   : >> { %v1568_v16 = vsel %vm4064_vm13, %v1563_v7, %v1567_v51  ;;  %v1740_v56 = vrot.slane %v2972_v62, 5  ;;  %v1582_v20 = vor.u32 %v1581_v12, %v1577_v9  ;;  %v1743_v30 = vrot.slane %v2973_v5, 5  ;;  %v4384_v32 = vpop.permute.xlu1 %1277  ;;  %v3317_v51 = vld [vmem:[%s4026_s17 + $0x8] sm:$0xff]   ;;  %v3031_v63 = vld [vmem:[%s4026_s17 + $0x70] sm:$0xf]  ;;  %894 = vst.msk [vmem:[#allocation3] sm:$0xff] %vm893_vm14, %v3316_v50 }
 0x117   : >> { %1291 = vrot.lane.b32.xlu1 %v2900_v55, %s3383_s23  ;;  %v1592_v29 = vor.u32 %v1591_v14, %v1587_v13  ;;  %v1746_v31 = vrot.slane %v2974_v11, 5  ;;  %v1578_v35 = vsel %vm4064_vm13, %v1573_v17, %v1577_v9  ;;  %v1738_v36 = vsel %vm4022_vm10, %v2978_v10, %v1737_v18  ;;  %v3319_v55 = vld [vmem:[%s4026_s17 + $0x1c] sm:$0xff]   ;;  %v3032_v8 = vld [vmem:[%s4026_s17 + $0x74] sm:$0x1]  ;;  %v3323_v10 = vld [vmem:[%s4026_s17 + $0x44] sm:$0xff]   ;;  %895 = vst.msk [vmem:[#allocation3 + $0x8] sm:$0xff] %vm893_vm14, %v3317_v51 }
 0x118   : >> { %v1739_v37 = vrot.slane %v1737_v18, 4  ;;  %v1742_v38 = vrot.slane %v1740_v56, 4  ;;  %v2953_v40 = vcombine.low %v1568_v16, %v1578_v35  ;;  %v1583_v41 = vrot.slane %v1582_v20, 4  ;;  %v3322_v9 = vld [vmem:[%s4026_s17 + $0x3c] sm:$0xff]   ;;  %v3056_v16 = vld [vmem:[%s4026_s17 + $0x64] sm:$0xe] }
 0x119   : >> { %v1593_v42 = vrot.slane %v1592_v29, 4  ;;  %v1745_v43 = vrot.slane %v1743_v30, 4  ;;  %v2051_v48 = vshrl.u32 %v3028_v34, 16  ;;  %v2054_v49 = vshll.u32 %v3028_v34, 16  ;;  %v3314_v17 = vld [vmem:[%s4026_s17 + $0x64] sm:$0xff]   ;;  %896 = vst.msk [vmem:[#allocation3 + $0x10] sm:$0xff] %vm893_vm14, %v3318_v52 }
 0x11a   : >> { %v1741_v44 = vsel %vm4022_vm10, %v1739_v37, %v1740_v56  ;;  %v4396_v45 = vsel %vm4022_vm10, %v1742_v38, %v1743_v30  ;;  %1635 = vrot.lane.b32.xlu0 %v2953_v40, %s3385_s25  ;;  %v1588_v58 = vsel %vm4064_vm13, %v1583_v41, %v1587_v13  ;;  %v2060_v62 = vshll.u32 %v3029_v39, 16  ;;  %v3057_v29 = vld [vmem:[%s4026_s17 + $0x68] sm:$0xf]  ;;  %v3058_v35 = vld [vmem:[%s4026_s17 + $0x6c] sm:$0xf]  ;;  %897 = vst.msk [vmem:[#allocation3 + $0x18] sm:$0xff] %vm893_vm14, %v3319_v55 }
 0x11b   : >> { %1384 = vrot.lane.b32.xlu1 %v3313_v19, %s3381_s18  ;;  %v1598_v60 = vsel %vm4064_vm13, %v1593_v42, %v1597_v15  ;;  %v2985_v61 = vcombine.low %v1738_v36, %v1741_v44  ;;  %v1747_v4 = vsel %vm4022_vm10, %v1745_v43, %v1746_v31  ;;  %v2053_v5 = vrot.slane %v2051_v48, 4  ;;  %v4422_v15 = vpop.permute.xlu1 %1279  ;;  %v3059_v41 = vld [vmem:[%s4026_s17 + $0x70] sm:$0xf]  ;;  %898 = vst.msk [vmem:[#allocation3 + $0x20] sm:$0xff] %vm893_vm14, %v3320_v57  ;;  %v3060_v44 = vld [vmem:[%s4026_s17 + $0x74] sm:$0x1] }
 0x11c   : >> { %v2954_v3 = vcombine.low %v1588_v58, %v1598_v60  ;;  %v2056_v7 = vrot.slane %v2054_v49, 5  ;;  %v2986_v11 = vcombine.low %v4396_v45, %v1747_v4  ;;  %v4420_v12 = vrot.slane %v2060_v62, 5  ;;  %899 = vst.msk [vmem:[#allocation3 + $0x28] sm:$0xff] %vm893_vm14, %v3321_v1  ;;  %900 = vst.msk [vmem:[#allocation3 + $0x30] sm:$0xff] %vm893_vm14, %v3322_v9  ;;  %v3315_v50 = vld [vmem:[%s4026_s17 + $0x6c] sm:$0xff]  }
 0x11d   : >> { %v2064_v13 = vshrl.u32 %v3029_v39, 16  ;;  %v2070_v14 = vshll.u32 %v3030_v47, 16  ;;  %v2074_v56 = vshrl.u32 %v3030_v47, 16  ;;  %v2080_v19 = vshll.u32 %v3031_v63, 16  ;;  %901 = vst.msk [vmem:[#allocation3 + $0x38] sm:$0xff] %vm893_vm14, %v3323_v10 }
 0x11e   : >> { %v2057_v18 = vor.u32 %v2056_v7, %v2053_v5  ;;  %v2084_v20 = vshrl.u32 %v3031_v63, 16  ;;  %1784 = vrot.lane.b32.xlu0 %v2985_v61, %s3382_s22  ;;  %v2090_v34 = vshll.u32 %v3032_v8, 16  ;;  %v3064_v49 = vrot.slane %v3056_v16, 9 }
 0x11f   : >> { %1637 = vrot.lane.b32.xlu1 %v2954_v3, %s3385_s25  ;;  %v2066_v30 = vrot.slane %v2064_v13, 4  ;;  %v2072_v31 = vrot.slane %v2070_v14, 5  ;;  %v2076_v37 = vrot.slane %v2074_v56, 4  ;;  %v2082_v38 = vrot.slane %v2080_v19, 5  ;;  %v1775_v58 = vpop.permute.xlu1 %1774 }
 0x120   : >> { %v2058_v36 = vrot.slane %v2057_v18, 4  ;;  %v2086_v39 = vrot.slane %v2084_v20, 4  ;;  %v1126_v40 = vpop.permute.xlu0 %1125  ;;  %v2092_v43 = vrot.slane %v2090_v34, 5  ;;  %v2232_v52 = vrot.slane %v3057_v29, 5 }
 0x121   : >> { %v2067_v42 = vor.u32 %v2066_v30, %v4420_v12  ;;  %v2077_v47 = vor.u32 %v2076_v37, %v2072_v31  ;;  %1150 = vst.msk [vmem:[#allocation3] sm:$0xff] %vm1149_vm15, %v1126_v40  ;;  %v2235_v55 = vrot.slane %v3058_v35, 5  ;;  %v2238_v57 = vrot.slane %v3059_v41, 5 }
 0x122   : >> { %v2063_v45 = vsel %vm4064_vm13, %v2058_v36, %v4420_v12  ;;  %v2087_v48 = vor.u32 %v2086_v39, %v2082_v38  ;;  %1877 = vrot.lane.b32.xlu0 %v3314_v17, %s3386_s26  ;;  %1302 = vst.msk [vmem:[#allocation3] sm:$0xff] %vm1301_vm2, %v4384_v32  ;;  %v2241_v62 = vrot.slane %v3060_v44, 5  ;;  %v2233_v3 = vsel %vm4022_vm10, %v3064_v49, %v2232_v52 }
 0x123   : >> { %1786 = vrot.lane.b32.xlu1 %v2986_v11, %s3382_s22  ;;  %v2068_v51 = vrot.slane %v2067_v42, 4  ;;  %v2078_v60 = vrot.slane %v2077_v47, 4  ;;  %v2234_v4 = vrot.slane %v2232_v52, 4  ;;  %v2237_v5 = vrot.slane %v2235_v55, 4  ;;  %1395 = vst.msk [vmem:[#allocation3] sm:$0xff] %vm1394_vm3, %v4377_v54 }
 0x124   : >> { %v2088_v61 = vrot.slane %v2087_v48, 4  ;;  %v1128_v63 = vpop.permute.xlu0 %1127  ;;  %v2240_v9 = vrot.slane %v2238_v57, 4  ;;  %v3073_v14 = vcombine.low %v3964_v21, %v3969_v59  ;;  %v3075_v17 = vcombine.low %v3984_v0, %v3989_v2 }
 0x125   : >> { %v2073_v1 = vsel %vm4064_vm13, %v2068_v51, %v2072_v31  ;;  %1151 = vst.msk [vmem:[#allocation3 + $0x8] sm:$0xff] %vm1149_vm15, %v1128_v63  ;;  %v2083_v7 = vsel %vm4064_vm13, %v2078_v60, %v2082_v38  ;;  %v2236_v11 = vsel %vm4022_vm10, %v2234_v4, %v2235_v55  ;;  %v2239_v33 = vsel %vm4022_vm10, %v2237_v5, %v2238_v57 }
 0x126   : >> { %v3039_v32 = vcombine.low %v2063_v45, %v2073_v1  ;;  %v2093_v8 = vsel %vm4064_vm13, %v2088_v61, %v2092_v43  ;;  %1303 = vst.msk [vmem:[#allocation3 + $0x8] sm:$0xff] %vm1301_vm2, %v4422_v15  ;;  %v3071_v54 = vcombine.low %v2233_v3, %v2236_v11  ;;  %v2242_v12 = vsel %vm4022_vm10, %v2240_v9, %v2241_v62 }
 0x127   : >> { %1879 = vrot.lane.b32.xlu1 %v3315_v50, %s3386_s26  ;;  %v3040_v10 = vcombine.low %v2083_v7, %v2093_v8  ;;  %1396 = vst.msk [vmem:[#allocation3 + $0x8] sm:$0xff] %vm1394_vm3, %v4369_v53  ;;  %v3074_v15 = vcombine.low %v3974_v6, %v3979_v22  ;;  %v3072_v53 = vcombine.low %v2239_v33, %v2242_v12  ;;  %vm2335_vm10 = vcmask 588800  }
 0x128   : >> { %2130 = vrot.lane.b32.xlu0 %v3039_v32, %s3387_s27  ;;  %v1626_v13 = vpop.permute.xlu1 %1625  ;;  %3197 = vmatprep.subr.bf16.mxu0 %v3073_v14  ;;  %v3076_v56 = vcombine.low %v3994_v23, %v3999_v24 }
 0x129   : >> { %1649 = vst.msk [vmem:[#allocation3 + $0x8] sm:$0xff] %vm1647_vm4, %v1626_v13  ;;  %3198 = vmatpush3.bf16.msra.mxu0 %v3073_v14  ;;  %3223 = vmatprep.subr.bf16.mxu1 %v3073_v14 }
 0x12a   : >> { %1798 = vst.msk [vmem:[#allocation3 + $0x8] sm:$0xff] %vm1796_vm5, %v1775_v58  ;;  %3199 = vmatprep.subr.bf16.mxu0 %v3074_v15  ;;  %3228 = vmatpush3.bf16.msra.mxu1 %v3073_v14 }
 0x12b   : >> { %2132 = vrot.lane.b32.xlu1 %v3040_v10, %s3387_s27  ;;  %3224 = vmatprep.subr.bf16.mxu1 %v3074_v15 }
 0x12c   : >> { %2279 = vrot.lane.b32.xlu0 %v3071_v54, %s3388_s28  ;;  %v1868_v16 = vpop.permute.xlu1 %1867 }
 0x12d   : >> { %v1624_v28 = vpop.permute.xlu0 %1623  ;;  %1891 = vst.msk [vmem:[#allocation3 + $0x8] sm:$0xff] %vm1889_vm6, %v1868_v16  ;;  %3200 = vmatpush3.bf16.msra.mxu0 %v3074_v15 }
 0x12e   : >> { %1648 = vst.msk [vmem:[#allocation3] sm:$0xff] %vm1647_vm4, %v1624_v28  ;;  %3201 = vmatprep.subr.bf16.mxu0 %v3075_v17  ;;  %3229 = vmatpush3.bf16.msra.mxu1 %v3074_v15 }
 0x12f   : >> { %2281 = vrot.lane.b32.xlu1 %v3072_v53, %s3388_s28  ;;  %1797 = vst.msk [vmem:[#allocation3] sm:$0xff] %vm1796_vm5, %v4398_v46  ;;  %3225 = vmatprep.subr.bf16.mxu1 %v3075_v17  ;;  %v3077_v46 = vcombine.low %v4004_v25, %v4004_v25 }
 0x131   : >> { %v1866_v18 = vpop.permute.xlu0 %1865  ;;  %3202 = vmatpush3.bf16.msra.mxu0 %v3075_v17  ;;  %v2362_v30 = vsel %vm2360_vm8, %v3077_v46, 0 }
 0x132   : >> { %1890 = vst.msk [vmem:[#allocation3] sm:$0xff] %vm1889_vm6, %v1866_v18  ;;  %3203 = vmatprep.subr.bf16.mxu0 %v3076_v56  ;;  %3230 = vmatpush3.bf16.msra.mxu1 %v3075_v17 }
 0x133   : >> { %v2121_v19 = vpop.permute.xlu1 %2120  ;;  %3226 = vmatprep.subr.bf16.mxu1 %v3076_v56 }
 0x134   : >> { %2144 = vst.msk [vmem:[#allocation3 + $0x8] sm:$0xff] %vm2142_vm7, %v2121_v19 }
 0x135   : >> { %v2119_v20 = vpop.permute.xlu0 %2118  ;;  %3204 = vmatpush3.bf16.msra.mxu0 %v3076_v56 }
 0x136   : >> { %2143 = vst.msk [vmem:[#allocation3] sm:$0xff] %vm2142_vm7, %v2119_v20  ;;  %3233 = vmatprep.subr.msk.bf16.mxu0 %vm2360_vm8, %v3077_v46  ;;  %3231 = vmatpush3.bf16.msra.mxu1 %v3076_v56 }
 0x137   : >> { %3234 = vmatprep.subr.msk.bf16.mxu1 %vm2360_vm8, %v3077_v46 }
 0x139   : >> { %v2268_v29 = vpop.permute.xlu0 %2267  ;;  %3206 = vmatpush3.bf16.msra.mxu0 %v2362_v30 }
 0x13a   : >> { %2292 = vst.msk [vmem:[#allocation3] sm:$0xff] %vm2291_vm9, %v2268_v29  ;;  %3232 = vmatpush3.bf16.msra.mxu1 %v2362_v30 }
 0x13b   : >> { %v1130_v31 = vpop.permute.xlu1 %1129 }
 0x13c   : >> { %1152 = vst.msk [vmem:[#allocation3 + $0x10] sm:$0xff] %vm1149_vm15, %v1130_v31 }
 0x13d   : >> { %v2270_v34 = vpop.permute.xlu0 %2269 }
 0x13e   : >> { %2293 = vst.msk [vmem:[#allocation3 + $0x8] sm:$0xff] %vm2291_vm9, %v2270_v34 }
 0x13f   : >> { %v1132_v35 = vpop.permute.xlu1 %1131 }
 0x140   : >> { %1153 = vst.msk [vmem:[#allocation3 + $0x18] sm:$0xff] %vm1149_vm15, %v1132_v35 }
 0x141   : >> { %v1282_v36 = vpop.permute.xlu0 %1281  ;;  %v2300_v37 = vld [vmem:[#allocation3] sm:$0xff] }
 0x142   : >> { %1304 = vst.msk [vmem:[#allocation3 + $0x10] sm:$0xff] %vm1301_vm2, %v1282_v36  ;;  %3207 = vmatprep.mubr.msk.bf16.mxu0 %vm2335_vm10, %v2300_v37 }
 0x143   : >> { %v1284_v38 = vpop.permute.xlu1 %1283 }
 0x144   : >> { %1305 = vst.msk [vmem:[#allocation3 + $0x18] sm:$0xff] %vm1301_vm2, %v1284_v38 }
 0x145   : >> { %v1375_v39 = vpop.permute.xlu0 %1374  ;;  %v2301_v40 = vld [vmem:[#allocation3 + $0x8] sm:$0xff] }
 0x146   : >> { %1397 = vst.msk [vmem:[#allocation3 + $0x10] sm:$0xff] %vm1394_vm3, %v1375_v39  ;;  %3208 = vmatmul.mubr.msk.bf16.vlgmr.msra.gmra.mrb[0].mxu0 %vm2335_vm10, %v2301_v40 }
 0x147   : >> { %v1377_v41 = vpop.permute.xlu1 %1376 }
 0x148   : >> { %1398 = vst.msk [vmem:[#allocation3 + $0x18] sm:$0xff] %vm1394_vm3, %v1377_v41 }
 0x149   : >> { %v1628_v42 = vpop.permute.xlu0 %1627 }
 0x14a   : >> { %1650 = vst.msk [vmem:[#allocation3 + $0x10] sm:$0xff] %vm1647_vm4, %v1628_v42 }
 0x14b   : >> { %v1630_v43 = vpop.permute.xlu1 %1629 }
 0x14c   : >> { %1651 = vst.msk [vmem:[#allocation3 + $0x18] sm:$0xff] %vm1647_vm4, %v1630_v43 }
 0x14d   : >> { %v1777_v44 = vpop.permute.xlu0 %1776 }
 0x14e   : >> { %1799 = vst.msk [vmem:[#allocation3 + $0x10] sm:$0xff] %vm1796_vm5, %v1777_v44 }
 0x14f   : >> { %v1779_v45 = vpop.permute.xlu1 %1778 }
 0x150   : >> { %1800 = vst.msk [vmem:[#allocation3 + $0x18] sm:$0xff] %vm1796_vm5, %v1779_v45 }
 0x151   : >> { %v1870_v47 = vpop.permute.xlu0 %1869 }
 0x152   : >> { %1892 = vst.msk [vmem:[#allocation3 + $0x10] sm:$0xff] %vm1889_vm6, %v1870_v47 }
 0x153   : >> { %v1872_v48 = vpop.permute.xlu1 %1871 }
 0x154   : >> { %1893 = vst.msk [vmem:[#allocation3 + $0x18] sm:$0xff] %vm1889_vm6, %v1872_v48 }
 0x155   : >> { %v2123_v49 = vpop.permute.xlu0 %2122 }
 0x156   : >> { %2145 = vst.msk [vmem:[#allocation3 + $0x10] sm:$0xff] %vm2142_vm7, %v2123_v49 }
 0x157   : >> { %v2125_v50 = vpop.permute.xlu1 %2124 }
 0x158   : >> { %2146 = vst.msk [vmem:[#allocation3 + $0x18] sm:$0xff] %vm2142_vm7, %v2125_v50 }
 0x159   : >> { %v2272_v51 = vpop.permute.xlu0 %2271 }
 0x15a   : >> { %2294 = vst.msk [vmem:[#allocation3 + $0x10] sm:$0xff] %vm2291_vm9, %v2272_v51 }
 0x15d   : >> { %v1134_v52 = vpop.permute.xlu1 %1133  ;;  %v2274_v55 = vpop.permute.xlu0 %2273 }
 0x15e   : >> { %1154 = vst.msk [vmem:[#allocation3 + $0x20] sm:$0xff] %vm1149_vm15, %v1134_v52 }
 0x15f   : >> { %2295 = vst.msk [vmem:[#allocation3 + $0x18] sm:$0xff] %vm2291_vm9, %v2274_v55 }
 0x161   : >> { %v2302_v57 = vld [vmem:[#allocation3 + $0x10] sm:$0xff] }
 0x162   : >> { %v1286_v58 = vpop.permute.xlu0 %1285  ;;  %3211 = vmatprep.mubr.msk.bf16.mxu0 %vm2335_vm10, %v2302_v57  ;;  %v1136_v60 = vpop.permute.xlu1 %1135 }
 0x163   : >> { %1306 = vst.msk [vmem:[#allocation3 + $0x20] sm:$0xff] %vm1301_vm2, %v1286_v58 }
 0x164   : >> { %1155 = vst.msk [vmem:[#allocation3 + $0x28] sm:$0xff] %vm1149_vm15, %v1136_v60 }
 0x166   : >> { %v2303_v61 = vld [vmem:[#allocation3 + $0x18] sm:$0xff]  ;;  %v1379_v62 = vpop.permute.xlu0 %1378  ;;  %v1288_v63 = vpop.permute.xlu1 %1287 }
 0x167   : >> { %3212 = vmatmul.mubr.msk.bf16.gmra.mrb[4].mxu0 %vm2335_vm10, %v2303_v61  ;;  %1399 = vst.msk [vmem:[#allocation3 + $0x20] sm:$0xff] %vm1394_vm3, %v1379_v62 }
 0x168   : >> { %1307 = vst.msk [vmem:[#allocation3 + $0x28] sm:$0xff] %vm1301_vm2, %v1288_v63 }
 0x16a   : >> { %v1632_v1 = vpop.permute.xlu0 %1631  ;;  %v1381_v3 = vpop.permute.xlu1 %1380 }
 0x16b   : >> { %1652 = vst.msk [vmem:[#allocation3 + $0x20] sm:$0xff] %vm1647_vm4, %v1632_v1 }
 0x16c   : >> { %1400 = vst.msk [vmem:[#allocation3 + $0x28] sm:$0xff] %vm1394_vm3, %v1381_v3 }
 0x16e   : >> { %v1781_v4 = vpop.permute.xlu0 %1780  ;;  %v1634_v5 = vpop.permute.xlu1 %1633 }
 0x16f   : >> { %1801 = vst.msk [vmem:[#allocation3 + $0x20] sm:$0xff] %vm1796_vm5, %v1781_v4 }
 0x170   : >> { %1653 = vst.msk [vmem:[#allocation3 + $0x28] sm:$0xff] %vm1647_vm4, %v1634_v5 }
 0x172   : >> { %v1874_v32 = vpop.permute.xlu0 %1873  ;;  %v1783_v7 = vpop.permute.xlu1 %1782 }
 0x173   : >> { %1894 = vst.msk [vmem:[#allocation3 + $0x20] sm:$0xff] %vm1889_vm6, %v1874_v32 }
 0x174   : >> { %1802 = vst.msk [vmem:[#allocation3 + $0x28] sm:$0xff] %vm1796_vm5, %v1783_v7 }
 0x176   : >> { %v1876_v8 = vpop.permute.xlu1 %1875 }
 0x177   : >> { %v2127_v9 = vpop.permute.xlu0 %2126  ;;  %1895 = vst.msk [vmem:[#allocation3 + $0x28] sm:$0xff] %vm1889_vm6, %v1876_v8 }
 0x178   : >> { %2147 = vst.msk [vmem:[#allocation3 + $0x20] sm:$0xff] %vm2142_vm7, %v2127_v9 }
 0x17a   : >> { %v2129_v10 = vpop.permute.xlu1 %2128 }
 0x17b   : >> { %v2276_v11 = vpop.permute.xlu0 %2275  ;;  %2148 = vst.msk [vmem:[#allocation3 + $0x28] sm:$0xff] %vm2142_vm7, %v2129_v10 }
 0x17c   : >> { %2296 = vst.msk [vmem:[#allocation3 + $0x20] sm:$0xff] %vm2291_vm9, %v2276_v11 }
 0x17f   : >> { %v2278_v54 = vpop.permute.xlu0 %2277  ;;  %v1138_v33 = vpop.permute.xlu1 %1137 }
 0x180   : >> { %2297 = vst.msk [vmem:[#allocation3 + $0x28] sm:$0xff] %vm2291_vm9, %v2278_v54 }
 0x181   : >> { %1156 = vst.msk [vmem:[#allocation3 + $0x30] sm:$0xff] %vm1149_vm15, %v1138_v33 }
 0x183   : >> { %v2304_v12 = vld [vmem:[#allocation3 + $0x20] sm:$0xff]  ;;  %v1290_v13 = vpop.permute.xlu0 %1289 }
 0x184   : >> { %3215 = vmatprep.mubr.msk.bf16.mxu1 %vm2335_vm10, %v2304_v12  ;;  %1308 = vst.msk [vmem:[#allocation3 + $0x30] sm:$0xff] %vm1301_vm2, %v1290_v13 }
 0x185   : >> { %v1140_v14 = vpop.permute.xlu1 %1139 }
 0x186   : >> { %1157 = vst.msk [vmem:[#allocation3 + $0x38] sm:$0xff] %vm1149_vm15, %v1140_v14 }
 0x187   : >> { %v2305_v15 = vld [vmem:[#allocation3 + $0x28] sm:$0xff]  ;;  %v1383_v53 = vpop.permute.xlu0 %1382 }
 0x188   : >> { %3216 = vmatmul.mubr.msk.bf16.vlgmr.msra.gmra.mrb[0].mxu1 %vm2335_vm10, %v2305_v15  ;;  %1401 = vst.msk [vmem:[#allocation3 + $0x30] sm:$0xff] %vm1394_vm3, %v1383_v53 }
 0x189   : >> { %v1292_v28 = vpop.permute.xlu1 %1291 }
 0x18a   : >> { %1309 = vst.msk [vmem:[#allocation3 + $0x38] sm:$0xff] %vm1301_vm2, %v1292_v28 }
 0x18c   : >> { %v1636_v17 = vpop.permute.xlu0 %1635 }
 0x18d   : >> { %v1385_v16 = vpop.permute.xlu1 %1384  ;;  %1654 = vst.msk [vmem:[#allocation3 + $0x30] sm:$0xff] %vm1647_vm4, %v1636_v17 }
 0x18e   : >> { %1402 = vst.msk [vmem:[#allocation3 + $0x38] sm:$0xff] %vm1394_vm3, %v1385_v16 }
 0x190   : >> { %v1785_v56 = vpop.permute.xlu0 %1784 }
 0x191   : >> { %v1638_v18 = vpop.permute.xlu1 %1637  ;;  %1803 = vst.msk [vmem:[#allocation3 + $0x30] sm:$0xff] %vm1796_vm5, %v1785_v56 }
 0x192   : >> { %1655 = vst.msk [vmem:[#allocation3 + $0x38] sm:$0xff] %vm1647_vm4, %v1638_v18 }
 0x194   : >> { %v1878_v20 = vpop.permute.xlu0 %1877 }
 0x195   : >> { %v1787_v19 = vpop.permute.xlu1 %1786  ;;  %1896 = vst.msk [vmem:[#allocation3 + $0x30] sm:$0xff] %vm1889_vm6, %v1878_v20 }
 0x196   : >> { %1804 = vst.msk [vmem:[#allocation3 + $0x38] sm:$0xff] %vm1796_vm5, %v1787_v19 }
 0x199   : >> { %v1880_v46 = vpop.permute.xlu1 %1879 }
 0x19a   : >> { %1897 = vst.msk [vmem:[#allocation3 + $0x38] sm:$0xff] %vm1889_vm6, %v1880_v46  ;;  %v2131_v29 = vpop.permute.xlu0 %2130 }
 0x19b   : >> { %2149 = vst.msk [vmem:[#allocation3 + $0x30] sm:$0xff] %vm2142_vm7, %v2131_v29 }
 0x19d   : >> { %v2133_v30 = vpop.permute.xlu1 %2132 }
 0x19e   : >> { %2150 = vst.msk [vmem:[#allocation3 + $0x38] sm:$0xff] %vm2142_vm7, %v2133_v30  ;;  %v2280_v31 = vpop.permute.xlu0 %2279 }
 0x19f   : >> { %2298 = vst.msk [vmem:[#allocation3 + $0x30] sm:$0xff] %vm2291_vm9, %v2280_v31 }
 0x1a1   : >> { %v2282_v34 = vpop.permute.xlu1 %2281 }
 0x1a2   : >> { %2299 = vst.msk [vmem:[#allocation3 + $0x38] sm:$0xff] %vm2291_vm9, %v2282_v34 }
 0x1a6   : >> { %v2306_v35 = vld [vmem:[#allocation3 + $0x30] sm:$0xff] }
 0x1a7   : >> { %3219 = vmatprep.mubr.msk.bf16.mxu1 %vm2335_vm10, %v2306_v35 }
 0x1a9   : >> { %v2307_v36 = vld [vmem:[#allocation3 + $0x38] sm:$0xff] }
 0x1aa   : >> { %3220 = vmatmul.mubr.msk.bf16.gmra.mrb[4].mxu1 %vm2335_vm10, %v2307_v36 }
 0x219   : >> { %v3209_v37 = vpop.f32.mrb[0].mxu0 }
 0x21a   : >> { %v3129_v38 = vpack.c.bf16 %v3209_v37, %v3209_v37  ;;  %v2398_v39 = vpop.f32.mrb[1].mxu0  ;;  %v2585_v43 = vmul.f32 %v3209_v37, %v3209_v37  ;;  %v2548_v52 = vsel %vm893_vm14, %v3209_v37, 0.0 }
 0x21b   : >> { %v3127_v40 = vpack.c.bf16 %v2398_v39, %v2398_v39  ;;  %v2583_v41 = vmul.f32 %v2398_v39, %v2398_v39  ;;  %v3210_v42 = vpop.f32.mrb[2].mxu0  ;;  %v2545_v47 = vsel %vm893_vm14, %v2398_v39, 0.0 }
 0x21c   : >> { %2531 = vst.msk [vmem:[%s4555_s30 + $0x8] sm:$0xf] %vm274_vm0, %v3129_v38  ;;  %v3130_v44 = vpack.c.bf16 %v3210_v42, %v3210_v42  ;;  %v2401_v45 = vpop.f32.mrb[3].mxu0  ;;  %v2586_v57 = vmul.f32 %v3210_v42, %v3210_v42  ;;  %v2602_v62 = vsel %vm893_vm14, %v2585_v43, 0.0  ;;  %v2550_v63 = vsel %vm893_vm14, %v3210_v42, 0.0 }
 0x21d   : >> { %2529 = vst.msk [vmem:[%s4555_s30] sm:$0xf] %vm274_vm0, %v3127_v40  ;;  %v3128_v48 = vpack.c.bf16 %v2401_v45, %v2401_v45  ;;  %v2546_v49 = vsel %vm893_vm14, %v2401_v45, 0.0  ;;  %v2584_v50 = vmul.f32 %v2401_v45, %v2401_v45  ;;  %v2599_v55 = vsel %vm893_vm14, %v2583_v41, 0.0 }
 0x21e   : >> { %2532 = vst.msk [vmem:[%s4555_s30 + $0xc] sm:$0xf] %vm274_vm0, %v3130_v44  ;;  %v2547_v51 = vadd.f32 %v2546_v49, %v2545_v47  ;;  %v2604_v4 = vsel %vm893_vm14, %v2586_v57, 0.0 }
 0x21f   : >> { %2530 = vst.msk [vmem:[%s4555_s30 + $0x4] sm:$0xf] %vm274_vm0, %v3128_v48  ;;  %v2600_v58 = vsel %vm893_vm14, %v2584_v50, 0.0 }
 0x220   : >> { %v2549_v60 = vadd.f32 %v2548_v52, %v2547_v51  ;;  %v2601_v61 = vadd.f32 %v2600_v58, %v2599_v55 }
 0x222   : >> { %v2603_v1 = vadd.f32 %v2602_v62, %v2601_v61  ;;  %v2551_v3 = vadd.f32 %v2550_v63, %v2549_v60 }
 0x224   : >> { %v2605_v5 = vadd.f32 %v2604_v4, %v2603_v1 }
 0x23a   : >> { %v3213_v32 = vpop.f32.mrb[4].mxu0 }
 0x23b   : >> { %v3133_v7 = vpack.c.bf16 %v3213_v32, %v3213_v32  ;;  %v2414_v8 = vpop.f32.mrb[5].mxu0  ;;  %v2589_v28 = vmul.f32 %v3213_v32, %v3213_v32  ;;  %v2556_v56 = vsel %vm893_vm14, %v3213_v32, 0.0 }
 0x23c   : >> { %v3131_v9 = vpack.c.bf16 %v2414_v8, %v2414_v8  ;;  %v2552_v10 = vsel %vm893_vm14, %v2414_v8, 0.0  ;;  %v2587_v11 = vmul.f32 %v2414_v8, %v2414_v8  ;;  %v3214_v54 = vpop.f32.mrb[6].mxu0 }
 0x23d   : >> { %2535 = vst.msk [vmem:[%s4555_s30 + $0x18] sm:$0xf] %vm274_vm0, %v3133_v7  ;;  %v2553_v33 = vadd.f32 %v2552_v10, %v2551_v3  ;;  %v3134_v12 = vpack.c.bf16 %v3214_v54, %v3214_v54  ;;  %v2417_v13 = vpop.f32.mrb[7].mxu0  ;;  %v2590_v19 = vmul.f32 %v3214_v54, %v3214_v54  ;;  %v2558_v29 = vsel %vm893_vm14, %v3214_v54, 0.0 }
 0x23e   : >> { %2533 = vst.msk [vmem:[%s4555_s30 + $0x10] sm:$0xf] %vm274_vm0, %v3131_v9  ;;  %v2606_v14 = vsel %vm893_vm14, %v2587_v11, 0.0  ;;  %v3132_v15 = vpack.c.bf16 %v2417_v13, %v2417_v13  ;;  %v2554_v53 = vsel %vm893_vm14, %v2417_v13, 0.0  ;;  %v2588_v18 = vmul.f32 %v2417_v13, %v2417_v13 }
 0x23f   : >> { %v2607_v16 = vadd.f32 %v2606_v14, %v2605_v5  ;;  %2536 = vst.msk [vmem:[%s4555_s30 + $0x1c] sm:$0xf] %vm274_vm0, %v3134_v12  ;;  %v2555_v17 = vadd.f32 %v2554_v53, %v2553_v33  ;;  %v2610_v31 = vsel %vm893_vm14, %v2589_v28, 0.0  ;;  %v2612_v36 = vsel %vm893_vm14, %v2590_v19, 0.0 }
 0x240   : >> { %2534 = vst.msk [vmem:[%s4555_s30 + $0x14] sm:$0xf] %vm274_vm0, %v3132_v15  ;;  %v2608_v46 = vsel %vm893_vm14, %v2588_v18, 0.0 }
 0x241   : >> { %v2557_v20 = vadd.f32 %v2556_v56, %v2555_v17  ;;  %v2609_v30 = vadd.f32 %v2608_v46, %v2607_v16 }
 0x243   : >> { %v2559_v34 = vadd.f32 %v2558_v29, %v2557_v20  ;;  %v2611_v35 = vadd.f32 %v2610_v31, %v2609_v30 }
 0x245   : >> { %v2613_v37 = vadd.f32 %v2612_v36, %v2611_v35 }
 0x25b   : >> { %v3217_v38 = vpop.f32.mrb[0].mxu1 }
 0x25c   : >> { %v3137_v39 = vpack.c.bf16 %v3217_v38, %v3217_v38  ;;  %v2430_v40 = vpop.f32.mrb[1].mxu1  ;;  %v2593_v52 = vmul.f32 %v3217_v38, %v3217_v38  ;;  %v2564_v60 = vsel %vm893_vm14, %v3217_v38, 0.0 }
 0x25d   : >> { %v3135_v41 = vpack.c.bf16 %v2430_v40, %v2430_v40  ;;  %v2560_v42 = vsel %vm893_vm14, %v2430_v40, 0.0  ;;  %v2591_v43 = vmul.f32 %v2430_v40, %v2430_v40  ;;  %v3218_v44 = vpop.f32.mrb[2].mxu1 }
 0x25e   : >> { %2539 = vst.msk [vmem:[%s4555_s30 + $0x28] sm:$0xf] %vm274_vm0, %v3137_v39  ;;  %v2561_v45 = vadd.f32 %v2560_v42, %v2559_v34  ;;  %v3138_v47 = vpack.c.bf16 %v3218_v44, %v3218_v44  ;;  %v2433_v48 = vpop.f32.mrb[3].mxu1  ;;  %v2594_v61 = vmul.f32 %v3218_v44, %v3218_v44  ;;  %v2566_v1 = vsel %vm893_vm14, %v3218_v44, 0.0 }
 0x25f   : >> { %2537 = vst.msk [vmem:[%s4555_s30 + $0x20] sm:$0xf] %vm274_vm0, %v3135_v41  ;;  %v2614_v49 = vsel %vm893_vm14, %v2591_v43, 0.0  ;;  %v3136_v50 = vpack.c.bf16 %v2433_v48, %v2433_v48  ;;  %v2562_v51 = vsel %vm893_vm14, %v2433_v48, 0.0  ;;  %v2592_v58 = vmul.f32 %v2433_v48, %v2433_v48 }
 0x260   : >> { %v2615_v55 = vadd.f32 %v2614_v49, %v2613_v37  ;;  %2540 = vst.msk [vmem:[%s4555_s30 + $0x2c] sm:$0xf] %vm274_vm0, %v3138_v47  ;;  %v2563_v57 = vadd.f32 %v2562_v51, %v2561_v45  ;;  %v2618_v4 = vsel %vm893_vm14, %v2593_v52, 0.0  ;;  %v2620_v7 = vsel %vm893_vm14, %v2594_v61, 0.0 }
 0x261   : >> { %2538 = vst.msk [vmem:[%s4555_s30 + $0x24] sm:$0xf] %vm274_vm0, %v3136_v50  ;;  %v2616_v63 = vsel %vm893_vm14, %v2592_v58, 0.0 }
 0x262   : >> { %v2565_v62 = vadd.f32 %v2564_v60, %v2563_v57  ;;  %v2617_v3 = vadd.f32 %v2616_v63, %v2615_v55 }
 0x264   : >> { %v2567_v5 = vadd.f32 %v2566_v1, %v2565_v62  ;;  %v2619_v32 = vadd.f32 %v2618_v4, %v2617_v3 }
 0x266   : >> { %v2621_v8 = vadd.f32 %v2620_v7, %v2619_v32 }
 0x27d   : >> { %v3221_v9 = vpop.f32.mrb[4].mxu1 }
 0x27e   : >> { %v3141_v10 = vpack.c.bf16 %v3221_v9, %v3221_v9  ;;  %v2446_v11 = vpop.f32.mrb[5].mxu1  ;;  %v2597_v18 = vmul.f32 %v3221_v9, %v3221_v9  ;;  %v2572_v46 = vsel %vm893_vm14, %v3221_v9, 0.0 }
 0x27f   : >> { %v3139_v54 = vpack.c.bf16 %v2446_v11, %v2446_v11  ;;  %v2568_v33 = vsel %vm893_vm14, %v2446_v11, 0.0  ;;  %v2595_v12 = vmul.f32 %v2446_v11, %v2446_v11  ;;  %v3222_v13 = vpop.f32.mrb[6].mxu1 }
 0x280   : >> { %2543 = vst.msk [vmem:[%s4555_s30 + $0x38] sm:$0xf] %vm274_vm0, %v3141_v10  ;;  %v2569_v14 = vadd.f32 %v2568_v33, %v2567_v5  ;;  %v3142_v15 = vpack.c.bf16 %v3222_v13, %v3222_v13  ;;  %v2449_v53 = vpop.f32.mrb[7].mxu1  ;;  %v2598_v29 = vmul.f32 %v3222_v13, %v3222_v13  ;;  %v2574_v34 = vsel %vm893_vm14, %v3222_v13, 0.0 }
 0x281   : >> { %2541 = vst.msk [vmem:[%s4555_s30 + $0x30] sm:$0xf] %vm274_vm0, %v3139_v54  ;;  %v2622_v28 = vsel %vm893_vm14, %v2595_v12, 0.0  ;;  %v3140_v16 = vpack.c.bf16 %v2449_v53, %v2449_v53  ;;  %v2570_v17 = vsel %vm893_vm14, %v2449_v53, 0.0  ;;  %v2596_v20 = vmul.f32 %v2449_v53, %v2449_v53 }
 0x282   : >> { %v2623_v56 = vadd.f32 %v2622_v28, %v2621_v8  ;;  %2544 = vst.msk [vmem:[%s4555_s30 + $0x3c] sm:$0xf] %vm274_vm0, %v3142_v15  ;;  %v2571_v19 = vadd.f32 %v2570_v17, %v2569_v14  ;;  %v2626_v36 = vsel %vm893_vm14, %v2597_v18, 0.0  ;;  %v2628_v39 = vsel %vm893_vm14, %v2598_v29, 0.0 }
 0x283   : >> { %2542 = vst.msk [vmem:[%s4555_s30 + $0x34] sm:$0xf] %vm274_vm0, %v3140_v16  ;;  %v2624_v31 = vsel %vm893_vm14, %v2596_v20, 0.0 }
 0x284   : >> { %v2573_v30 = vadd.f32 %v2572_v46, %v2571_v19  ;;  %v2625_v35 = vadd.f32 %v2624_v31, %v2623_v56 }
 0x286   : >> { %v2575_v37 = vadd.f32 %v2574_v34, %v2573_v30  ;;  %v2627_v38 = vadd.f32 %v2626_v36, %v2625_v35 }
 0x288   : >> { %v2576_v40 = vrot.slane %v2575_v37, 4  ;;  %v2629_v41 = vadd.f32 %v2628_v39, %v2627_v38 }
 0x28a   : >> { %v2577_v42 = vadd.f32 %v2576_v40, %v2575_v37  ;;  %v2630_v43 = vrot.slane %v2629_v41, 4 }
 0x28c   : >> { %v2578_v44 = vrot.slane %v2577_v42, 2  ;;  %v2631_v45 = vadd.f32 %v2630_v43, %v2629_v41 }
 0x28e   : >> { %v2579_v47 = vadd.f32 %v2578_v44, %v2577_v42  ;;  %v2632_v48 = vrot.slane %v2631_v45, 2 }
 0x290   : >> { %v2580_v49 = vrot.slane %v2579_v47, 1  ;;  %v2633_v50 = vadd.f32 %v2632_v48, %v2631_v45 }
 0x292   : >> { %v2581_v51 = vadd.f32 %v2580_v49, %v2579_v47  ;;  %v2634_v52 = vrot.slane %v2633_v50, 1  ;;  %820 = sbr.rel (!%p818_p6) target bundleno = 148 (0x94), region = 113 }
 0x294   : >> { %v2582_v55 = vadd.f32 %v3374_v27, %v2581_v51   ;;  %v2635_v57 = vadd.f32 %v2634_v52, %v2633_v50 }
 0x296   : >> { %v2636_v58 = vadd.f32 %v3370_v26, %v2635_v57   ;;  %v4660_v27 = vmov %v2582_v55  ;;  %2638 = vst.msk [vmem:[%s3806_s11] sm:$0x1] (%p818_p6), %vm279_vm1, %v2582_v55 }
 0x298   : >> { %v4659_v26 = vmov %v2636_v58  ;;  %2639 = vst.msk [vmem:[%s3806_s11 + $0x1] sm:$0x1] (%p818_p6), %vm279_vm1, %v2636_v58 }
 0x299 PF: > { %s16_s20 = sadd.s32 1, %s3362_s20   ;;  %s4661_s18 = smov %s3358_s19 }
 0x29a   : > { %p13_p7 = scmp.ge.s32.totalorder %s16_s20, 4   ;;  %s4662_s19 = smov %s4664_s21 }
 0x29c   :  { %15 = sbr.rel (!%p13_p7) target bundleno = 2 (0x2), region = 124 }

// kernel: decoder_block_forward.3
= control target key start
LH: loop header
LB: loop body
LE: loop exit
PB: predicated region body
PF: predicated region fallthrough
CT: control target
= control target key end

     0   :  { %s3435_s15 = smov 0   ;;  %s3437_s16 = smov 0   ;;  %s4846_s0 = inlined_call_operand.vmem [shape: bf16[2,16,32,4], index: 0, kind: input, shape index: {}]   ;;  %s4847_s1 = inlined_call_operand.vmem [shape: bf16[2,32,32,4], index: 1, kind: input, shape index: {}]   ;;  %s4848_s2 = inlined_call_operand.vmem [shape: bf16[72,8], index: 2, kind: input, shape index: {}]   ;;  %s4849_s3 = inlined_call_operand.vmem [shape: bf16[2,32,32,8], index: 3, kind: output, shape index: {0}]   ;;  %s4850_s4 = inlined_call_operand.vmem [shape: f32[2,1,2,8], index: 4, kind: output, shape index: {1}]  }
   0x1   :  { %s3439_s17 = smov 0  }
   0x2 LB: > { %s27_s18 = sadd.s32 1, %s3378_s16  ;;  %p2868_p0 = scmp.ge.s32.totalorder %s3382_s17, 1  ;;  %s3382_s17 = sphi %s3439_s17, %s15_s17   ;;  %s3378_s16 = sphi %s3437_s16, %s4868_s16   ;;  %s3374_s15 = sphi %s3435_s15, %s4867_s15  }
   0x3   : > { %p29_p1 = scmp.ge.s32.totalorder %s27_s18, 2  ;;  %p191_p2 = scmp.lt.s32.totalorder %s3382_s17, 3 }
   0x5   : > { %s4870_s18 = smov (%p29_p1, %s27_s18), 0  ;;  %p192_p3 = pnand %p2868_p0, %p191_p2 }
   0x6   : > { %p234_p4 = scmp.lt.s32.totalorder (!%p192_p3), %s3374_s15, 1  ;;  %vm267_vm0 = vcmask (!%p192_p3), 60416   ;;  %vm272_vm1 = vcmask (!%p192_p3), 57344   ;;  %v3400_v0 = vmov (!%p192_p3), 0   ;;  %s3819_s8 = smov (!%p192_p3), 0  }
   0x7   : > { %195 = sbr.rel (%p192_p3) target bundleno = 770 (0x302), region = 32  ;;  %268 = vst.msk [vmem:[#allocation2] sm:$0xf] (!%p192_p3), %vm267_vm0, %v3400_v0  ;;  %269 = vst.msk [vmem:[#allocation2 + $0x4] sm:$0xf] (!%p192_p3), %vm267_vm0, %v3400_v0 }
   0x8   : > { %270 = vst.msk [vmem:[#allocation2 + $0x8] sm:$0xf] (!%p192_p3), %vm267_vm0, %v3400_v0  ;;  %271 = vst.msk [vmem:[#allocation2 + $0xc] sm:$0xf] (!%p192_p3), %vm267_vm0, %v3400_v0 }
   0x9   : > { %274 = vst.msk [vmem:[#allocation2 + $0x14] sm:$0xf] (!%p192_p3), %vm267_vm0, %v3400_v0  ;;  %275 = vst.msk [vmem:[#allocation2 + $0x18] sm:$0xf] (!%p192_p3), %vm267_vm0, %v3400_v0 }
   0xa   : > { %276 = vst.msk [vmem:[#allocation2 + $0x1c] sm:$0xf] (!%p192_p3), %vm267_vm0, %v3400_v0  ;;  %277 = vst.msk [vmem:[#allocation2 + $0x20] sm:$0xf] (!%p192_p3), %vm267_vm0, %v3400_v0 }
   0xb   : > { %279 = vst.msk [vmem:[#allocation2 + $0x28] sm:$0xf] (!%p192_p3), %vm267_vm0, %v3400_v0  ;;  %280 = vst.msk [vmem:[#allocation2 + $0x2c] sm:$0xf] (!%p192_p3), %vm267_vm0, %v3400_v0 }
   0xc   : > { %281 = vst.msk [vmem:[#allocation2 + $0x30] sm:$0xf] (!%p192_p3), %vm267_vm0, %v3400_v0  ;;  %282 = vst.msk [vmem:[#allocation2 + $0x34] sm:$0xf] (!%p192_p3), %vm267_vm0, %v3400_v0 }
   0xd   : > { %284 = vst.msk [vmem:[#allocation2 + $0x3c] sm:$0xf] (!%p192_p3), %vm267_vm0, %v3400_v0  ;;  %285 = vst.msk [vmem:[#allocation2 + $0x40] sm:$0xf] (!%p192_p3), %vm267_vm0, %v3400_v0 }
   0xe   : > { %286 = vst.msk [vmem:[#allocation2 + $0x44] sm:$0xf] %vm267_vm0, %v3400_v0  ;;  %287 = vst.msk [vmem:[#allocation2 + $0x48] sm:$0xf] %vm267_vm0, %v3400_v0  ;;  %s4872_s15 = smov (!%p234_p4, %s3374_s15), 1 }
   0xf   : > { %289 = vst.msk [vmem:[#allocation2 + $0x50] sm:$0xf] %vm267_vm0, %v3400_v0  ;;  %290 = vst.msk [vmem:[#allocation2 + $0x54] sm:$0xf] %vm267_vm0, %v3400_v0  ;;  %s3176_s19 = sshll.u32 %s4872_s15, 8  ;;  %s3177_s20 = sshll.u32 %s4872_s15, 9 }
  0x10   : > { %291 = vst.msk [vmem:[#allocation2 + $0x58] sm:$0xf] %vm267_vm0, %v3400_v0  ;;  %292 = vst.msk [vmem:[#allocation2 + $0x5c] sm:$0xf] %vm267_vm0, %v3400_v0  ;;  %s3802_s23 = scalar_lea.vmem %s4846_s0, %s3176_s19  ;;  %s3807_s26 = scalar_lea.vmem %s4847_s1, %s3177_s20 }
  0x11   : > { %294 = vst.msk [vmem:[#allocation2 + $0x64] sm:$0xf] %vm267_vm0, %v3400_v0  ;;  %295 = vst.msk [vmem:[#allocation2 + $0x68] sm:$0xf] %vm267_vm0, %v3400_v0  ;;  %s3812_s29 = scalar_lea.vmem %s4849_s3, %s3177_s20  ;;  %s2875_s30 = sshll.u32 %s4872_s15, 1 }
  0x12   : > { %296 = vst.msk [vmem:[#allocation2 + $0x6c] sm:$0xf] %vm267_vm0, %v3400_v0  ;;  %297 = vst.msk [vmem:[#allocation2 + $0x70] sm:$0xf] %vm267_vm0, %v3400_v0  ;;  %s3817_s7 = scalar_lea.vmem %s4850_s4, %s2875_s30 }
  0x13   : > { %299 = vst.msk [vmem:[#allocation2 + $0x78] sm:$0xf] %vm267_vm0, %v3400_v0  ;;  %300 = vst.msk [vmem:[#allocation2 + $0x7c] sm:$0xf] %vm267_vm0, %v3400_v0 }
  0x14   : > { %301 = vst.msk [vmem:[#allocation2 + $0x80] sm:$0xf] %vm267_vm0, %v3400_v0  ;;  %302 = vst.msk [vmem:[#allocation2 + $0x84] sm:$0xf] %vm267_vm0, %v3400_v0 }
  0x15   : > { %304 = vst.msk [vmem:[#allocation2 + $0x8c] sm:$0xf] %vm267_vm0, %v3400_v0  ;;  %305 = vst.msk [vmem:[#allocation2 + $0x90] sm:$0xf] %vm267_vm0, %v3400_v0 }
  0x16   : > { %306 = vst.msk [vmem:[#allocation2 + $0x94] sm:$0xf] %vm267_vm0, %v3400_v0  ;;  %307 = vst.msk [vmem:[#allocation2 + $0x98] sm:$0xf] %vm267_vm0, %v3400_v0 }
  0x17   : > { %309 = vst.msk [vmem:[#allocation2 + $0xa0] sm:$0xf] %vm267_vm0, %v3400_v0  ;;  %310 = vst.msk [vmem:[#allocation2 + $0xa4] sm:$0xf] %vm267_vm0, %v3400_v0 }
  0x18   : > { %311 = vst.msk [vmem:[#allocation2 + $0xa8] sm:$0xf] %vm267_vm0, %v3400_v0  ;;  %312 = vst.msk [vmem:[#allocation2 + $0xac] sm:$0xf] %vm267_vm0, %v3400_v0 }
  0x19   : > { %314 = vst.msk [vmem:[#allocation2 + $0xb4] sm:$0xf] %vm267_vm0, %v3400_v0  ;;  %315 = vst.msk [vmem:[#allocation2 + $0xb8] sm:$0xf] %vm267_vm0, %v3400_v0 }
  0x1a   : > { %316 = vst.msk [vmem:[#allocation2 + $0xbc] sm:$0xf] %vm267_vm0, %v3400_v0  ;;  %317 = vst.msk [vmem:[#allocation2 + $0xc0] sm:$0xf] %vm267_vm0, %v3400_v0 }
  0x1b   : > { %319 = vst.msk [vmem:[#allocation2 + $0xc8] sm:$0xf] %vm267_vm0, %v3400_v0  ;;  %320 = vst.msk [vmem:[#allocation2 + $0xcc] sm:$0xf] %vm267_vm0, %v3400_v0 }
  0x1c   : > { %321 = vst.msk [vmem:[#allocation2 + $0xd0] sm:$0xf] %vm267_vm0, %v3400_v0  ;;  %322 = vst.msk [vmem:[#allocation2 + $0xd4] sm:$0xf] %vm267_vm0, %v3400_v0 }
  0x1d   : > { %324 = vst.msk [vmem:[#allocation2 + $0xdc] sm:$0xf] %vm267_vm0, %v3400_v0  ;;  %325 = vst.msk [vmem:[#allocation2 + $0xe0] sm:$0xf] %vm267_vm0, %v3400_v0 }
  0x1e   : > { %326 = vst.msk [vmem:[#allocation2 + $0xe4] sm:$0xf] %vm267_vm0, %v3400_v0  ;;  %327 = vst.msk [vmem:[#allocation2 + $0xe8] sm:$0xf] %vm267_vm0, %v3400_v0 }
  0x1f   : > { %329 = vst.msk [vmem:[#allocation2 + $0xf0] sm:$0xf] %vm267_vm0, %v3400_v0  ;;  %330 = vst.msk [vmem:[#allocation2 + $0xf4] sm:$0xf] %vm267_vm0, %v3400_v0 }
  0x20   : > { %331 = vst.msk [vmem:[#allocation2 + $0xf8] sm:$0xf] %vm267_vm0, %v3400_v0  ;;  %332 = vst.msk [vmem:[#allocation2 + $0xfc] sm:$0xf] %vm267_vm0, %v3400_v0 }
  0x21   : > { %334 = vst.msk [vmem:[#allocation2 + $0x104] sm:$0xf] %vm267_vm0, %v3400_v0  ;;  %335 = vst.msk [vmem:[#allocation2 + $0x108] sm:$0xf] %vm267_vm0, %v3400_v0 }
  0x22   : > { %336 = vst.msk [vmem:[#allocation2 + $0x10c] sm:$0xf] %vm267_vm0, %v3400_v0  ;;  %337 = vst.msk [vmem:[#allocation2 + $0x110] sm:$0xf] %vm267_vm0, %v3400_v0 }
  0x23   : > { %339 = vst.msk [vmem:[#allocation2 + $0x118] sm:$0xf] %vm267_vm0, %v3400_v0  ;;  %340 = vst.msk [vmem:[#allocation2 + $0x11c] sm:$0xf] %vm267_vm0, %v3400_v0 }
  0x24   : > { %341 = vst.msk [vmem:[#allocation2 + $0x120] sm:$0xf] %vm267_vm0, %v3400_v0  ;;  %342 = vst.msk [vmem:[#allocation2 + $0x124] sm:$0xf] %vm267_vm0, %v3400_v0 }
  0x25   : > { %344 = vst.msk [vmem:[#allocation2 + $0x12c] sm:$0xf] %vm267_vm0, %v3400_v0  ;;  %345 = vst.msk [vmem:[#allocation2 + $0x130] sm:$0xf] %vm267_vm0, %v3400_v0 }
  0x26   : > { %346 = vst.msk [vmem:[#allocation2 + $0x134] sm:$0xf] %vm267_vm0, %v3400_v0  ;;  %347 = vst.msk [vmem:[#allocation2 + $0x138] sm:$0xf] %vm267_vm0, %v3400_v0 }
  0x27   : > { %349 = vst.msk [vmem:[#allocation2 + $0x140] sm:$0xf] %vm267_vm0, %v3400_v0  ;;  %350 = vst.msk [vmem:[#allocation2 + $0x144] sm:$0xf] %vm267_vm0, %v3400_v0 }
  0x28   : > { %351 = vst.msk [vmem:[#allocation2 + $0x148] sm:$0xf] %vm267_vm0, %v3400_v0  ;;  %352 = vst.msk [vmem:[#allocation2 + $0x14c] sm:$0xf] %vm267_vm0, %v3400_v0 }
  0x29   : > { %354 = vst.msk [vmem:[#allocation2 + $0x154] sm:$0xf] %vm267_vm0, %v3400_v0  ;;  %355 = vst.msk [vmem:[#allocation2 + $0x158] sm:$0xf] %vm267_vm0, %v3400_v0 }
  0x2a   : > { %356 = vst.msk [vmem:[#allocation2 + $0x15c] sm:$0xf] %vm267_vm0, %v3400_v0  ;;  %357 = vst.msk [vmem:[#allocation2 + $0x160] sm:$0xf] %vm267_vm0, %v3400_v0 }
  0x2b   : > { %359 = vst.msk [vmem:[#allocation2 + $0x168] sm:$0xf] %vm267_vm0, %v3400_v0  ;;  %360 = vst.msk [vmem:[#allocation2 + $0x16c] sm:$0xf] %vm267_vm0, %v3400_v0 }
  0x2c   : > { %361 = vst.msk [vmem:[#allocation2 + $0x170] sm:$0xf] %vm267_vm0, %v3400_v0  ;;  %362 = vst.msk [vmem:[#allocation2 + $0x174] sm:$0xf] %vm267_vm0, %v3400_v0 }
  0x2d   : > { %364 = vst.msk [vmem:[#allocation2 + $0x17c] sm:$0xf] %vm267_vm0, %v3400_v0  ;;  %365 = vst.msk [vmem:[#allocation2 + $0x180] sm:$0xf] %vm267_vm0, %v3400_v0 }
  0x2e   : > { %366 = vst.msk [vmem:[#allocation2 + $0x184] sm:$0xf] %vm267_vm0, %v3400_v0  ;;  %367 = vst.msk [vmem:[#allocation2 + $0x188] sm:$0xf] %vm267_vm0, %v3400_v0 }
  0x2f   : > { %369 = vst.msk [vmem:[#allocation2 + $0x190] sm:$0xf] %vm267_vm0, %v3400_v0  ;;  %370 = vst.msk [vmem:[#allocation2 + $0x194] sm:$0xf] %vm267_vm0, %v3400_v0 }
  0x30   : > { %371 = vst.msk [vmem:[#allocation2 + $0x198] sm:$0xf] %vm267_vm0, %v3400_v0  ;;  %372 = vst.msk [vmem:[#allocation2 + $0x19c] sm:$0xf] %vm267_vm0, %v3400_v0 }
  0x31   : > { %374 = vst.msk [vmem:[#allocation2 + $0x1a4] sm:$0xf] %vm267_vm0, %v3400_v0  ;;  %375 = vst.msk [vmem:[#allocation2 + $0x1a8] sm:$0xf] %vm267_vm0, %v3400_v0 }
  0x32   : > { %376 = vst.msk [vmem:[#allocation2 + $0x1ac] sm:$0xf] %vm267_vm0, %v3400_v0  ;;  %377 = vst.msk [vmem:[#allocation2 + $0x1b0] sm:$0xf] %vm267_vm0, %v3400_v0 }
  0x33   : > { %379 = vst.msk [vmem:[#allocation2 + $0x1b8] sm:$0xf] %vm267_vm0, %v3400_v0  ;;  %380 = vst.msk [vmem:[#allocation2 + $0x1bc] sm:$0xf] %vm267_vm0, %v3400_v0 }
  0x34   : > { %381 = vst.msk [vmem:[#allocation2 + $0x1c0] sm:$0xf] %vm267_vm0, %v3400_v0  ;;  %382 = vst.msk [vmem:[#allocation2 + $0x1c4] sm:$0xf] %vm267_vm0, %v3400_v0 }
  0x35   : > { %384 = vst.msk [vmem:[#allocation2 + $0x1cc] sm:$0xf] %vm267_vm0, %v3400_v0  ;;  %385 = vst.msk [vmem:[#allocation2 + $0x1d0] sm:$0xf] %vm267_vm0, %v3400_v0 }
  0x36   : > { %386 = vst.msk [vmem:[#allocation2 + $0x1d4] sm:$0xf] %vm267_vm0, %v3400_v0  ;;  %387 = vst.msk [vmem:[#allocation2 + $0x1d8] sm:$0xf] %vm267_vm0, %v3400_v0 }
  0x37   : > { %389 = vst.msk [vmem:[#allocation2 + $0x1e0] sm:$0xf] %vm267_vm0, %v3400_v0  ;;  %390 = vst.msk [vmem:[#allocation2 + $0x1e4] sm:$0xf] %vm267_vm0, %v3400_v0 }
  0x38   : > { %391 = vst.msk [vmem:[#allocation2 + $0x1e8] sm:$0xf] %vm267_vm0, %v3400_v0  ;;  %392 = vst.msk [vmem:[#allocation2 + $0x1ec] sm:$0xf] %vm267_vm0, %v3400_v0 }
  0x39   : > { %394 = vst.msk [vmem:[#allocation2 + $0x1f4] sm:$0xf] %vm267_vm0, %v3400_v0  ;;  %395 = vst.msk [vmem:[#allocation2 + $0x1f8] sm:$0xf] %vm267_vm0, %v3400_v0 }
  0x3a   : > { %396 = vst.msk [vmem:[#allocation2 + $0x1fc] sm:$0xf] %vm267_vm0, %v3400_v0  ;;  %397 = vst.msk [vmem:[#allocation2 + $0x200] sm:$0xf] %vm267_vm0, %v3400_v0 }
  0x3b   : > { %399 = vst.msk [vmem:[#allocation2 + $0x208] sm:$0xf] %vm267_vm0, %v3400_v0  ;;  %400 = vst.msk [vmem:[#allocation2 + $0x20c] sm:$0xf] %vm267_vm0, %v3400_v0 }
  0x3c   : > { %401 = vst.msk [vmem:[#allocation2 + $0x210] sm:$0xf] %vm267_vm0, %v3400_v0  ;;  %402 = vst.msk [vmem:[#allocation2 + $0x214] sm:$0xf] %vm267_vm0, %v3400_v0 }
  0x3d   : > { %404 = vst.msk [vmem:[#allocation2 + $0x21c] sm:$0xf] %vm267_vm0, %v3400_v0  ;;  %405 = vst.msk [vmem:[#allocation2 + $0x220] sm:$0xf] %vm267_vm0, %v3400_v0 }
  0x3e   : > { %406 = vst.msk [vmem:[#allocation2 + $0x224] sm:$0xf] %vm267_vm0, %v3400_v0  ;;  %407 = vst.msk [vmem:[#allocation2 + $0x228] sm:$0xf] %vm267_vm0, %v3400_v0 }
  0x3f   : > { %409 = vst.msk [vmem:[#allocation2 + $0x230] sm:$0xf] %vm267_vm0, %v3400_v0  ;;  %410 = vst.msk [vmem:[#allocation2 + $0x234] sm:$0xf] %vm267_vm0, %v3400_v0 }
  0x40   : > { %411 = vst.msk [vmem:[#allocation2 + $0x238] sm:$0xf] %vm267_vm0, %v3400_v0  ;;  %412 = vst.msk [vmem:[#allocation2 + $0x23c] sm:$0xf] %vm267_vm0, %v3400_v0 }
  0x41   : > { %414 = vst.msk [vmem:[#allocation2 + $0x244] sm:$0xf] %vm267_vm0, %v3400_v0  ;;  %415 = vst.msk [vmem:[#allocation2 + $0x248] sm:$0xf] %vm267_vm0, %v3400_v0 }
  0x42   : > { %416 = vst.msk [vmem:[#allocation2 + $0x24c] sm:$0xf] %vm267_vm0, %v3400_v0  ;;  %417 = vst.msk [vmem:[#allocation2 + $0x250] sm:$0xf] %vm267_vm0, %v3400_v0 }
  0x43   : > { %419 = vst.msk [vmem:[#allocation2 + $0x258] sm:$0xf] %vm267_vm0, %v3400_v0  ;;  %420 = vst.msk [vmem:[#allocation2 + $0x25c] sm:$0xf] %vm267_vm0, %v3400_v0 }
  0x44   : > { %421 = vst.msk [vmem:[#allocation2 + $0x260] sm:$0xf] %vm267_vm0, %v3400_v0  ;;  %422 = vst.msk [vmem:[#allocation2 + $0x264] sm:$0xf] %vm267_vm0, %v3400_v0 }
  0x45   : > { %424 = vst.msk [vmem:[#allocation2 + $0x26c] sm:$0xf] %vm267_vm0, %v3400_v0  ;;  %425 = vst.msk [vmem:[#allocation2 + $0x270] sm:$0xf] %vm267_vm0, %v3400_v0 }
  0x46   : > { %426 = vst.msk [vmem:[#allocation2 + $0x274] sm:$0xf] %vm267_vm0, %v3400_v0  ;;  %427 = vst.msk [vmem:[#allocation2 + $0x278] sm:$0xf] %vm267_vm0, %v3400_v0 }
  0x47   : > { %429 = vst.msk [vmem:[#allocation2 + $0x280] sm:$0xf] %vm267_vm0, %v3400_v0  ;;  %430 = vst.msk [vmem:[#allocation2 + $0x284] sm:$0xf] %vm267_vm0, %v3400_v0 }
  0x48   : > { %431 = vst.msk [vmem:[#allocation2 + $0x288] sm:$0xf] %vm267_vm0, %v3400_v0  ;;  %432 = vst.msk [vmem:[#allocation2 + $0x28c] sm:$0xf] %vm267_vm0, %v3400_v0 }
  0x49   : > { %434 = vst.msk [vmem:[#allocation2 + $0x294] sm:$0xf] %vm267_vm0, %v3400_v0  ;;  %435 = vst.msk [vmem:[#allocation2 + $0x298] sm:$0xf] %vm267_vm0, %v3400_v0 }
  0x4a   : > { %436 = vst.msk [vmem:[#allocation2 + $0x29c] sm:$0xf] %vm267_vm0, %v3400_v0  ;;  %437 = vst.msk [vmem:[#allocation2 + $0x2a0] sm:$0xf] %vm267_vm0, %v3400_v0 }
  0x4b   : > { %273 = vst.msk [vmem:[#allocation2 + $0x10] sm:$0x1] %vm272_vm1, %v3400_v0  ;;  %278 = vst.msk [vmem:[#allocation2 + $0x24] sm:$0x1] %vm272_vm1, %v3400_v0 }
  0x4c   : > { %283 = vst.msk [vmem:[#allocation2 + $0x38] sm:$0x1] %vm272_vm1, %v3400_v0  ;;  %288 = vst.msk [vmem:[#allocation2 + $0x4c] sm:$0x1] %vm272_vm1, %v3400_v0 }
  0x4d   : > { %293 = vst.msk [vmem:[#allocation2 + $0x60] sm:$0x1] %vm272_vm1, %v3400_v0  ;;  %298 = vst.msk [vmem:[#allocation2 + $0x74] sm:$0x1] %vm272_vm1, %v3400_v0 }
  0x4e   : > { %303 = vst.msk [vmem:[#allocation2 + $0x88] sm:$0x1] %vm272_vm1, %v3400_v0  ;;  %308 = vst.msk [vmem:[#allocation2 + $0x9c] sm:$0x1] %vm272_vm1, %v3400_v0 }
  0x4f   : > { %313 = vst.msk [vmem:[#allocation2 + $0xb0] sm:$0x1] %vm272_vm1, %v3400_v0  ;;  %318 = vst.msk [vmem:[#allocation2 + $0xc4] sm:$0x1] %vm272_vm1, %v3400_v0 }
  0x50   : > { %323 = vst.msk [vmem:[#allocation2 + $0xd8] sm:$0x1] %vm272_vm1, %v3400_v0  ;;  %328 = vst.msk [vmem:[#allocation2 + $0xec] sm:$0x1] %vm272_vm1, %v3400_v0 }
  0x51   : > { %333 = vst.msk [vmem:[#allocation2 + $0x100] sm:$0x1] %vm272_vm1, %v3400_v0  ;;  %338 = vst.msk [vmem:[#allocation2 + $0x114] sm:$0x1] %vm272_vm1, %v3400_v0 }
  0x52   : > { %343 = vst.msk [vmem:[#allocation2 + $0x128] sm:$0x1] %vm272_vm1, %v3400_v0  ;;  %348 = vst.msk [vmem:[#allocation2 + $0x13c] sm:$0x1] %vm272_vm1, %v3400_v0 }
  0x53   : > { %353 = vst.msk [vmem:[#allocation2 + $0x150] sm:$0x1] %vm272_vm1, %v3400_v0  ;;  %358 = vst.msk [vmem:[#allocation2 + $0x164] sm:$0x1] %vm272_vm1, %v3400_v0 }
  0x54   : > { %363 = vst.msk [vmem:[#allocation2 + $0x178] sm:$0x1] %vm272_vm1, %v3400_v0  ;;  %368 = vst.msk [vmem:[#allocation2 + $0x18c] sm:$0x1] %vm272_vm1, %v3400_v0 }
  0x55   : > { %373 = vst.msk [vmem:[#allocation2 + $0x1a0] sm:$0x1] %vm272_vm1, %v3400_v0  ;;  %378 = vst.msk [vmem:[#allocation2 + $0x1b4] sm:$0x1] %vm272_vm1, %v3400_v0 }
  0x56   : > { %383 = vst.msk [vmem:[#allocation2 + $0x1c8] sm:$0x1] %vm272_vm1, %v3400_v0  ;;  %388 = vst.msk [vmem:[#allocation2 + $0x1dc] sm:$0x1] %vm272_vm1, %v3400_v0 }
  0x57   : > { %393 = vst.msk [vmem:[#allocation2 + $0x1f0] sm:$0x1] %vm272_vm1, %v3400_v0  ;;  %398 = vst.msk [vmem:[#allocation2 + $0x204] sm:$0x1] %vm272_vm1, %v3400_v0 }
  0x58   : > { %403 = vst.msk [vmem:[#allocation2 + $0x218] sm:$0x1] %vm272_vm1, %v3400_v0  ;;  %408 = vst.msk [vmem:[#allocation2 + $0x22c] sm:$0x1] %vm272_vm1, %v3400_v0 }
  0x59   : > { %413 = vst.msk [vmem:[#allocation2 + $0x240] sm:$0x1] %vm272_vm1, %v3400_v0  ;;  %418 = vst.msk [vmem:[#allocation2 + $0x254] sm:$0x1] %vm272_vm1, %v3400_v0 }
  0x5a   : > { %423 = vst.msk [vmem:[#allocation2 + $0x268] sm:$0x1] %vm272_vm1, %v3400_v0  ;;  %428 = vst.msk [vmem:[#allocation2 + $0x27c] sm:$0x1] %vm272_vm1, %v3400_v0 }
  0x5b   : > { %433 = vst.msk [vmem:[#allocation2 + $0x290] sm:$0x1] %vm272_vm1, %v3400_v0  ;;  %438 = vst.msk [vmem:[#allocation2 + $0x2a4] sm:$0x1] %vm272_vm1, %v3400_v0 }
  0x5c LB: >> { %s3183_s9 = sshll.u32 %s3386_s8, 6  ;;  %vm459_vm2 = vsmask.f32 256  ;;  %vm460_vm3 = vsmask.f32 4368  ;;  %s3401_s11 = smov 4   ;;  %s3386_s8 = sphi %s3819_s8, %s444_s8  }
  0x5d   : >> { %s3826_s10 = scalar_lea.vmem %s3807_s26, %s3183_s9  ;;  %s3180_s12 = sshll.u32 %s3386_s8, 5  ;;  %vm3885_vm4 = vmor %vm459_vm2, %vm460_vm3  ;;  %vm545_vm5 = vcmask 27648   ;;  %vm546_vm6 = vsmask.f32 7938  ;;  %vm555_vm7 = vcmask 24576   ;;  %vm806_vm10 = vcmask 60448  }
  0x5e   : >> { %v594_v1 = vld [vmem:[%s3826_s10 + $0x10] sm:$0xf]  ;;  %v590_v2 = vld [vmem:[%s3826_s10] sm:$0xf]  ;;  %v3831_v7 = vld [vmem:[%s3826_s10 + $0x1c] sm:$0xf]  ;;  %s3896_s14 = scalar_lea.vmem %s3802_s23, %s3180_s12 }
  0x5f   : >> { %v642_v3 = vshrl.u32 %v594_v1, 16  ;;  %v645_v4 = vshll.u32 %v594_v1, 16  ;;  %v607_v5 = vshrl.u32 %v590_v2, 16  ;;  %v610_v6 = vshll.u32 %v590_v2, 16  ;;  %v3835_v9 = vld [vmem:[%s3826_s10 + $0xc] sm:$0xf]  ;;  %vm3966_vm8 = vmand %vm545_vm5, %vm546_vm6 }
  0x60   : >> { %v668_v8 = vshrl.u32 %v3831_v7, 16  ;;  %v3838_v10 = vld [vmem:[%s3826_s10 + $0x2c] sm:$0xf]  ;;  %v633_v13 = vshrl.u32 %v3835_v9, 16  ;;  %v598_v15 = vld [vmem:[%s3826_s10 + $0x20] sm:$0xf]  ;;  %vm3999_vm9 = vmand %vm555_vm7, %vm459_vm2 }
  0x61   : >> { %v3840_v11 = vrot.slane %v642_v3, 7  ;;  %v3842_v12 = vrot.slane %v607_v5, 7  ;;  %v703_v14 = vshrl.u32 %v3838_v10, 16  ;;  %v677_v17 = vshrl.u32 %v598_v15, 16  ;;  %v3850_v18 = vld [vmem:[%s3826_s10 + $0x3c] sm:$0xf]  ;;  %vm4096_vm11 = vmand %vm806_vm10, %vm546_vm6 }
  0x62   : >> { %v3847_v16 = vrot.slane %v668_v8, 7  ;;  %v602_v21 = vld [vmem:[%s3826_s10 + $0x30] sm:$0xf]  ;;  %v591_v22 = vld [vmem:[%s3826_s10 + $0x4] sm:$0xf]  ;;  %v635_v24 = vrot.slane %v633_v13, 7 }
  0x63   : >> { %v647_v19 = vor.u32 %v645_v4, %v3840_v11  ;;  %v612_v20 = vor.u32 %v610_v6, %v3842_v12  ;;  %v3857_v25 = vrot.slane %v703_v14, 7  ;;  %v680_v26 = vshll.u32 %v598_v15, 16  ;;  %v592_v27 = vld [vmem:[%s3826_s10 + $0x8] sm:$0xf]  ;;  %v595_v32 = vld [vmem:[%s3826_s10 + $0x14] sm:$0xf] }
  0x64   : >> { %v675_v23 = vrot.slane %v3847_v16, 4  ;;  %v3862_v28 = vrot.slane %v677_v17, 7  ;;  %v738_v29 = vshrl.u32 %v3850_v18, 16  ;;  %v712_v30 = vshrl.u32 %v602_v21, 16  ;;  %v596_v41 = vld [vmem:[%s3826_s10 + $0x18] sm:$0xf] }
  0x65   : >> { %756 = vrot.lane.b32.xlu1 %v647_v19, %s3401_s11  ;;  %746 = vrot.lane.b32.xlu0 %v612_v20, %s3401_s11  ;;  %v615_v31 = vshrl.u32 %v591_v22, 16  ;;  %v640_v33 = vrot.slane %v635_v24, 4  ;;  %v624_v34 = vshrl.u32 %v592_v27, 16  ;;  %v636_v35 = vshll.u32 %v3835_v9, 16  ;;  %v599_v46 = vld [vmem:[%s3826_s10 + $0x24] sm:$0xf] }
  0x66   : >> { %v671_v36 = vshll.u32 %v3831_v7, 16  ;;  %v3868_v37 = vrot.slane %v738_v29, 7  ;;  %v715_v38 = vshll.u32 %v602_v21, 16  ;;  %v627_v40 = vshll.u32 %v592_v27, 16  ;;  %v600_v55 = vld [vmem:[%s3826_s10 + $0x28] sm:$0xf] }
  0x67   : >> { %v617_v39 = vrot.slane %v615_v31, 7  ;;  %v3871_v42 = vrot.slane %v712_v30, 7  ;;  %v626_v43 = vrot.slane %v624_v34, 7  ;;  %v618_v44 = vshll.u32 %v591_v22, 16  ;;  %s2881_s13 = smul.u32 80, %s3386_s8  ;;  %s444_s8 = sadd.s32 1, %s3386_s8  }
  0x68   : >> { %v650_v45 = vshrl.u32 %v595_v32, 16  ;;  %v648_v47 = vrot.slane %v3840_v11, 4  ;;  %v613_v48 = vrot.slane %v3842_v12, 4  ;;  %v710_v49 = vrot.slane %v3857_v25, 4  ;;  %v603_v5 = vld [vmem:[%s3826_s10 + $0x34] sm:$0xf] }
  0x69   : >> { %764 = vrot.lane.b32.xlu1 %v675_v23, %s3401_s11  ;;  %754 = vrot.lane.b32.xlu0 %v640_v33, %s3401_s11  ;;  %v682_v50 = vor.u32 %v680_v26, %v3862_v28  ;;  %v622_v51 = vrot.slane %v617_v39, 4  ;;  %v629_v52 = vor.u32 %v627_v40, %v626_v43  ;;  %v653_v54 = vshll.u32 %v595_v32, 16  ;;  %v3903_v15 = vld [vmem:[%s3826_s10 + $0x38] sm:$0xf]  ;;  %v449_v21 = vld [vmem:[%s3896_s14] sm:$0xf] }
  0x6a   : >> { %v652_v53 = vrot.slane %v650_v45, 7  ;;  %v745_v56 = vrot.slane %v3868_v37, 4  ;;  %v659_v58 = vshrl.u32 %v596_v41, 16  ;;  %v662_v59 = vshll.u32 %v596_v41, 16  ;;  %v453_v31 = vld [vmem:[%s3896_s14 + $0x10] sm:$0xf] }
  0x6b   : >> { %v685_v60 = vshrl.u32 %v599_v46, 16  ;;  %v717_v61 = vor.u32 %v715_v38, %v3871_v42  ;;  %v620_v62 = vor.u32 %v618_v44, %v617_v39  ;;  %v631_v63 = vrot.slane %v626_v43, 4  ;;  %s3939_s15 = scalar_lea.vmem [#allocation2], %s2881_s13  ;;  %v3943_v41 = vld [vmem:[%s3896_s14 + $0xc] sm:$0xf]  ;;  %p441_p5 = scmp.ge.s32.totalorder %s444_s8, 8  }
  0x6c   : >> { %v638_v0 = vor.u32 %v636_v35, %v635_v24  ;;  %v661_v1 = vrot.slane %v659_v58, 7  ;;  %v673_v2 = vor.u32 %v671_v36, %v3847_v16  ;;  %v694_v4 = vshrl.u32 %v600_v55, 16  ;;  %v2882_v40 = vld [vmem:[%s3939_s15 + $0x14] sm:$0xf]  ;;  %s4213_s13 = smov (%p441_p5), 0  }
  0x6d   : >> { %774 = vrot.lane.b32.xlu1 %v710_v49, %s3401_s11  ;;  %766 = vrot.lane.b32.xlu0 %v682_v50, %s3401_s11  ;;  %v687_v3 = vrot.slane %v685_v60, 7  ;;  %v630_v6 = vsel %vm3885_vm4, %v622_v51, %v629_v52  ;;  %v655_v7 = vor.u32 %v653_v54, %v652_v53  ;;  %v697_v8 = vshll.u32 %v600_v55, 16  ;;  %v2889_v52 = vld [vmem:[%s3939_s15 + $0x28] sm:$0xf]  ;;  %v2896_v60 = vld [vmem:[%s3939_s15 + $0x3c] sm:$0xf] }
  0x6e   : >> { %v688_v9 = vshll.u32 %v599_v46, 16  ;;  %v666_v11 = vrot.slane %v661_v1, 4  ;;  %v657_v12 = vrot.slane %v652_v53, 4  ;;  %v664_v13 = vor.u32 %v662_v59, %v661_v1  ;;  %v450_v46 = vld [vmem:[%s3896_s14 + $0x4] sm:$0xf] }
  0x6f   : >> { %v3900_v14 = vrot.slane %v694_v4, 7  ;;  %v683_v16 = vrot.slane %v3862_v28, 4  ;;  %v720_v19 = vshrl.u32 %v603_v5, 16  ;;  %v723_v20 = vshll.u32 %v603_v5, 16  ;;  %v2887_v4 = vld [vmem:[%s3939_s15 + $0x24] sm:$0x1] }
  0x70   : >> { %v690_v17 = vor.u32 %v688_v9, %v687_v3  ;;  %v621_v22 = vsel %vm3885_vm4, %v613_v48, %v620_v62  ;;  %v639_v23 = vsel %vm3885_vm4, %v631_v63, %v638_v0  ;;  %v692_v24 = vrot.slane %v687_v3, 4  ;;  %v2894_v3 = vld [vmem:[%s3939_s15 + $0x38] sm:$0x1] }
  0x71   : >> { %784 = vrot.lane.b32.xlu1 %v745_v56, %s3401_s11  ;;  %776 = vrot.lane.b32.xlu0 %v717_v61, %s3401_s11  ;;  %v699_v26 = vor.u32 %v697_v8, %v3900_v14  ;;  %v656_v27 = vsel %vm3885_vm4, %v648_v47, %v655_v7  ;;  %v3916_v28 = vrot.slane %v720_v19, 7  ;;  %v706_v29 = vshll.u32 %v3838_v10, 16  ;;  %v451_v56 = vld [vmem:[%s3896_s14 + $0x8] sm:$0xf]  ;;  %v2903_v61 = vld [vmem:[%s3939_s15 + $0x50] sm:$0xf] }
  0x72   : >> { %v729_v30 = vshrl.u32 %v3903_v15, 16  ;;  %v3923_v32 = vsel %vm3885_vm4, %v666_v11, %v673_v2  ;;  %v3927_v33 = vsel %vm3885_vm4, %v657_v12, %v664_v13  ;;  %v718_v34 = vrot.slane %v3871_v42, 4  ;;  %v3946_v42 = vld [vmem:[%s3896_s14 + $0x1c] sm:$0xf]  ;;  %v454_v11 = vld [vmem:[%s3896_s14 + $0x14] sm:$0xf] }
  0x73   : >> { %v463_v35 = vshrl.u32 %v449_v21, 16  ;;  %v3932_v36 = vsel %vm3885_vm4, %v683_v16, %v690_v17  ;;  %v725_v10 = vor.u32 %v723_v20, %v3916_v28  ;;  %v701_v38 = vrot.slane %v3900_v14, 4  ;;  %v2901_v17 = vld [vmem:[%s3939_s15 + $0x4c] sm:$0x1]  ;;  %v2908_v19 = vld [vmem:[%s3939_s15 + $0x60] sm:$0x1] }
  0x74   : >> { %v741_v39 = vshll.u32 %v3850_v18, 16  ;;  %v3952_v43 = vsel %vm3885_vm4, %v692_v24, %v699_v26  ;;  %v466_v44 = vshll.u32 %v449_v21, 16  ;;  %v498_v45 = vshrl.u32 %v453_v31, 16  ;;  %v455_v26 = vld [vmem:[%s3896_s14 + $0x18] sm:$0xf] }
  0x75   : >> { %750 = vrot.lane.b32.xlu1 %v630_v6, %s3401_s11  ;;  %748 = vrot.lane.b32.xlu0 %v621_v22, %s3401_s11  ;;  %v3954_v18 = vrot.slane %v463_v35, 7  ;;  %v3958_v47 = vor.u32 %v706_v29, %v3857_v25  ;;  %v3960_v48 = vrot.slane %v729_v30, 7  ;;  %v727_v49 = vrot.slane %v3916_v28, 4 }
  0x76   : >> { %v732_v50 = vshll.u32 %v3903_v15, 16  ;;  %v3972_v54 = vrot.slane %v498_v45, 7  ;;  %v501_v25 = vshll.u32 %v453_v31, 16  ;;  %v489_v55 = vshrl.u32 %v3943_v41, 16 }
  0x77   : >> { %v468_v53 = vor.u32 %v466_v44, %v3954_v18  ;;  %v3978_v58 = vsel %vm3885_vm4, %v718_v34, %v725_v10  ;;  %v3981_v59 = vor.u32 %v741_v39, %v3868_v37  ;;  %v524_v62 = vshrl.u32 %v3946_v42, 16 }
  0x78   : >> { %v471_v63 = vshrl.u32 %v450_v46, 16  ;;  %v503_v0 = vor.u32 %v501_v25, %v3972_v54  ;;  %v491_v2 = vrot.slane %v489_v55, 7  ;;  %v480_v8 = vshrl.u32 %v451_v56, 16 }
  0x79   : >> { %758 = vrot.lane.b32.xlu1 %v656_v27, %s3401_s11  ;;  %752 = vrot.lane.b32.xlu0 %v639_v23, %s3401_s11  ;;  %v549_v1 = vsel %vm3966_vm8, %v468_v53, %v2882_v40  ;;  %v561_v37 = vsel %vm3966_vm8, %v468_v53, %v2889_v52  ;;  %v526_v6 = vrot.slane %v524_v62, 7  ;;  %v483_v9 = vshll.u32 %v451_v56, 16 }
  0x7a   : >> { %2883 = vst [vmem:[%s3939_s15 + $0x14] sm:$0xf] %v549_v1  ;;  %2890 = vst [vmem:[%s3939_s15 + $0x28] sm:$0xf] %v561_v37  ;;  %v473_v7 = vrot.slane %v471_v63, 7  ;;  %v570_v12 = vsel %vm3966_vm8, %v503_v0, %v2896_v60  ;;  %v579_v13 = vsel %vm3966_vm8, %v503_v0, %v2903_v61  ;;  %v496_v16 = vrot.slane %v491_v2, 4 }
  0x7b   : >> { %v469_v20 = vrot.slane %v3954_v18, 4  ;;  %2897 = vst [vmem:[%s3939_s15 + $0x3c] sm:$0xf] %v570_v12  ;;  %2904 = vst [vmem:[%s3939_s15 + $0x50] sm:$0xf] %v579_v13  ;;  %v531_v21 = vrot.slane %v526_v6, 4  ;;  %v709_v18 = vsel %vm3885_vm4, %v701_v38, %v3958_v47 }
  0x7c   : >> { %v478_v22 = vrot.slane %v473_v7, 4  ;;  %v482_v23 = vrot.slane %v480_v8, 7  ;;  %v474_v24 = vshll.u32 %v450_v46, 16  ;;  %v567_v27 = vsel %vm3999_vm9, %v496_v16, %v2894_v3 }
  0x7d   : >> { %762 = vrot.lane.b32.xlu1 %v3923_v32, %s3401_s11  ;;  %760 = vrot.lane.b32.xlu0 %v3927_v33, %s3401_s11  ;;  %v558_v29 = vsel %vm3999_vm9, %v496_v16, %v2887_v4  ;;  %v492_v30 = vshll.u32 %v3943_v41, 16  ;;  %v506_v31 = vshrl.u32 %v454_v11, 16  ;;  %2895 = vst [vmem:[%s3939_s15 + $0x38] sm:$0x1] %v567_v27  ;;  %v576_v34 = vsel %vm3999_vm9, %v531_v21, %v2901_v17 }
  0x7e   : >> { %2888 = vst [vmem:[%s3939_s15 + $0x24] sm:$0x1] %v558_v29  ;;  %v585_v32 = vsel %vm3999_vm9, %v531_v21, %v2908_v19  ;;  %v485_v35 = vor.u32 %v483_v9, %v482_v23  ;;  %v476_v33 = vor.u32 %v474_v24, %v473_v7  ;;  %2902 = vst [vmem:[%s3939_s15 + $0x4c] sm:$0x1] %v576_v34  ;;  %v487_v10 = vrot.slane %v482_v23, 4 }
  0x7f   : >> { %2909 = vst [vmem:[%s3939_s15 + $0x60] sm:$0x1] %v585_v32  ;;  %v494_v39 = vor.u32 %v492_v30, %v491_v2  ;;  %v508_v40 = vrot.slane %v506_v31, 7  ;;  %v515_v41 = vshrl.u32 %v455_v26, 16  ;;  %v518_v46 = vshll.u32 %v455_v26, 16 }
  0x80   : >> { %v486_v44 = vsel %vm3885_vm4, %v478_v22, %v485_v35  ;;  %v477_v45 = vsel %vm3885_vm4, %v469_v20, %v476_v33  ;;  %v736_v14 = vrot.slane %v3960_v48, 4  ;;  %v509_v52 = vshll.u32 %v454_v11, 16  ;;  %v4167_v33 = vld [vmem:[%s4848_s2] sm:$0xf] (%p441_p5) }
  0x81   : >> { %770 = vrot.lane.b32.xlu1 %v3952_v43, %s3401_s11  ;;  %768 = vrot.lane.b32.xlu0 %v3932_v36, %s3401_s11  ;;  %2885 = vst.msk [vmem:[%s3939_s15 + $0x1c] sm:$0xf] %vm545_vm5, %v486_v44  ;;  %2892 = vst.msk [vmem:[%s3939_s15 + $0x30] sm:$0xf] %vm545_vm5, %v486_v44  ;;  %v495_v38 = vsel %vm3885_vm4, %v487_v10, %v494_v39  ;;  %v513_v47 = vrot.slane %v508_v40, 4  ;;  %v517_v51 = vrot.slane %v515_v41, 7 }
  0x82   : >> { %2884 = vst.msk [vmem:[%s3939_s15 + $0x18] sm:$0xf] %vm545_vm5, %v477_v45  ;;  %2891 = vst.msk [vmem:[%s3939_s15 + $0x2c] sm:$0xf] %vm545_vm5, %v477_v45  ;;  %v734_v36 = vor.u32 %v732_v50, %v3960_v48  ;;  %v504_v43 = vrot.slane %v3972_v54, 4  ;;  %v527_v53 = vshll.u32 %v3946_v42, 16  ;;  %v511_v56 = vor.u32 %v509_v52, %v508_v40 }
  0x83   : >> { %2886 = vst.msk [vmem:[%s3939_s15 + $0x20] sm:$0xf] %vm545_vm5, %v495_v38  ;;  %2893 = vst.msk [vmem:[%s3939_s15 + $0x34] sm:$0xf] %vm545_vm5, %v495_v38  ;;  %v520_v25 = vor.u32 %v518_v46, %v517_v51  ;;  %v522_v55 = vrot.slane %v517_v51, 4  ;;  %v744_v42 = vsel %vm3885_vm4, %v736_v14, %v3981_v59  ;;  %vm815_vm12 = vcmask 57376  }
  0x84   : >> { %v529_v15 = vor.u32 %v527_v53, %v526_v6  ;;  %v735_v50 = vsel %vm3885_vm4, %v727_v49, %v734_v36  ;;  %v512_v54 = vsel %vm3885_vm4, %v504_v43, %v511_v56  ;;  %v2919_v28 = vld [vmem:[%s3939_s15 + $0x28] sm:$0xf]  ;;  %v2912_v49 = vld [vmem:[%s3939_s15 + $0x14] sm:$0xf]  ;;  %vm4109_vm13 = vmand %vm815_vm12, %vm459_vm2  ;;  %v4209_v14 = vmov (%p441_p5), 0.0  }
  0x85   : >> { %778 = vrot.lane.b32.xlu1 %v3978_v58, %s3401_s11  ;;  %772 = vrot.lane.b32.xlu0 %v709_v18, %s3401_s11  ;;  %v521_v48 = vsel %vm3885_vm4, %v513_v47, %v520_v25  ;;  %2898 = vst.msk [vmem:[%s3939_s15 + $0x40] sm:$0xf] %vm545_vm5, %v512_v54  ;;  %2905 = vst.msk [vmem:[%s3939_s15 + $0x54] sm:$0xf] %vm545_vm5, %v512_v54  ;;  %v4211_v38 = vmov (%p441_p5), 0.0  }
  0x86   : >> { %2899 = vst.msk [vmem:[%s3939_s15 + $0x44] sm:$0xf] %vm545_vm5, %v521_v48  ;;  %2906 = vst.msk [vmem:[%s3939_s15 + $0x58] sm:$0xf] %vm545_vm5, %v521_v48  ;;  %v530_v58 = vsel %vm3885_vm4, %v522_v55, %v529_v15  ;;  %v2924_v0 = vld [vmem:[%s3939_s15 + $0x38] sm:$0x1] }
  0x87   : >> { %2900 = vst.msk [vmem:[%s3939_s15 + $0x48] sm:$0xf] %vm545_vm5, %v530_v58  ;;  %2907 = vst.msk [vmem:[%s3939_s15 + $0x5c] sm:$0xf] %vm545_vm5, %v530_v58  ;;  %v2917_v1 = vld [vmem:[%s3939_s15 + $0x24] sm:$0x1] }
  0x88   : >> { %v2931_v5 = vld [vmem:[%s3939_s15 + $0x4c] sm:$0x1]  ;;  %v2926_v6 = vld [vmem:[%s3939_s15 + $0x3c] sm:$0xf]  ;;  %v2938_v12 = vld [vmem:[%s3939_s15 + $0x60] sm:$0x1] }
  0x89   : >> { %782 = vrot.lane.b32.xlu1 %v744_v42, %s3401_s11  ;;  %780 = vrot.lane.b32.xlu0 %v735_v50, %s3401_s11  ;;  %v2933_v13 = vld [vmem:[%s3939_s15 + $0x50] sm:$0xf]  ;;  %v4172_v10 = vld [vmem:[%s4848_s2 + $0x4] sm:$0xf] (%p441_p5) }
  0x8a   : > { %v4177_v39 = vld [vmem:[%s4848_s2 + $0x8] sm:$0xf] (%p441_p5)  ;;  %v4182_v40 = vld [vmem:[%s4848_s2 + $0xc] sm:$0xf] (%p441_p5)  ;;  %v4187_v41 = vld [vmem:[%s4848_s2 + $0x10] sm:$0xf] (%p441_p5) }
  0x8b   : > { %v4192_v18 = vld [vmem:[%s4848_s2 + $0x14] sm:$0xf] (%p441_p5)  ;;  %v4197_v44 = vld [vmem:[%s4848_s2 + $0x18] sm:$0xf] (%p441_p5)  ;;  %v4202_v45 = vld [vmem:[%s4848_s2 + $0x1c] sm:$0xf] (%p441_p5) }
  0x8c   : > { %v4207_v46 = vld [vmem:[%s4848_s2 + $0x20] sm:$0xf] (%p441_p5) }
  0xd7   : >> { %v757_v59 = vpop.permute.xlu1 %756  ;;  %v747_v60 = vpop.permute.xlu0 %746 }
  0xd8   : >> { %v821_v61 = vsel %vm4096_vm11, %v757_v59, %v2919_v28  ;;  %v809_v62 = vsel %vm4096_vm11, %v747_v60, %v2912_v49 }
  0xd9   : >> { %2920 = vst [vmem:[%s3939_s15 + $0x28] sm:$0xf] %v821_v61  ;;  %2913 = vst [vmem:[%s3939_s15 + $0x14] sm:$0xf] %v809_v62 }
  0xdb   : >> { %v765_v37 = vpop.permute.xlu1 %764  ;;  %v755_v2 = vpop.permute.xlu0 %754 }
  0xdc   : >> { %v827_v3 = vsel %vm4109_vm13, %v765_v37, %v2924_v0  ;;  %v818_v4 = vsel %vm4109_vm13, %v755_v2, %v2917_v1 }
  0xdd   : >> { %2925 = vst [vmem:[%s3939_s15 + $0x38] sm:$0x1] %v827_v3  ;;  %2918 = vst [vmem:[%s3939_s15 + $0x24] sm:$0x1] %v818_v4 }
  0xdf   : >> { %v775_v7 = vpop.permute.xlu1 %774  ;;  %v767_v8 = vpop.permute.xlu0 %766 }
  0xe0   : >> { %v836_v9 = vsel %vm4109_vm13, %v775_v7, %v2931_v5  ;;  %v830_v11 = vsel %vm4096_vm11, %v767_v8, %v2926_v6 }
  0xe1   : >> { %2932 = vst [vmem:[%s3939_s15 + $0x4c] sm:$0x1] %v836_v9  ;;  %2927 = vst [vmem:[%s3939_s15 + $0x3c] sm:$0xf] %v830_v11 }
  0xe3   : >> { %v785_v16 = vpop.permute.xlu1 %784  ;;  %v777_v17 = vpop.permute.xlu0 %776 }
  0xe4   : >> { %v845_v19 = vsel %vm4109_vm13, %v785_v16, %v2938_v12  ;;  %v839_v20 = vsel %vm4096_vm11, %v777_v17, %v2933_v13 }
  0xe5   : >> { %2939 = vst [vmem:[%s3939_s15 + $0x60] sm:$0x1] %v845_v19  ;;  %2934 = vst [vmem:[%s3939_s15 + $0x50] sm:$0xf] %v839_v20 }
  0xe7   : >> { %v751_v21 = vpop.permute.xlu1 %750  ;;  %v749_v22 = vpop.permute.xlu0 %748 }
  0xe8   : >> { %2915 = vst.msk [vmem:[%s3939_s15 + $0x1c] sm:$0xf] %vm806_vm10, %v751_v21  ;;  %2914 = vst.msk [vmem:[%s3939_s15 + $0x18] sm:$0xf] %vm806_vm10, %v749_v22 }
  0xeb   : >> { %v759_v23 = vpop.permute.xlu1 %758  ;;  %v753_v24 = vpop.permute.xlu0 %752 }
  0xec   : >> { %2921 = vst.msk [vmem:[%s3939_s15 + $0x2c] sm:$0xf] %vm806_vm10, %v759_v23  ;;  %2916 = vst.msk [vmem:[%s3939_s15 + $0x20] sm:$0xf] %vm806_vm10, %v753_v24 }
  0xef   : >> { %v763_v26 = vpop.permute.xlu1 %762  ;;  %v761_v27 = vpop.permute.xlu0 %760 }
  0xf0   : >> { %2923 = vst.msk [vmem:[%s3939_s15 + $0x34] sm:$0xf] %vm806_vm10, %v763_v26  ;;  %2922 = vst.msk [vmem:[%s3939_s15 + $0x30] sm:$0xf] %vm806_vm10, %v761_v27 }
  0xf3   : >> { %v771_v29 = vpop.permute.xlu1 %770  ;;  %v769_v30 = vpop.permute.xlu0 %768 }
  0xf4   : >> { %2929 = vst.msk [vmem:[%s3939_s15 + $0x44] sm:$0xf] %vm806_vm10, %v771_v29  ;;  %2928 = vst.msk [vmem:[%s3939_s15 + $0x40] sm:$0xf] %vm806_vm10, %v769_v30 }
  0xf6   : > { %443 = sbr.rel (!%p441_p5) target bundleno = 92 (0x5c), region = 102 }
  0xf7   : >> { %v779_v31 = vpop.permute.xlu1 %778  ;;  %v773_v34 = vpop.permute.xlu0 %772 }
  0xf8   : >> { %2935 = vst.msk [vmem:[%s3939_s15 + $0x54] sm:$0xf] %vm806_vm10, %v779_v31  ;;  %2930 = vst.msk [vmem:[%s3939_s15 + $0x48] sm:$0xf] %vm806_vm10, %v773_v34 }
  0xfb   : >> { %v783_v32 = vpop.permute.xlu1 %782  ;;  %v781_v35 = vpop.permute.xlu0 %780 }
  0xfc   : >> { %2937 = vst.msk [vmem:[%s3939_s15 + $0x5c] sm:$0xf] %vm806_vm10, %v783_v32  ;;  %2936 = vst.msk [vmem:[%s3939_s15 + $0x58] sm:$0xf] %vm806_vm10, %v781_v35 }
  0xfd LB: >> { %vm1239_vm14 = vcmask 1042432   ;;  %vm1240_vm15 = vcmask 1046532   ;;  %s3184_s14 = smul.u32 80, %s3398_s13  ;;  %s3402_s19 = smov 24   ;;  %vm963_vm3 = vsmask.f32 3328  ;;  %s3398_s13 = sphi %s4213_s13, %s862_s13   ;;  %v3394_v38 = vphi %v4211_v38, %v4866_v38   ;;  %v3390_v14 = vphi %v4209_v14, %v4865_v14  }
  0xfe   : >> { %vm4225_vm2 = vmor %vm1239_vm14, %vm1240_vm15  ;;  %vm964_vm4 = vsmask.f32 7440  ;;  %s3403_s20 = smov 40   ;;  %s3404_s21 = smov 16   ;;  %vm934_vm6 = vcmask 64512   ;;  %vm1190_vm7 = vcmask 130112  }
  0xff   : >> { %s4229_s15 = scalar_lea.vmem [#allocation2], %s3184_s14  ;;  %vm4267_vm5 = vmor %vm963_vm3, %vm964_vm4  ;;  %s3405_s22 = smov 8   ;;  %vm1342_vm8 = vcmask 195712   ;;  %vm1435_vm9 = vcmask 261312   ;;  %vm1688_vm10 = vcmask 326912   ;;  %vm1837_vm11 = vcmask 392512  }
 0x100   : >> { %s3406_s24 = smov 32   ;;  %s3407_s25 = smov 48   ;;  %vm1930_vm12 = vcmask 458112   ;;  %vm2183_vm13 = vcmask 523712   ;;  %vm2401_vm14 = vcmask 1043456   ;;  %vm2332_vm15 = vcmask 589312  }
 0x101   : >> { %s3408_s27 = smov 56   ;;  %s3409_s28 = smov 64  }
 0x102   : >> { %s3202_s23 = sshll.u32 %s3398_s13, 6  ;;  %s862_s13 = sadd.s32 1, %s3398_s13  }
 0x103   : >> { %v3320_v51 = vld [vmem:[%s4229_s15 + $0x1c] sm:$0xff]   ;;  %v3321_v36 = vld [vmem:[%s4229_s15 + $0x14] sm:$0xff]   ;;  %v1200_v48 = vld [vmem:[%s4229_s15 + $0x4] sm:$0xf]  ;;  %s4758_s26 = scalar_lea.vmem %s3812_s29, %s3202_s23  ;;  %p859_p6 = scmp.ge.s32.totalorder %s862_s13, 8  }
 0x104   : >> { %1413 = vrot.lane.b32.xlu1 %v3320_v51, %s3402_s19  ;;  %v3025_v43 = vld [vmem:[%s4229_s15 + $0x14] sm:$0xe]  ;;  %v3026_v52 = vld [vmem:[%s4229_s15 + $0x18] sm:$0xf]  ;;  %v3027_v53 = vld [vmem:[%s4229_s15 + $0x1c] sm:$0xf] }
 0x105   : >> { %1411 = vrot.lane.b32.xlu0 %v3321_v36, %s3402_s19  ;;  %v3045_v25 = vrot.slane %v3025_v43, 9  ;;  %v1739_v55 = vrot.slane %v3026_v52, 5  ;;  %v1742_v56 = vrot.slane %v3027_v53, 5  ;;  %v1199_v15 = vld [vmem:[%s4229_s15] sm:$0xe]  ;;  %v1244_v57 = vrot.slane %v1200_v48, 5 }
 0x106   : >> { %v1201_v42 = vld [vmem:[%s4229_s15 + $0x8] sm:$0xf]  ;;  %v2959_v50 = vrot.slane %v1199_v15, 9  ;;  %v1202_v49 = vld [vmem:[%s4229_s15 + $0xc] sm:$0xf] }
 0x107   : >> { %v1740_v54 = vsel %vm4225_vm2, %v3045_v25, %v1739_v55  ;;  %v1741_v58 = vrot.slane %v1739_v55, 4  ;;  %v1247_v28 = vrot.slane %v1201_v42, 5  ;;  %v1203_v59 = vld [vmem:[%s4229_s15 + $0x10] sm:$0x1]  ;;  %v1250_v60 = vrot.slane %v1202_v49, 5 }
 0x108   : >> { %v943_v61 = vld [vmem:[%s4229_s15] sm:$0xf]  ;;  %v1744_v62 = vrot.slane %v1742_v56, 4  ;;  %v1245_v0 = vsel %vm4225_vm2, %v2959_v50, %v1244_v57  ;;  %v1246_v1 = vrot.slane %v1244_v57, 4  ;;  %v944_v2 = vld [vmem:[%s4229_s15 + $0x4] sm:$0xf] }
 0x109   : >> { %v1743_v63 = vsel %vm4225_vm2, %v1741_v58, %v1742_v56  ;;  %v1249_v37 = vrot.slane %v1247_v28, 4  ;;  %v1252_v4 = vrot.slane %v1250_v60, 4  ;;  %v1253_v5 = vrot.slane %v1203_v59, 5  ;;  %v945_v6 = vld [vmem:[%s4229_s15 + $0x8] sm:$0xf] }
 0x10a   : >> { %v3049_v3 = vcombine.low %v1740_v54, %v1743_v63  ;;  %v967_v7 = vshrl.u32 %v943_v61, 16  ;;  %v1248_v8 = vsel %vm4225_vm2, %v1246_v1, %v1247_v28  ;;  %v970_v11 = vshll.u32 %v943_v61, 16  ;;  %v3028_v13 = vld [vmem:[%s4229_s15 + $0x20] sm:$0xf]  ;;  %v3029_v16 = vld [vmem:[%s4229_s15 + $0x24] sm:$0x1] }
 0x10b   : >> { %v1251_v9 = vsel %vm4225_vm2, %v1249_v37, %v1250_v60  ;;  %v976_v12 = vshll.u32 %v944_v2, 16  ;;  %v2963_v17 = vcombine.low %v1245_v0, %v1248_v8  ;;  %v1254_v19 = vsel %vm4225_vm2, %v1252_v4, %v1253_v5  ;;  %v946_v22 = vld [vmem:[%s4229_s15 + $0xc] sm:$0xf]  ;;  %v947_v32 = vld [vmem:[%s4229_s15 + $0x10] sm:$0x1] }
 0x10c   : >> { %1813 = vrot.lane.b32.xlu0 %v3049_v3, %s3403_s20  ;;  %v969_v20 = vrot.slane %v967_v7, 4  ;;  %v980_v21 = vshrl.u32 %v944_v2, 16  ;;  %v2964_v23 = vcombine.low %v1251_v9, %v1254_v19  ;;  %v972_v24 = vrot.slane %v970_v11, 5  ;;  %v2999_v52 = vld [vmem:[%s4229_s15 + $0x1c] sm:$0xf] }
 0x10d   : >> { %v978_v26 = vrot.slane %v976_v12, 5  ;;  %v986_v27 = vshll.u32 %v945_v6, 16  ;;  %1318 = vrot.lane.b32.xlu1 %v2963_v17, %s3404_s21  ;;  %v990_v30 = vshrl.u32 %v945_v6, 16  ;;  %v1745_v31 = vrot.slane %v3028_v13, 5  ;;  %v3000_v48 = vld [vmem:[%s4229_s15 + $0x20] sm:$0xf] }
 0x10e   : >> { %v982_v29 = vrot.slane %v980_v21, 4  ;;  %v1748_v34 = vrot.slane %v3029_v16, 5  ;;  %v973_v35 = vor.u32 %v972_v24, %v969_v20  ;;  %v996_v36 = vshll.u32 %v946_v22, 16  ;;  %v3001_v0 = vld [vmem:[%s4229_s15 + $0x24] sm:$0x1] }
 0x10f   : >> { %v988_v51 = vrot.slane %v986_v27, 5  ;;  %v1000_v43 = vshrl.u32 %v946_v22, 16  ;;  %v1746_v55 = vsel %vm4225_vm2, %v1744_v62, %v1745_v31  ;;  %v1747_v56 = vrot.slane %v1745_v31, 4  ;;  %v2997_v1 = vld [vmem:[%s4229_s15 + $0x14] sm:$0xf] }
 0x110   : >> { %v983_v25 = vor.u32 %v982_v29, %v978_v26  ;;  %v992_v15 = vrot.slane %v990_v30, 4  ;;  %v974_v42 = vrot.slane %v973_v35, 4  ;;  %v998_v50 = vrot.slane %v996_v36, 5  ;;  %v2998_v9 = vld [vmem:[%s4229_s15 + $0x18] sm:$0xf] }
 0x111   : >> { %v1002_v54 = vrot.slane %v1000_v43, 4  ;;  %v1006_v58 = vshll.u32 %v947_v32, 16  ;;  %1320 = vrot.lane.b32.xlu1 %v2964_v23, %s3404_s21  ;;  %v1749_v28 = vsel %vm4225_vm2, %v1747_v56, %v1748_v34  ;;  %v1484_v59 = vshll.u32 %v2999_v52, 16  ;;  %v3083_v17 = vld [vmem:[%s4229_s15 + $0x28] sm:$0xf] }
 0x112   : >> { %v984_v57 = vrot.slane %v983_v25, 4  ;;  %v993_v49 = vor.u32 %v992_v15, %v988_v51  ;;  %v979_v60 = vsel %vm4267_vm5, %v974_v42, %v978_v26  ;;  %v3050_v61 = vcombine.low %v1746_v55, %v1749_v28  ;;  %v3084_v23 = vld [vmem:[%s4229_s15 + $0x2c] sm:$0xf]  ;;  %v3085_v15 = vld [vmem:[%s4229_s15 + $0x30] sm:$0xf] }
 0x113   : >> { %v1003_v62 = vor.u32 %v1002_v54, %v998_v50  ;;  %v1008_v63 = vrot.slane %v1006_v58, 5  ;;  %v4283_v3 = vrot.slane %v1484_v59, 5  ;;  %v1488_v4 = vshrl.u32 %v2999_v52, 16  ;;  %v3086_v58 = vld [vmem:[%s4229_s15 + $0x34] sm:$0xf] }
 0x114   : >> { %v989_v37 = vsel %vm4267_vm5, %v984_v57, %v988_v51  ;;  %v994_v2 = vrot.slane %v993_v49, 4  ;;  %v1494_v7 = vshll.u32 %v3000_v48, 16  ;;  %v1498_v8 = vshrl.u32 %v3000_v48, 16 }
 0x115   : >> { %v2951_v5 = vcombine.low %v979_v60, %v989_v37  ;;  %v1004_v6 = vrot.slane %v1003_v62, 4  ;;  %1815 = vrot.lane.b32.xlu1 %v3050_v61, %s3403_s20  ;;  %v1490_v12 = vrot.slane %v1488_v4, 4  ;;  %v1504_v13 = vshll.u32 %v3001_v0, 16  ;;  %v3087_v0 = vld [vmem:[%s4229_s15 + $0x38] sm:$0x1] }
 0x116   : >> { %v999_v11 = vsel %vm4267_vm5, %v994_v2, %v998_v50  ;;  %v1465_v16 = vshrl.u32 %v2997_v1, 16  ;;  %v1496_v20 = vrot.slane %v1494_v7, 5  ;;  %v1500_v21 = vrot.slane %v1498_v8, 4  ;;  %v3323_v2 = vld [vmem:[%s4229_s15 + $0x30] sm:$0xff]  }
 0x117   : >> { %1166 = vrot.lane.b32.xlu0 %v2951_v5, %s3405_s22  ;;  %v1009_v19 = vsel %vm4267_vm5, %v1004_v6, %v1008_v63  ;;  %v1468_v22 = vshll.u32 %v2997_v1, 16  ;;  %v1491_v26 = vor.u32 %v1490_v12, %v4283_v3  ;;  %v1506_v27 = vrot.slane %v1504_v13, 5  ;;  %v3111_v6 = vld [vmem:[%s4229_s15 + $0x28] sm:$0xe]  ;;  %v3112_v12 = vld [vmem:[%s4229_s15 + $0x2c] sm:$0xf] }
 0x118   : >> { %v2952_v24 = vcombine.low %v999_v11, %v1009_v19  ;;  %v1467_v29 = vrot.slane %v1465_v16, 4  ;;  %v1501_v30 = vor.u32 %v1500_v21, %v1496_v20  ;;  %v1474_v34 = vshll.u32 %v2998_v9, 16  ;;  %v948_v21 = vld [vmem:[%s4229_s15 + $0x14] sm:$0xf] }
 0x119   : >> { %v1470_v31 = vrot.slane %v1468_v22, 5  ;;  %v1478_v32 = vshrl.u32 %v2998_v9, 16  ;;  %v1492_v35 = vrot.slane %v1491_v26, 4  ;;  %v1960_v51 = vshrl.u32 %v3083_v17, 16 }
 0x11a   : >> { %v1963_v36 = vshll.u32 %v3083_v17, 16  ;;  %v1969_v43 = vshll.u32 %v3084_v23, 16  ;;  %v1502_v52 = vrot.slane %v1501_v30, 4  ;;  %v1476_v55 = vrot.slane %v1474_v34, 5 }
 0x11b   : >> { %1168 = vrot.lane.b32.xlu0 %v2952_v24, %s3405_s22  ;;  %v1471_v25 = vor.u32 %v1470_v31, %v1467_v29  ;;  %v1480_v56 = vrot.slane %v1478_v32, 4  ;;  %v1497_v48 = vsel %vm4267_vm5, %v1492_v35, %v1496_v20  ;;  %v1962_v42 = vrot.slane %v1960_v51, 4  ;;  %v3113_v20 = vld [vmem:[%s4229_s15 + $0x30] sm:$0xf] }
 0x11c   : >> { %v1965_v50 = vrot.slane %v1963_v36, 5  ;;  %v1971_v54 = vrot.slane %v1969_v43, 5  ;;  %v1507_v57 = vsel %vm4267_vm5, %v1502_v52, %v1506_v27  ;;  %v1973_v59 = vshrl.u32 %v3084_v23, 16  ;;  %v949_v27 = vld [vmem:[%s4229_s15 + $0x18] sm:$0xf] }
 0x11d   : >> { %v1472_v28 = vrot.slane %v1471_v25, 4  ;;  %v1481_v49 = vor.u32 %v1480_v56, %v1476_v55  ;;  %v3018_v60 = vcombine.low %v1497_v48, %v1507_v57  ;;  %v1979_v62 = vshll.u32 %v3085_v15, 16 }
 0x11e   : >> { %v1966_v61 = vor.u32 %v1965_v50, %v1962_v42  ;;  %v1983_v63 = vshrl.u32 %v3085_v15, 16  ;;  %v1975_v4 = vrot.slane %v1973_v59, 4  ;;  %v1989_v5 = vshll.u32 %v3086_v58, 16  ;;  %v3115_v59 = vld [vmem:[%s4229_s15 + $0x38] sm:$0x1] }
 0x11f   : >> { %v1477_v1 = vsel %vm4267_vm5, %v1472_v28, %v1476_v55  ;;  %v1482_v37 = vrot.slane %v1481_v49, 4  ;;  %1666 = vrot.lane.b32.xlu1 %v3018_v60, %s3406_s24  ;;  %v1981_v8 = vrot.slane %v1979_v62, 5  ;;  %v1993_v11 = vshrl.u32 %v3086_v58, 16  ;;  %v950_v55 = vld [vmem:[%s4229_s15 + $0x1c] sm:$0xf] }
 0x120   : >> { %v1967_v7 = vrot.slane %v1966_v61, 4  ;;  %v1985_v9 = vrot.slane %v1983_v63, 4  ;;  %v1976_v16 = vor.u32 %v1975_v4, %v1971_v54  ;;  %v1991_v17 = vrot.slane %v1989_v5, 5  ;;  %v952_v5 = vld [vmem:[%s4229_s15 + $0x24] sm:$0x1] }
 0x121   : >> { %v1487_v13 = vsel %vm4267_vm5, %v1482_v37, %v4283_v3  ;;  %v1999_v19 = vshll.u32 %v3087_v0, 16  ;;  %v1995_v26 = vrot.slane %v1993_v11, 4  ;;  %v3131_v31 = vrot.slane %v3111_v6, 9  ;;  %v3322_v3 = vld [vmem:[%s4229_s15 + $0x28] sm:$0xff]   ;;  %v951_v0 = vld [vmem:[%s4229_s15 + $0x20] sm:$0xf] }
 0x122   : >> { %v3017_v22 = vcombine.low %v1477_v1, %v1487_v13  ;;  %v1972_v23 = vsel %vm4267_vm5, %v1967_v7, %v1971_v54  ;;  %v1986_v24 = vor.u32 %v1985_v9, %v1981_v8  ;;  %v1977_v29 = vrot.slane %v1976_v16, 4  ;;  %v3114_v54 = vld [vmem:[%s4229_s15 + $0x34] sm:$0xf] }
 0x123   : >> { %v2001_v30 = vrot.slane %v1999_v19, 5  ;;  %v2234_v34 = vrot.slane %v3112_v12, 5  ;;  %1908 = vrot.lane.b32.xlu1 %v3323_v2, %s3407_s25  ;;  %v1996_v35 = vor.u32 %v1995_v26, %v1991_v17  ;;  %v2237_v51 = vrot.slane %v3113_v20, 5  ;;  %v1204_v6 = vld [vmem:[%s4229_s15 + $0x14] sm:$0xe] }
 0x124   : >> { %1664 = vrot.lane.b32.xlu0 %v3017_v22, %s3406_s24  ;;  %v1987_v32 = vrot.slane %v1986_v24, 4  ;;  %v1011_v36 = vshrl.u32 %v948_v21, 16  ;;  %v1982_v43 = vsel %vm4267_vm5, %v1977_v29, %v1981_v8  ;;  %v1014_v56 = vshll.u32 %v948_v21, 16  ;;  %v1205_v12 = vld [vmem:[%s4229_s15 + $0x18] sm:$0xf] }
 0x125   : >> { %v2235_v52 = vsel %vm4225_vm2, %v3131_v31, %v2234_v34  ;;  %v2236_v25 = vrot.slane %v2234_v34, 4  ;;  %v3103_v15 = vcombine.low %v1972_v23, %v1982_v43  ;;  %v1997_v42 = vrot.slane %v1996_v35, 4  ;;  %v1206_v20 = vld [vmem:[%s4229_s15 + $0x1c] sm:$0xf]  ;;  %v1207_v21 = vld [vmem:[%s4229_s15 + $0x20] sm:$0xf] }
 0x126   : >> { %v1992_v48 = vsel %vm4267_vm5, %v1987_v32, %v1991_v17  ;;  %v1013_v50 = vrot.slane %v1011_v36, 4  ;;  %v1016_v57 = vrot.slane %v1014_v56, 5  ;;  %v1020_v28 = vshll.u32 %v949_v27, 16 }
 0x127   : >> { %v2238_v58 = vsel %vm4225_vm2, %v2236_v25, %v2237_v51  ;;  %v1024_v49 = vshrl.u32 %v949_v27, 16  ;;  %v2002_v60 = vsel %vm4267_vm5, %v1997_v42, %v2001_v30  ;;  %v1030_v62 = vshll.u32 %v950_v55, 16 }
 0x128   : >> { %1906 = vrot.lane.b32.xlu0 %v3322_v3, %s3407_s25  ;;  %v3135_v61 = vcombine.low %v2235_v52, %v2238_v58  ;;  %v1034_v63 = vshrl.u32 %v950_v55, 16  ;;  %v3104_v1 = vcombine.low %v1992_v48, %v2002_v60  ;;  %v1017_v37 = vor.u32 %v1016_v57, %v1013_v50  ;;  %v3002_v55 = vld [vmem:[%s4229_s15 + $0x28] sm:$0xf]  ;;  %v3003_v50 = vld [vmem:[%s4229_s15 + $0x2c] sm:$0xf] }
 0x129   : >> { %v1022_v2 = vrot.slane %v1020_v28, 5  ;;  %v1026_v4 = vrot.slane %v1024_v49, 4  ;;  %v1032_v7 = vrot.slane %v1030_v62, 5  ;;  %v2239_v8 = vrot.slane %v2237_v51, 4  ;;  %v1208_v51 = vld [vmem:[%s4229_s15 + $0x24] sm:$0x1] }
 0x12a   : >> { %v2240_v9 = vrot.slane %v3114_v54, 5  ;;  %v2243_v11 = vrot.slane %v3115_v59, 5  ;;  %2161 = vrot.lane.b32.xlu1 %v3104_v1, %s3408_s27  ;;  %v1018_v13 = vrot.slane %v1017_v37, 4  ;;  %v1036_v17 = vrot.slane %v1034_v63, 4  ;;  %v3004_v63 = vld [vmem:[%s4229_s15 + $0x30] sm:$0xf] }
 0x12b   : >> { %v1027_v16 = vor.u32 %v1026_v4, %v1022_v2  ;;  %v1040_v19 = vshll.u32 %v951_v0, 16  ;;  %v1044_v24 = vshrl.u32 %v951_v0, 16  ;;  %v1050_v26 = vshll.u32 %v952_v5, 16 }
 0x12c   : >> { %2159 = vrot.lane.b32.xlu0 %v3103_v15, %s3408_s27  ;;  %v2241_v22 = vsel %vm4225_vm2, %v2239_v8, %v2240_v9  ;;  %v2242_v23 = vrot.slane %v2240_v9, 4  ;;  %v1023_v27 = vsel %vm4267_vm5, %v1018_v13, %v1022_v2  ;;  %v1037_v30 = vor.u32 %v1036_v17, %v1032_v7  ;;  %v3006_v8 = vld [vmem:[%s4229_s15 + $0x38] sm:$0x1]  ;;  %v3031_v17 = vld [vmem:[%s4229_s15 + $0x2c] sm:$0xf] }
 0x12d   : >> { %v1028_v29 = vrot.slane %v1027_v16, 4  ;;  %v1042_v31 = vrot.slane %v1040_v19, 5  ;;  %v1046_v3 = vrot.slane %v1044_v24, 4  ;;  %v1052_v32 = vrot.slane %v1050_v26, 5  ;;  %v3030_v16 = vld [vmem:[%s4229_s15 + $0x28] sm:$0xe] }
 0x12e   : >> { %v2244_v34 = vsel %vm4225_vm2, %v2242_v23, %v2243_v11  ;;  %v2960_v35 = vrot.slane %v1204_v6, 9  ;;  %v1038_v52 = vrot.slane %v1037_v30, 4  ;;  %v1257_v25 = vrot.slane %v1205_v12, 5  ;;  %v3032_v23 = vld [vmem:[%s4229_s15 + $0x30] sm:$0xf] }
 0x12f   : >> { %v1033_v36 = vsel %vm4267_vm5, %v1028_v29, %v1032_v7  ;;  %v3136_v43 = vcombine.low %v2241_v22, %v2244_v34  ;;  %v1047_v15 = vor.u32 %v1046_v3, %v1042_v31  ;;  %v1260_v48 = vrot.slane %v1206_v20, 5  ;;  %v3005_v7 = vld [vmem:[%s4229_s15 + $0x34] sm:$0xf] }
 0x130   : >> { %2308 = vrot.lane.b32.xlu0 %v3135_v61, %s3409_s28  ;;  %v2953_v56 = vcombine.low %v1023_v27, %v1033_v36  ;;  %v1263_v42 = vrot.slane %v1207_v21, 5  ;;  %v1043_v54 = vsel %vm4267_vm5, %v1038_v52, %v1042_v31  ;;  %v1258_v58 = vsel %vm4225_vm2, %v2960_v35, %v1257_v25  ;;  %v3033_v30 = vld [vmem:[%s4229_s15 + $0x34] sm:$0xf]  ;;  %v3324_v31 = vld [vmem:[%s4229_s15 + $0x28] sm:$0xff]  }
 0x131   : >> { %v1259_v57 = vrot.slane %v1257_v25, 4  ;;  %v1266_v28 = vrot.slane %v1208_v51, 5  ;;  %v1048_v49 = vrot.slane %v1047_v15, 4  ;;  %v1262_v59 = vrot.slane %v1260_v48, 4  ;;  %v3034_v51 = vld [vmem:[%s4229_s15 + $0x38] sm:$0x1] }
 0x132   : >> { %1170 = vrot.lane.b32.xlu1 %v2953_v56, %s3405_s22  ;;  %v1265_v60 = vrot.slane %v1263_v42, 4  ;;  %v1509_v61 = vshrl.u32 %v3002_v55, 16  ;;  %v1512_v0 = vshll.u32 %v3002_v55, 16  ;;  %v1518_v1 = vshll.u32 %v3003_v50, 16  ;;  %v3325_v55 = vld [vmem:[%s4229_s15 + $0x30] sm:$0xff]  }
 0x133   : >> { %v1261_v62 = vsel %vm4225_vm2, %v1259_v57, %v1260_v48  ;;  %v1522_v37 = vshrl.u32 %v3003_v50, 16  ;;  %v1053_v2 = vsel %vm4267_vm5, %v1048_v49, %v1052_v32  ;;  %v1264_v5 = vsel %vm4225_vm2, %v1262_v59, %v1263_v42 }
 0x134   : >> { %2310 = vrot.lane.b32.xlu0 %v3136_v43, %s3409_s28  ;;  %v2965_v4 = vcombine.low %v1258_v58, %v1261_v62  ;;  %v1267_v6 = vsel %vm4225_vm2, %v1265_v60, %v1266_v28  ;;  %v2954_v9 = vcombine.low %v1043_v54, %v1053_v2  ;;  %v1511_v12 = vrot.slane %v1509_v61, 4  ;;  %v3088_v28 = vld [vmem:[%s4229_s15 + $0x3c] sm:$0xf] }
 0x135   : >> { %v2966_v11 = vcombine.low %v1264_v5, %v1267_v6  ;;  %v1514_v13 = vrot.slane %v1512_v0, 5  ;;  %v1520_v19 = vrot.slane %v1518_v1, 5  ;;  %v1524_v20 = vrot.slane %v1522_v37, 4  ;;  %v3090_v5 = vld [vmem:[%s4229_s15 + $0x44] sm:$0xf] }
 0x136   : >> { %v1528_v21 = vshll.u32 %v3004_v63, 16  ;;  %v1532_v22 = vshrl.u32 %v3004_v63, 16  ;;  %1172 = vrot.lane.b32.xlu1 %v2954_v9, %s3405_s22  ;;  %v1538_v26 = vshll.u32 %v3005_v7, 16  ;;  %v1542_v27 = vshrl.u32 %v3005_v7, 16 }
 0x137   : >> { %v1515_v24 = vor.u32 %v1514_v13, %v1511_v12  ;;  %v1548_v29 = vshll.u32 %v3006_v8, 16  ;;  %v1525_v34 = vor.u32 %v1524_v20, %v1520_v19  ;;  %v3046_v35 = vrot.slane %v3030_v16, 9  ;;  %v3091_v13 = vld [vmem:[%s4229_s15 + $0x48] sm:$0xf]  ;;  %v3092_v16 = vld [vmem:[%s4229_s15 + $0x4c] sm:$0x1] }
 0x138   : >> { %1322 = vrot.lane.b32.xlu0 %v2965_v4, %s3404_s21  ;;  %v1530_v3 = vrot.slane %v1528_v21, 5  ;;  %v1534_v32 = vrot.slane %v1532_v22, 4  ;;  %v1540_v43 = vrot.slane %v1538_v26, 5  ;;  %v1544_v52 = vrot.slane %v1542_v27, 4  ;;  %v3089_v4 = vld [vmem:[%s4229_s15 + $0x40] sm:$0xf] }
 0x139   : >> { %v1516_v36 = vrot.slane %v1515_v24, 4  ;;  %v1550_v25 = vrot.slane %v1548_v29, 5  ;;  %v1526_v56 = vrot.slane %v1525_v34, 4  ;;  %v1752_v48 = vrot.slane %v3031_v17, 5  ;;  %v3116_v22 = vld [vmem:[%s4229_s15 + $0x3c] sm:$0xe] }
 0x13a   : >> { %v1535_v15 = vor.u32 %v1534_v32, %v1530_v3  ;;  %v1755_v42 = vrot.slane %v3032_v23, 5  ;;  %1324 = vrot.lane.b32.xlu1 %v2966_v11, %s3404_s21  ;;  %v1545_v54 = vor.u32 %v1544_v52, %v1540_v43  ;;  %v1758_v58 = vrot.slane %v3033_v30, 5  ;;  %v3117_v23 = vld [vmem:[%s4229_s15 + $0x40] sm:$0xf]  ;;  %v3118_v30 = vld [vmem:[%s4229_s15 + $0x44] sm:$0xf] }
 0x13b   : >> { %v1521_v50 = vsel %vm4267_vm5, %v1516_v36, %v1520_v19  ;;  %v1761_v57 = vrot.slane %v3034_v51, 5  ;;  %v1531_v49 = vsel %vm4267_vm5, %v1526_v56, %v1530_v3  ;;  %v1753_v60 = vsel %vm4225_vm2, %v3046_v35, %v1752_v48  ;;  %v953_v51 = vld [vmem:[%s4229_s15 + $0x28] sm:$0xf] }
 0x13c   : >> { %1415 = vrot.lane.b32.xlu0 %v3324_v31, %s3402_s19  ;;  %v1536_v59 = vrot.slane %v1535_v15, 4  ;;  %v1754_v61 = vrot.slane %v1752_v48, 4  ;;  %v3019_v62 = vcombine.low %v1521_v50, %v1531_v49  ;;  %v1546_v63 = vrot.slane %v1545_v54, 4  ;;  %v3326_v31 = vld [vmem:[%s4229_s15 + $0x3c] sm:$0xff]  }
 0x13d   : >> { %v1757_v0 = vrot.slane %v1755_v42, 4  ;;  %v1760_v1 = vrot.slane %v1758_v58, 4  ;;  %v2004_v6 = vshrl.u32 %v3088_v28, 16  ;;  %v2007_v7 = vshll.u32 %v3088_v28, 16 }
 0x13e   : >> { %v1541_v37 = vsel %vm4267_vm5, %v1536_v59, %v1540_v43  ;;  %v1756_v2 = vsel %vm4225_vm2, %v1754_v61, %v1755_v42  ;;  %1417 = vrot.lane.b32.xlu1 %v3325_v55, %s3402_s19  ;;  %v1551_v8 = vsel %vm4267_vm5, %v1546_v63, %v1550_v25  ;;  %v2013_v24 = vshll.u32 %v3089_v4, 16  ;;  %v954_v55 = vld [vmem:[%s4229_s15 + $0x2c] sm:$0xf]  ;;  %v3327_v61 = vld [vmem:[%s4229_s15 + $0x44] sm:$0xff]  }
 0x13f   : >> { %v3051_v9 = vcombine.low %v1753_v60, %v1756_v2  ;;  %v1759_v11 = vsel %vm4225_vm2, %v1757_v0, %v1758_v58  ;;  %v1762_v12 = vsel %vm4225_vm2, %v1760_v1, %v1761_v57  ;;  %v3020_v17 = vcombine.low %v1541_v37, %v1551_v8  ;;  %v955_v2 = vld [vmem:[%s4229_s15 + $0x30] sm:$0xf] }
 0x140   : >> { %1668 = vrot.lane.b32.xlu0 %v3019_v62, %s3406_s24  ;;  %v3052_v19 = vcombine.low %v1759_v11, %v1762_v12  ;;  %v2006_v20 = vrot.slane %v2004_v6, 4  ;;  %v2009_v21 = vrot.slane %v2007_v7, 5  ;;  %v2017_v26 = vshrl.u32 %v3089_v4, 16  ;;  %v3119_v12 = vld [vmem:[%s4229_s15 + $0x48] sm:$0xf] }
 0x141   : >> { %v2023_v27 = vshll.u32 %v3090_v5, 16  ;;  %v2027_v29 = vshrl.u32 %v3090_v5, 16  ;;  %v2033_v3 = vshll.u32 %v3091_v13, 16  ;;  %v2037_v32 = vshrl.u32 %v3091_v13, 16 }
 0x142   : >> { %v2010_v34 = vor.u32 %v2009_v21, %v2006_v20  ;;  %v2043_v35 = vshll.u32 %v3092_v16, 16  ;;  %1670 = vrot.lane.b32.xlu1 %v3020_v17, %s3406_s24  ;;  %v2015_v36 = vrot.slane %v2013_v24, 5  ;;  %v2019_v43 = vrot.slane %v2017_v26, 4  ;;  %v3120_v20 = vld [vmem:[%s4229_s15 + $0x4c] sm:$0x1] }
 0x143   : >> { %v2025_v52 = vrot.slane %v2023_v27, 5  ;;  %v2029_v25 = vrot.slane %v2027_v29, 4  ;;  %v2035_v15 = vrot.slane %v2033_v3, 5  ;;  %v2039_v48 = vrot.slane %v2037_v32, 4  ;;  %v956_v21 = vld [vmem:[%s4229_s15 + $0x34] sm:$0xf] }
 0x144   : >> { %1817 = vrot.lane.b32.xlu0 %v3051_v9, %s3403_s20  ;;  %v2011_v56 = vrot.slane %v2010_v34, 4  ;;  %v2045_v42 = vrot.slane %v2043_v35, 5  ;;  %v2020_v50 = vor.u32 %v2019_v43, %v2015_v36  ;;  %v3132_v58 = vrot.slane %v3116_v22, 9  ;;  %v957_v27 = vld [vmem:[%s4229_s15 + $0x38] sm:$0x1] }
 0x145   : >> { %v2030_v54 = vor.u32 %v2029_v25, %v2025_v52  ;;  %v2247_v57 = vrot.slane %v3117_v23, 5  ;;  %v2040_v49 = vor.u32 %v2039_v48, %v2035_v15  ;;  %v2250_v59 = vrot.slane %v3118_v30, 5  ;;  %v1209_v3 = vld [vmem:[%s4229_s15 + $0x28] sm:$0xe]  ;;  %v1210_v43 = vld [vmem:[%s4229_s15 + $0x2c] sm:$0xf] }
 0x146   : >> { %v2016_v28 = vsel %vm4267_vm5, %v2011_v56, %v2015_v36  ;;  %v1055_v60 = vshrl.u32 %v953_v51, 16  ;;  %1819 = vrot.lane.b32.xlu1 %v3052_v19, %s3403_s20  ;;  %v2021_v62 = vrot.slane %v2020_v50, 4  ;;  %v1058_v5 = vshll.u32 %v953_v51, 16 }
 0x147   : >> { %v2031_v63 = vrot.slane %v2030_v54, 4  ;;  %v2248_v0 = vsel %vm4225_vm2, %v3132_v58, %v2247_v57  ;;  %v2249_v1 = vrot.slane %v2247_v57, 4  ;;  %v2041_v37 = vrot.slane %v2040_v49, 4  ;;  %v1212_v58 = vld [vmem:[%s4229_s15 + $0x34] sm:$0xf] }
 0x148   : >> { %1910 = vrot.lane.b32.xlu0 %v3326_v31, %s3407_s25  ;;  %v1057_v4 = vrot.slane %v1055_v60, 4  ;;  %v1064_v6 = vshll.u32 %v954_v55, 16  ;;  %v2026_v7 = vsel %vm4267_vm5, %v2021_v62, %v2025_v52  ;;  %v1068_v11 = vshrl.u32 %v954_v55, 16  ;;  %v1213_v60 = vld [vmem:[%s4229_s15 + $0x38] sm:$0x1] }
 0x149   : >> { %v2036_v8 = vsel %vm4267_vm5, %v2031_v63, %v2035_v15  ;;  %v2251_v9 = vsel %vm4225_vm2, %v2249_v1, %v2250_v59  ;;  %v3105_v13 = vcombine.low %v2016_v28, %v2026_v7  ;;  %v2046_v16 = vsel %vm4267_vm5, %v2041_v37, %v2045_v42  ;;  %v1211_v15 = vld [vmem:[%s4229_s15 + $0x30] sm:$0xf] }
 0x14a   : >> { %v3137_v17 = vcombine.low %v2248_v0, %v2251_v9  ;;  %v1060_v19 = vrot.slane %v1058_v5, 5  ;;  %1912 = vrot.lane.b32.xlu1 %v3327_v61, %s3407_s25  ;;  %v3106_v22 = vcombine.low %v2036_v8, %v2046_v16  ;;  %v1066_v23 = vrot.slane %v1064_v6, 5  ;;  %v3007_v61 = vld [vmem:[%s4229_s15 + $0x3c] sm:$0xf]  ;;  %v3008_v9 = vld [vmem:[%s4229_s15 + $0x40] sm:$0xf] }
 0x14b   : >> { %v1070_v24 = vrot.slane %v1068_v11, 4  ;;  %v1074_v26 = vshll.u32 %v955_v2, 16  ;;  %v1078_v30 = vshrl.u32 %v955_v2, 16  ;;  %v2252_v31 = vrot.slane %v2250_v59, 4 }
 0x14c   : >> { %2163 = vrot.lane.b32.xlu0 %v3105_v13, %s3408_s27  ;;  %v1061_v29 = vor.u32 %v1060_v19, %v1057_v4  ;;  %v2253_v34 = vrot.slane %v3119_v12, 5  ;;  %v2256_v51 = vrot.slane %v3120_v20, 5  ;;  %v1084_v36 = vshll.u32 %v956_v21, 16  ;;  %v3009_v19 = vld [vmem:[%s4229_s15 + $0x44] sm:$0xf] }
 0x14d   : >> { %v1071_v32 = vor.u32 %v1070_v24, %v1066_v23  ;;  %v1076_v35 = vrot.slane %v1074_v26, 5  ;;  %v1080_v56 = vrot.slane %v1078_v30, 4  ;;  %v1088_v50 = vshrl.u32 %v956_v21, 16  ;;  %v3010_v20 = vld [vmem:[%s4229_s15 + $0x48] sm:$0xf] }
 0x14e   : >> { %v1062_v52 = vrot.slane %v1061_v29, 4  ;;  %v2254_v25 = vsel %vm4225_vm2, %v2252_v31, %v2253_v34  ;;  %v2255_v55 = vrot.slane %v2253_v34, 4  ;;  %2165 = vrot.lane.b32.xlu1 %v3106_v22, %s3408_s27  ;;  %v1086_v42 = vrot.slane %v1084_v36, 5  ;;  %v3011_v26 = vld [vmem:[%s4229_s15 + $0x4c] sm:$0x1] }
 0x14f   : >> { %v1072_v48 = vrot.slane %v1071_v32, 4  ;;  %v1094_v54 = vshll.u32 %v957_v27, 16  ;;  %v1081_v49 = vor.u32 %v1080_v56, %v1076_v35  ;;  %v2961_v59 = vrot.slane %v1209_v3, 9  ;;  %v3328_v56 = vld [vmem:[%s4229_s15 + $0x3c] sm:$0xff]  }
 0x150   : >> { %2312 = vrot.lane.b32.xlu0 %v3137_v17, %s3409_s28  ;;  %v1067_v57 = vsel %vm4267_vm5, %v1062_v52, %v1066_v23  ;;  %v2257_v28 = vsel %vm4225_vm2, %v2255_v55, %v2256_v51  ;;  %v1090_v0 = vrot.slane %v1088_v50, 4  ;;  %v1270_v4 = vrot.slane %v1210_v43, 5  ;;  %v3035_v51 = vld [vmem:[%s4229_s15 + $0x3c] sm:$0xe]  ;;  %v3036_v55 = vld [vmem:[%s4229_s15 + $0x40] sm:$0xf] }
 0x151   : >> { %v1077_v62 = vsel %vm4267_vm5, %v1072_v48, %v1076_v35  ;;  %v3138_v63 = vcombine.low %v2254_v25, %v2257_v28  ;;  %v1096_v1 = vrot.slane %v1094_v54, 5  ;;  %v1082_v2 = vrot.slane %v1081_v49, 4  ;;  %v3037_v54 = vld [vmem:[%s4229_s15 + $0x44] sm:$0xf] }
 0x152   : >> { %v2955_v37 = vcombine.low %v1067_v57, %v1077_v62  ;;  %v1273_v5 = vrot.slane %v1211_v15, 5  ;;  %v1091_v6 = vor.u32 %v1090_v0, %v1086_v42  ;;  %v1276_v7 = vrot.slane %v1212_v58, 5 }
 0x153   : >> { %v1279_v8 = vrot.slane %v1213_v60, 5  ;;  %v1553_v11 = vshrl.u32 %v3007_v61, 16  ;;  %v1087_v12 = vsel %vm4267_vm5, %v1082_v2, %v1086_v42  ;;  %v1271_v13 = vsel %vm4225_vm2, %v2961_v59, %v1270_v4  ;;  %v3038_v59 = vld [vmem:[%s4229_s15 + $0x48] sm:$0xf] }
 0x154   : >> { %1174 = vrot.lane.b32.xlu1 %v2955_v37, %s3405_s22  ;;  %2314 = vrot.lane.b32.xlu0 %v3138_v63, %s3409_s28  ;;  %v1272_v16 = vrot.slane %v1270_v4, 4  ;;  %v1275_v17 = vrot.slane %v1273_v5, 4  ;;  %v1092_v21 = vrot.slane %v1091_v6, 4  ;;  %v1278_v22 = vrot.slane %v1276_v7, 4 }
 0x155   : >> { %v1555_v23 = vrot.slane %v1553_v11, 4  ;;  %v1556_v24 = vshll.u32 %v3007_v61, 16  ;;  %v1562_v30 = vshll.u32 %v3008_v9, 16  ;;  %v1566_v31 = vshrl.u32 %v3008_v9, 16  ;;  %v3093_v9 = vld [vmem:[%s4229_s15 + $0x50] sm:$0xf] }
 0x156   : >> { %v1274_v27 = vsel %vm4225_vm2, %v1272_v16, %v1273_v5  ;;  %v1277_v29 = vsel %vm4225_vm2, %v1275_v17, %v1276_v7  ;;  %v1097_v34 = vsel %vm4267_vm5, %v1092_v21, %v1096_v1  ;;  %v1280_v32 = vsel %vm4225_vm2, %v1278_v22, %v1279_v8  ;;  %v3039_v7 = vld [vmem:[%s4229_s15 + $0x4c] sm:$0x1]  ;;  %v3329_v11 = vld [vmem:[%s4229_s15 + $0x44] sm:$0xff]  }
 0x157   : >> { %v2967_v3 = vcombine.low %v1271_v13, %v1274_v27  ;;  %v1558_v35 = vrot.slane %v1556_v24, 5  ;;  %v2956_v36 = vcombine.low %v1087_v12, %v1097_v34  ;;  %v2968_v43 = vcombine.low %v1277_v29, %v1280_v32  ;;  %v3095_v24 = vld [vmem:[%s4229_s15 + $0x58] sm:$0xf] }
 0x158   : >> { %v1564_v52 = vrot.slane %v1562_v30, 5  ;;  %v1568_v25 = vrot.slane %v1566_v31, 4  ;;  %v1572_v48 = vshll.u32 %v3009_v19, 16  ;;  %v1576_v42 = vshrl.u32 %v3009_v19, 16  ;;  %v3094_v19 = vld [vmem:[%s4229_s15 + $0x54] sm:$0xf] }
 0x159   : >> { %1326 = vrot.lane.b32.xlu0 %v2967_v3, %s3404_s21  ;;  %v1559_v15 = vor.u32 %v1558_v35, %v1555_v23  ;;  %v1582_v50 = vshll.u32 %v3010_v20, 16  ;;  %1176 = vrot.lane.b32.xlu1 %v2956_v36, %s3405_s22  ;;  %v1586_v57 = vshrl.u32 %v3010_v20, 16  ;;  %v1592_v28 = vshll.u32 %v3011_v26, 16  ;;  %v3096_v35 = vld [vmem:[%s4229_s15 + $0x5c] sm:$0xf] }
 0x15a   : >> { %v1569_v58 = vor.u32 %v1568_v25, %v1564_v52  ;;  %v3047_v49 = vrot.slane %v3035_v51, 9  ;;  %v1574_v61 = vrot.slane %v1572_v48, 5  ;;  %v1578_v62 = vrot.slane %v1576_v42, 4  ;;  %v3097_v25 = vld [vmem:[%s4229_s15 + $0x60] sm:$0x1] }
 0x15b   : >> { %v1560_v60 = vrot.slane %v1559_v15, 4  ;;  %v1584_v63 = vrot.slane %v1582_v50, 5  ;;  %v1588_v1 = vrot.slane %v1586_v57, 4  ;;  %v1594_v37 = vrot.slane %v1592_v28, 5  ;;  %v3122_v50 = vld [vmem:[%s4229_s15 + $0x54] sm:$0xf] }
 0x15c   : >> { %v1570_v0 = vrot.slane %v1569_v58, 4  ;;  %v1765_v2 = vrot.slane %v3036_v55, 5  ;;  %v1579_v5 = vor.u32 %v1578_v62, %v1574_v61  ;;  %v1768_v6 = vrot.slane %v3037_v54, 5  ;;  %v3121_v55 = vld [vmem:[%s4229_s15 + $0x50] sm:$0xe] }
 0x15d   : >> { %1419 = vrot.lane.b32.xlu0 %v3328_v56, %s3402_s19  ;;  %v1565_v4 = vsel %vm4267_vm5, %v1560_v60, %v1564_v52  ;;  %v1771_v8 = vrot.slane %v3038_v59, 5  ;;  %1328 = vrot.lane.b32.xlu1 %v2968_v43, %s3404_s21  ;;  %v1589_v13 = vor.u32 %v1588_v1, %v1584_v63  ;;  %v1774_v29 = vrot.slane %v3039_v7, 5  ;;  %v4506_v54 = vld [vmem:[%s4229_s15 + $0x58] sm:$0xf]  ;;  %v958_v58 = vld [vmem:[%s4229_s15 + $0x3c] sm:$0xf] }
 0x15e   : >> { %v1575_v12 = vsel %vm4267_vm5, %v1570_v0, %v1574_v61  ;;  %v1766_v16 = vsel %vm4225_vm2, %v3047_v49, %v1765_v2  ;;  %v1767_v17 = vrot.slane %v1765_v2, 4  ;;  %v1580_v21 = vrot.slane %v1579_v5, 4  ;;  %v3330_v60 = vld [vmem:[%s4229_s15 + $0x50] sm:$0xff]  }
 0x15f   : >> { %v3021_v20 = vcombine.low %v1565_v4, %v1575_v12  ;;  %v1770_v22 = vrot.slane %v1768_v6, 4  ;;  %v1773_v23 = vrot.slane %v1771_v8, 4  ;;  %v1590_v26 = vrot.slane %v1589_v13, 4  ;;  %v959_v13 = vld [vmem:[%s4229_s15 + $0x40] sm:$0xf] }
 0x160   : >> { %v1769_v27 = vsel %vm4225_vm2, %v1767_v17, %v1768_v6  ;;  %v2048_v30 = vshrl.u32 %v3093_v9, 16  ;;  %v1585_v31 = vsel %vm4267_vm5, %v1580_v21, %v1584_v63  ;;  %v2051_v32 = vshll.u32 %v3093_v9, 16  ;;  %v960_v21 = vld [vmem:[%s4229_s15 + $0x44] sm:$0xf] }
 0x161   : >> { %1672 = vrot.lane.b32.xlu0 %v3021_v20, %s3406_s24  ;;  %v3053_v34 = vcombine.low %v1766_v16, %v1769_v27  ;;  %v1772_v3 = vsel %vm4225_vm2, %v1770_v22, %v1771_v8  ;;  %1421 = vrot.lane.b32.xlu1 %v3329_v11, %s3402_s19  ;;  %v1595_v51 = vsel %vm4267_vm5, %v1590_v26, %v1594_v37  ;;  %v2057_v52 = vshll.u32 %v3094_v19, 16 }
 0x162   : >> { %v1775_v36 = vsel %vm4225_vm2, %v1773_v23, %v1774_v29  ;;  %v2050_v43 = vrot.slane %v2048_v30, 4  ;;  %v3022_v56 = vcombine.low %v1585_v31, %v1595_v51  ;;  %v2053_v48 = vrot.slane %v2051_v32, 5  ;;  %v3331_v23 = vld [vmem:[%s4229_s15 + $0x58] sm:$0xff]   ;;  %v3125_v31 = vld [vmem:[%s4229_s15 + $0x60] sm:$0x1] }
 0x163   : >> { %v3054_v15 = vcombine.low %v1772_v3, %v1775_v36  ;;  %v2061_v42 = vshrl.u32 %v3094_v19, 16  ;;  %v2059_v57 = vrot.slane %v2057_v52, 5  ;;  %v2067_v28 = vshll.u32 %v3095_v24, 16  ;;  %v3124_v30 = vld [vmem:[%s4229_s15 + $0x5c] sm:$0xf] }
 0x164   : >> { %v2071_v49 = vshrl.u32 %v3095_v24, 16  ;;  %v2077_v59 = vshll.u32 %v3096_v35, 16  ;;  %v2054_v61 = vor.u32 %v2053_v48, %v2050_v43  ;;  %v2081_v63 = vshrl.u32 %v3096_v35, 16  ;;  %v961_v51 = vld [vmem:[%s4229_s15 + $0x48] sm:$0xf] }
 0x165   : >> { %1821 = vrot.lane.b32.xlu0 %v3053_v34, %s3403_s20  ;;  %v2063_v62 = vrot.slane %v2061_v42, 4  ;;  %v2087_v0 = vshll.u32 %v3097_v25, 16  ;;  %1674 = vrot.lane.b32.xlu1 %v3022_v56, %s3406_s24  ;;  %v2069_v1 = vrot.slane %v2067_v28, 5  ;;  %v3133_v4 = vrot.slane %v3121_v55, 9  ;;  %v962_v42 = vld [vmem:[%s4229_s15 + $0x4c] sm:$0x1] }
 0x166   : >> { %v2073_v37 = vrot.slane %v2071_v49, 4  ;;  %v2079_v2 = vrot.slane %v2077_v59, 5  ;;  %v2055_v5 = vrot.slane %v2054_v61, 4  ;;  %v2083_v7 = vrot.slane %v2081_v63, 4  ;;  %v1214_v28 = vld [vmem:[%s4229_s15 + $0x3c] sm:$0xe] }
 0x167   : >> { %v2064_v6 = vor.u32 %v2063_v62, %v2059_v57  ;;  %v2089_v8 = vrot.slane %v2087_v0, 5  ;;  %v2260_v11 = vrot.slane %v3122_v50, 5  ;;  %v2263_v12 = vrot.slane %v4506_v54, 5  ;;  %v1215_v49 = vld [vmem:[%s4229_s15 + $0x40] sm:$0xf] }
 0x168   : >> { %v2074_v9 = vor.u32 %v2073_v37, %v2069_v1  ;;  %v1099_v16 = vshrl.u32 %v958_v58, 16  ;;  %v2060_v17 = vsel %vm4267_vm5, %v2055_v5, %v2059_v57  ;;  %v2084_v20 = vor.u32 %v2083_v7, %v2079_v2  ;;  %v1216_v7 = vld [vmem:[%s4229_s15 + $0x44] sm:$0xf] }
 0x169   : >> { %1914 = vrot.lane.b32.xlu0 %v3330_v60, %s3407_s25  ;;  %v2065_v19 = vrot.slane %v2064_v6, 4  ;;  %v1102_v22 = vshll.u32 %v958_v58, 16  ;;  %1823 = vrot.lane.b32.xlu1 %v3054_v15, %s3403_s20  ;;  %v2261_v26 = vsel %vm4225_vm2, %v3133_v4, %v2260_v11  ;;  %v2262_v27 = vrot.slane %v2260_v11, 4 }
 0x16a   : >> { %v2075_v24 = vrot.slane %v2074_v9, 4  ;;  %v1101_v29 = vrot.slane %v1099_v16, 4  ;;  %v2085_v3 = vrot.slane %v2084_v20, 4  ;;  %v1108_v35 = vshll.u32 %v959_v13, 16  ;;  %v1218_v9 = vld [vmem:[%s4229_s15 + $0x4c] sm:$0x1] }
 0x16b   : >> { %v2070_v34 = vsel %vm4267_vm5, %v2065_v19, %v2069_v1  ;;  %v1104_v32 = vrot.slane %v1102_v22, 5  ;;  %v2264_v52 = vsel %vm4225_vm2, %v2262_v27, %v2263_v12  ;;  %v1112_v25 = vshrl.u32 %v959_v13, 16 }
 0x16c   : >> { %v3107_v36 = vcombine.low %v2060_v17, %v2070_v34  ;;  %v2080_v43 = vsel %vm4267_vm5, %v2075_v24, %v2079_v2  ;;  %v2090_v55 = vsel %vm4267_vm5, %v2085_v3, %v2089_v8  ;;  %v3139_v56 = vcombine.low %v2261_v26, %v2264_v52  ;;  %v1217_v8 = vld [vmem:[%s4229_s15 + $0x48] sm:$0xf]  ;;  %v3012_v17 = vld [vmem:[%s4229_s15 + $0x50] sm:$0xf] }
 0x16d   : >> { %v1105_v15 = vor.u32 %v1104_v32, %v1101_v29  ;;  %v1110_v48 = vrot.slane %v1108_v35, 5  ;;  %1916 = vrot.lane.b32.xlu1 %v3331_v23, %s3407_s25  ;;  %v3108_v50 = vcombine.low %v2080_v43, %v2090_v55  ;;  %v1114_v54 = vrot.slane %v1112_v25, 4  ;;  %v3013_v29 = vld [vmem:[%s4229_s15 + $0x54] sm:$0xf] }
 0x16e   : >> { %2167 = vrot.lane.b32.xlu0 %v3107_v36, %s3408_s27  ;;  %v1118_v58 = vshll.u32 %v960_v21, 16  ;;  %v1122_v57 = vshrl.u32 %v960_v21, 16  ;;  %v2265_v60 = vrot.slane %v2263_v12, 4  ;;  %v2266_v61 = vrot.slane %v3124_v30, 5 }
 0x16f   : >> { %v1106_v59 = vrot.slane %v1105_v15, 4  ;;  %v2269_v62 = vrot.slane %v3125_v31, 5  ;;  %v1115_v63 = vor.u32 %v1114_v54, %v1110_v48  ;;  %v1128_v37 = vshll.u32 %v961_v51, 16 }
 0x170   : >> { %v1120_v0 = vrot.slane %v1118_v58, 5  ;;  %v1124_v1 = vrot.slane %v1122_v57, 4  ;;  %v2267_v4 = vsel %vm4225_vm2, %v2265_v60, %v2266_v61  ;;  %v2268_v5 = vrot.slane %v2266_v61, 4 }
 0x171   : >> { %v1111_v2 = vsel %vm4267_vm5, %v1106_v59, %v1110_v48  ;;  %v1132_v6 = vshrl.u32 %v961_v51, 16  ;;  %2169 = vrot.lane.b32.xlu1 %v3108_v50, %s3408_s27  ;;  %v1116_v11 = vrot.slane %v1115_v63, 4  ;;  %v1130_v13 = vrot.slane %v1128_v37, 5  ;;  %v3016_v59 = vld [vmem:[%s4229_s15 + $0x60] sm:$0x1]  ;;  %v3332_v63 = vld [vmem:[%s4229_s15 + $0x50] sm:$0xff]  }
 0x172   : >> { %2316 = vrot.lane.b32.xlu0 %v3139_v56, %s3409_s28  ;;  %v1125_v12 = vor.u32 %v1124_v1, %v1120_v0  ;;  %v1138_v16 = vshll.u32 %v962_v42, 16  ;;  %v2270_v19 = vsel %vm4225_vm2, %v2268_v5, %v2269_v62  ;;  %v2962_v21 = vrot.slane %v1214_v28, 9  ;;  %v3014_v42 = vld [vmem:[%s4229_s15 + $0x58] sm:$0xf]  ;;  %v3040_v1 = vld [vmem:[%s4229_s15 + $0x50] sm:$0xe] }
 0x173   : >> { %v1134_v20 = vrot.slane %v1132_v6, 4  ;;  %v1283_v22 = vrot.slane %v1215_v49, 5  ;;  %v1121_v23 = vsel %vm4267_vm5, %v1116_v11, %v1120_v0  ;;  %v3140_v24 = vcombine.low %v2267_v4, %v2270_v19  ;;  %v3015_v49 = vld [vmem:[%s4229_s15 + $0x5c] sm:$0xf] }
 0x174   : >> { %v1126_v26 = vrot.slane %v1125_v12, 4  ;;  %v1140_v27 = vrot.slane %v1138_v16, 5  ;;  %v2957_v30 = vcombine.low %v1111_v2, %v1121_v23  ;;  %v1286_v35 = vrot.slane %v1216_v7, 5  ;;  %v3041_v7 = vld [vmem:[%s4229_s15 + $0x54] sm:$0xf] }
 0x175   : >> { %v1135_v31 = vor.u32 %v1134_v20, %v1130_v13  ;;  %v1284_v34 = vsel %vm4225_vm2, %v2962_v21, %v1283_v22  ;;  %v1285_v3 = vrot.slane %v1283_v22, 4  ;;  %v1289_v51 = vrot.slane %v1217_v8, 5  ;;  %v3042_v8 = vld [vmem:[%s4229_s15 + $0x58] sm:$0xf]  ;;  %v3043_v16 = vld [vmem:[%s4229_s15 + $0x5c] sm:$0xf] }
 0x176   : >> { %2318 = vrot.lane.b32.xlu0 %v3140_v24, %s3409_s28  ;;  %v1131_v32 = vsel %vm4267_vm5, %v1126_v26, %v1130_v13  ;;  %v1292_v36 = vrot.slane %v1218_v9, 5  ;;  %1178 = vrot.lane.b32.xlu1 %v2957_v30, %s3405_s22  ;;  %v1597_v52 = vshrl.u32 %v3012_v17, 16  ;;  %v1600_v25 = vshll.u32 %v3012_v17, 16  ;;  %v4572_v37 = vpop.permute.xlu1 %1413  ;;  %v3044_v22 = vld [vmem:[%s4229_s15 + $0x60] sm:$0x1] }
 0x177   : >> { %v1136_v43 = vrot.slane %v1135_v31, 4  ;;  %v1606_v55 = vshll.u32 %v3013_v29, 16  ;;  %v1287_v56 = vsel %vm4225_vm2, %v1285_v3, %v1286_v35  ;;  %v1288_v15 = vrot.slane %v1286_v35, 4  ;;  %v4580_v23 = vpop.permute.xlu0 %1411 }
 0x178   : >> { %v1291_v48 = vrot.slane %v1289_v51, 4  ;;  %v1610_v50 = vshrl.u32 %v3013_v29, 16  ;;  %v2969_v58 = vcombine.low %v1284_v34, %v1287_v56  ;;  %v1599_v57 = vrot.slane %v1597_v52, 4 }
 0x179   : >> { %v1141_v54 = vsel %vm4267_vm5, %v1136_v43, %v1140_v27  ;;  %v1602_v28 = vrot.slane %v1600_v25, 5  ;;  %v1290_v61 = vsel %vm4225_vm2, %v1288_v15, %v1289_v51  ;;  %v1608_v0 = vrot.slane %v1606_v55, 5  ;;  %v3098_v25 = vld [vmem:[%s4229_s15 + $0x64] sm:$0xf] }
 0x17a   : >> { %v2958_v60 = vcombine.low %v1131_v32, %v1141_v54  ;;  %v1293_v62 = vsel %vm4225_vm2, %v1291_v48, %v1292_v36  ;;  %1330 = vrot.lane.b32.xlu0 %v2969_v58, %s3404_s21  ;;  %v1612_v5 = vrot.slane %v1610_v50, 4  ;;  %v1616_v6 = vshll.u32 %v3014_v42, 16  ;;  %v3333_v32 = vld [vmem:[%s4229_s15 + $0x58] sm:$0xff]  }
 0x17b   : >> { %v2970_v2 = vcombine.low %v1290_v61, %v1293_v62  ;;  %v1603_v4 = vor.u32 %v1602_v28, %v1599_v57  ;;  %v1620_v9 = vshrl.u32 %v3014_v42, 16  ;;  %v1626_v11 = vshll.u32 %v3015_v49, 16  ;;  %v3099_v42 = vld [vmem:[%s4229_s15 + $0x68] sm:$0xf] }
 0x17c   : >> { %1180 = vrot.lane.b32.xlu1 %v2958_v60, %s3405_s22  ;;  %v1630_v12 = vshrl.u32 %v3015_v49, 16  ;;  %v1636_v13 = vshll.u32 %v3016_v59, 16  ;;  %v1613_v19 = vor.u32 %v1612_v5, %v1608_v0  ;;  %v1618_v20 = vrot.slane %v1616_v6, 5  ;;  %v3100_v60 = vld [vmem:[%s4229_s15 + $0x6c] sm:$0xf] }
 0x17d   : >> { %v1604_v17 = vrot.slane %v1603_v4, 4  ;;  %v3048_v21 = vrot.slane %v3040_v1, 9  ;;  %v1622_v24 = vrot.slane %v1620_v9, 4  ;;  %v1628_v26 = vrot.slane %v1626_v11, 5  ;;  %v3338_v1 = vld [vmem:[%s4229_s15 + $0x14] sm:$0xff]   ;;  %v3340_v4 = vld [vmem:[%s4229_s15 + $0x28] sm:$0xff]  }
 0x17e   : >> { %v1632_v27 = vrot.slane %v1630_v12, 4  ;;  %v1638_v29 = vrot.slane %v1636_v13, 5  ;;  %1423 = vrot.lane.b32.xlu0 %v3332_v63, %s3402_s19  ;;  %v1614_v31 = vrot.slane %v1613_v19, 4  ;;  %v1778_v34 = vrot.slane %v3041_v7, 5  ;;  %v4601_v59 = vpop.permute.xlu0 %1813  ;;  %v3336_v63 = vld [vmem:[%s4229_s15] sm:$0xff]   ;;  %v3341_v11 = vld [vmem:[%s4229_s15 + $0x30] sm:$0xff]  }
 0x17f   : >> { %v1609_v30 = vsel %vm4267_vm5, %v1604_v17, %v1608_v0  ;;  %v1781_v3 = vrot.slane %v3042_v8, 5  ;;  %v1623_v35 = vor.u32 %v1622_v24, %v1618_v20  ;;  %v1784_v36 = vrot.slane %v3043_v16, 5  ;;  %v4587_v52 = vpop.permute.xlu1 %1318  ;;  %v3337_v0 = vld [vmem:[%s4229_s15 + $0x8] sm:$0xff]   ;;  %v3101_v9 = vld [vmem:[%s4229_s15 + $0x70] sm:$0xf]  ;;  %935 = vst.msk [vmem:[#allocation3] sm:$0xff] %vm934_vm6, %v3336_v63 }
 0x180   : >> { %1332 = vrot.lane.b32.xlu1 %v2970_v2, %s3404_s21  ;;  %v1633_v51 = vor.u32 %v1632_v27, %v1628_v26  ;;  %v1787_v43 = vrot.slane %v3044_v22, 5  ;;  %v1619_v55 = vsel %vm4267_vm5, %v1614_v31, %v1618_v20  ;;  %v1779_v56 = vsel %vm4225_vm2, %v3048_v21, %v1778_v34  ;;  %v3339_v2 = vld [vmem:[%s4229_s15 + $0x1c] sm:$0xff]   ;;  %v3102_v19 = vld [vmem:[%s4229_s15 + $0x74] sm:$0x1]  ;;  %v3343_v21 = vld [vmem:[%s4229_s15 + $0x44] sm:$0xff]   ;;  %936 = vst.msk [vmem:[#allocation3 + $0x8] sm:$0xff] %vm934_vm6, %v3337_v0 }
 0x181   : >> { %v1780_v15 = vrot.slane %v1778_v34, 4  ;;  %v1783_v48 = vrot.slane %v1781_v3, 4  ;;  %v3023_v50 = vcombine.low %v1609_v30, %v1619_v55  ;;  %v1624_v54 = vrot.slane %v1623_v35, 4  ;;  %v3342_v20 = vld [vmem:[%s4229_s15 + $0x3c] sm:$0xff]   ;;  %v3126_v30 = vld [vmem:[%s4229_s15 + $0x64] sm:$0xe] }
 0x182   : >> { %v1634_v58 = vrot.slane %v1633_v51, 4  ;;  %v1786_v57 = vrot.slane %v1784_v36, 4  ;;  %v2092_v61 = vshrl.u32 %v3098_v25, 16  ;;  %v2095_v62 = vshll.u32 %v3098_v25, 16  ;;  %v3334_v31 = vld [vmem:[%s4229_s15 + $0x64] sm:$0xff]   ;;  %937 = vst.msk [vmem:[#allocation3 + $0x10] sm:$0xff] %vm934_vm6, %v3338_v1 }
 0x183   : >> { %v1782_v28 = vsel %vm4225_vm2, %v1780_v15, %v1781_v3  ;;  %v4599_v49 = vsel %vm4225_vm2, %v1783_v48, %v1784_v36  ;;  %1676 = vrot.lane.b32.xlu0 %v3023_v50, %s3406_s24  ;;  %v1629_v5 = vsel %vm4267_vm5, %v1624_v54, %v1628_v26  ;;  %v2101_v8 = vshll.u32 %v3099_v42, 16  ;;  %v3127_v51 = vld [vmem:[%s4229_s15 + $0x68] sm:$0xf]  ;;  %v3128_v55 = vld [vmem:[%s4229_s15 + $0x6c] sm:$0xf]  ;;  %938 = vst.msk [vmem:[#allocation3 + $0x18] sm:$0xff] %vm934_vm6, %v3339_v2 }
 0x184   : >> { %1425 = vrot.lane.b32.xlu1 %v3333_v32, %s3402_s19  ;;  %v1639_v6 = vsel %vm4267_vm5, %v1634_v58, %v1638_v29  ;;  %v3055_v7 = vcombine.low %v1779_v56, %v1782_v28  ;;  %v1788_v13 = vsel %vm4225_vm2, %v1786_v57, %v1787_v43  ;;  %v2094_v16 = vrot.slane %v2092_v61, 4  ;;  %v4625_v29 = vpop.permute.xlu1 %1320  ;;  %v3129_v54 = vld [vmem:[%s4229_s15 + $0x70] sm:$0xf]  ;;  %939 = vst.msk [vmem:[#allocation3 + $0x20] sm:$0xff] %vm934_vm6, %v3340_v4  ;;  %v3130_v28 = vld [vmem:[%s4229_s15 + $0x74] sm:$0x1] }
 0x185   : >> { %v3024_v12 = vcombine.low %v1629_v5, %v1639_v6  ;;  %v2097_v17 = vrot.slane %v2095_v62, 5  ;;  %v3056_v22 = vcombine.low %v4599_v49, %v1788_v13  ;;  %v4623_v24 = vrot.slane %v2101_v8, 5  ;;  %940 = vst.msk [vmem:[#allocation3 + $0x28] sm:$0xff] %vm934_vm6, %v3341_v11  ;;  %941 = vst.msk [vmem:[#allocation3 + $0x30] sm:$0xff] %vm934_vm6, %v3342_v20  ;;  %v3335_v63 = vld [vmem:[%s4229_s15 + $0x6c] sm:$0xff]  }
 0x186   : >> { %v2105_v26 = vshrl.u32 %v3099_v42, 16  ;;  %v2111_v27 = vshll.u32 %v3100_v60, 16  ;;  %v2115_v3 = vshrl.u32 %v3100_v60, 16  ;;  %v2121_v32 = vshll.u32 %v3101_v9, 16  ;;  %942 = vst.msk [vmem:[#allocation3 + $0x38] sm:$0xff] %vm934_vm6, %v3343_v21 }
 0x187   : >> { %v2098_v34 = vor.u32 %v2097_v17, %v2094_v16  ;;  %v2125_v35 = vshrl.u32 %v3101_v9, 16  ;;  %1825 = vrot.lane.b32.xlu0 %v3055_v7, %s3403_s20  ;;  %v2131_v25 = vshll.u32 %v3102_v19, 16  ;;  %v3134_v62 = vrot.slane %v3126_v30, 9 }
 0x188   : >> { %1678 = vrot.lane.b32.xlu1 %v3024_v12, %s3406_s24  ;;  %v2107_v36 = vrot.slane %v2105_v26, 4  ;;  %v2113_v43 = vrot.slane %v2111_v27, 5  ;;  %v2117_v15 = vrot.slane %v2115_v3, 4  ;;  %v2123_v48 = vrot.slane %v2121_v32, 5  ;;  %v1816_v5 = vpop.permute.xlu1 %1815 }
 0x189   : >> { %v2099_v56 = vrot.slane %v2098_v34, 4  ;;  %v2127_v42 = vrot.slane %v2125_v35, 4  ;;  %v1167_v50 = vpop.permute.xlu0 %1166  ;;  %v2133_v57 = vrot.slane %v2131_v25, 5  ;;  %v2273_v1 = vrot.slane %v3127_v51, 5 }
 0x18a   : >> { %v2108_v58 = vor.u32 %v2107_v36, %v4623_v24  ;;  %v2118_v60 = vor.u32 %v2117_v15, %v2113_v43  ;;  %1191 = vst.msk [vmem:[#allocation3] sm:$0xff] %vm1190_vm7, %v1167_v50  ;;  %v2276_v2 = vrot.slane %v3128_v55, 5  ;;  %v2279_v4 = vrot.slane %v3129_v54, 5 }
 0x18b   : >> { %v2104_v49 = vsel %vm4267_vm5, %v2099_v56, %v4623_v24  ;;  %v2128_v61 = vor.u32 %v2127_v42, %v2123_v48  ;;  %1918 = vrot.lane.b32.xlu0 %v3334_v31, %s3407_s25  ;;  %1343 = vst.msk [vmem:[#allocation3] sm:$0xff] %vm1342_vm8, %v4587_v52  ;;  %v2282_v8 = vrot.slane %v3130_v28, 5  ;;  %v2274_v12 = vsel %vm4225_vm2, %v3134_v62, %v2273_v1 }
 0x18c   : >> { %1827 = vrot.lane.b32.xlu1 %v3056_v22, %s3403_s20  ;;  %v2109_v0 = vrot.slane %v2108_v58, 4  ;;  %v2119_v6 = vrot.slane %v2118_v60, 4  ;;  %v2275_v13 = vrot.slane %v2273_v1, 4  ;;  %v2278_v16 = vrot.slane %v2276_v2, 4  ;;  %1436 = vst.msk [vmem:[#allocation3] sm:$0xff] %vm1435_vm9, %v4580_v23 }
 0x18d   : >> { %v2129_v7 = vrot.slane %v2128_v61, 4  ;;  %v1169_v9 = vpop.permute.xlu0 %1168  ;;  %v2281_v20 = vrot.slane %v2279_v4, 4  ;;  %v3143_v27 = vcombine.low %v4167_v33, %v4172_v10  ;;  %v3145_v31 = vcombine.low %v4187_v41, %v4192_v18 }
 0x18e   : >> { %v2114_v11 = vsel %vm4267_vm5, %v2109_v0, %v2113_v43  ;;  %1192 = vst.msk [vmem:[#allocation3 + $0x8] sm:$0xff] %vm1190_vm7, %v1169_v9  ;;  %v2124_v17 = vsel %vm4267_vm5, %v2119_v6, %v2123_v48  ;;  %v2277_v22 = vsel %vm4225_vm2, %v2275_v13, %v2276_v2  ;;  %v2280_v53 = vsel %vm4225_vm2, %v2278_v16, %v2279_v4 }
 0x18f   : >> { %v3109_v52 = vcombine.low %v2104_v49, %v2114_v11  ;;  %v2134_v19 = vsel %vm4267_vm5, %v2129_v7, %v2133_v57  ;;  %1344 = vst.msk [vmem:[#allocation3 + $0x8] sm:$0xff] %vm1342_vm8, %v4625_v29  ;;  %v3141_v23 = vcombine.low %v2274_v12, %v2277_v22  ;;  %v2283_v24 = vsel %vm4225_vm2, %v2281_v20, %v2282_v8 }
 0x190   : >> { %1920 = vrot.lane.b32.xlu1 %v3335_v63, %s3407_s25  ;;  %v3110_v21 = vcombine.low %v2124_v17, %v2134_v19  ;;  %1437 = vst.msk [vmem:[#allocation3 + $0x8] sm:$0xff] %vm1435_vm9, %v4572_v37  ;;  %v3144_v29 = vcombine.low %v4177_v39, %v4182_v40  ;;  %v3142_v37 = vcombine.low %v2280_v53, %v2283_v24  ;;  %vm2376_vm2 = vcmask 588800  }
 0x191   : >> { %2171 = vrot.lane.b32.xlu0 %v3109_v52, %s3408_s27  ;;  %v1667_v26 = vpop.permute.xlu1 %1666  ;;  %3216 = vmatprep.subr.bf16.mxu0 %v3143_v27  ;;  %v3146_v3 = vcombine.low %v4197_v44, %v4202_v45 }
 0x192   : >> { %1690 = vst.msk [vmem:[#allocation3 + $0x8] sm:$0xff] %vm1688_vm10, %v1667_v26  ;;  %3217 = vmatpush3.bf16.msra.mxu0 %v3143_v27  ;;  %3242 = vmatprep.subr.bf16.mxu1 %v3143_v27 }
 0x193   : >> { %1839 = vst.msk [vmem:[#allocation3 + $0x8] sm:$0xff] %vm1837_vm11, %v1816_v5  ;;  %3218 = vmatprep.subr.bf16.mxu0 %v3144_v29  ;;  %3247 = vmatpush3.bf16.msra.mxu1 %v3143_v27 }
 0x194   : >> { %2173 = vrot.lane.b32.xlu1 %v3110_v21, %s3408_s27  ;;  %3243 = vmatprep.subr.bf16.mxu1 %v3144_v29 }
 0x195   : >> { %2320 = vrot.lane.b32.xlu0 %v3141_v23, %s3409_s28  ;;  %v1909_v30 = vpop.permute.xlu1 %1908 }
 0x196   : >> { %v1665_v47 = vpop.permute.xlu0 %1664  ;;  %1932 = vst.msk [vmem:[#allocation3 + $0x8] sm:$0xff] %vm1930_vm12, %v1909_v30  ;;  %3219 = vmatpush3.bf16.msra.mxu0 %v3144_v29 }
 0x197   : >> { %1689 = vst.msk [vmem:[#allocation3] sm:$0xff] %vm1688_vm10, %v1665_v47  ;;  %3220 = vmatprep.subr.bf16.mxu0 %v3145_v31  ;;  %3248 = vmatpush3.bf16.msra.mxu1 %v3144_v29 }
 0x198   : >> { %2322 = vrot.lane.b32.xlu1 %v3142_v37, %s3409_s28  ;;  %1838 = vst.msk [vmem:[#allocation3] sm:$0xff] %vm1837_vm11, %v4601_v59  ;;  %3244 = vmatprep.subr.bf16.mxu1 %v3145_v31  ;;  %v3147_v59 = vcombine.low %v4207_v46, %v4207_v46 }
 0x19a   : >> { %v1907_v34 = vpop.permute.xlu0 %1906  ;;  %3221 = vmatpush3.bf16.msra.mxu0 %v3145_v31  ;;  %v2403_v36 = vsel %vm2401_vm14, %v3147_v59, 0 }
 0x19b   : >> { %1931 = vst.msk [vmem:[#allocation3] sm:$0xff] %vm1930_vm12, %v1907_v34  ;;  %3222 = vmatprep.subr.bf16.mxu0 %v3146_v3  ;;  %3249 = vmatpush3.bf16.msra.mxu1 %v3145_v31 }
 0x19c   : >> { %v2162_v32 = vpop.permute.xlu1 %2161  ;;  %3245 = vmatprep.subr.bf16.mxu1 %v3146_v3 }
 0x19d   : >> { %2185 = vst.msk [vmem:[#allocation3 + $0x8] sm:$0xff] %vm2183_vm13, %v2162_v32 }
 0x19e   : >> { %v2160_v35 = vpop.permute.xlu0 %2159  ;;  %3223 = vmatpush3.bf16.msra.mxu0 %v3146_v3 }
 0x19f   : >> { %2184 = vst.msk [vmem:[#allocation3] sm:$0xff] %vm2183_vm13, %v2160_v35  ;;  %3252 = vmatprep.subr.msk.bf16.mxu0 %vm2401_vm14, %v3147_v59  ;;  %3250 = vmatpush3.bf16.msra.mxu1 %v3146_v3 }
 0x1a0   : >> { %3253 = vmatprep.subr.msk.bf16.mxu1 %vm2401_vm14, %v3147_v59 }
 0x1a2   : >> { %v2309_v51 = vpop.permute.xlu0 %2308  ;;  %3225 = vmatpush3.bf16.msra.mxu0 %v2403_v36 }
 0x1a3   : >> { %2333 = vst.msk [vmem:[#allocation3] sm:$0xff] %vm2332_vm15, %v2309_v51  ;;  %3251 = vmatpush3.bf16.msra.mxu1 %v2403_v36 }
 0x1a4   : >> { %v1171_v43 = vpop.permute.xlu1 %1170 }
 0x1a5   : >> { %1193 = vst.msk [vmem:[#allocation3 + $0x10] sm:$0xff] %vm1190_vm7, %v1171_v43 }
 0x1a6   : >> { %v2311_v25 = vpop.permute.xlu0 %2310 }
 0x1a7   : >> { %2334 = vst.msk [vmem:[#allocation3 + $0x8] sm:$0xff] %vm2332_vm15, %v2311_v25 }
 0x1a8   : >> { %v1173_v55 = vpop.permute.xlu1 %1172 }
 0x1a9   : >> { %1194 = vst.msk [vmem:[#allocation3 + $0x18] sm:$0xff] %vm1190_vm7, %v1173_v55 }
 0x1aa   : >> { %v1323_v56 = vpop.permute.xlu0 %1322  ;;  %v2341_v15 = vld [vmem:[#allocation3] sm:$0xff] }
 0x1ab   : >> { %1345 = vst.msk [vmem:[#allocation3 + $0x10] sm:$0xff] %vm1342_vm8, %v1323_v56  ;;  %3226 = vmatprep.mubr.msk.bf16.mxu0 %vm2376_vm2, %v2341_v15 }
 0x1ac   : >> { %v1325_v48 = vpop.permute.xlu1 %1324 }
 0x1ad   : >> { %1346 = vst.msk [vmem:[#allocation3 + $0x18] sm:$0xff] %vm1342_vm8, %v1325_v48 }
 0x1ae   : >> { %v1416_v42 = vpop.permute.xlu0 %1415  ;;  %v2342_v50 = vld [vmem:[#allocation3 + $0x8] sm:$0xff] }
 0x1af   : >> { %1438 = vst.msk [vmem:[#allocation3 + $0x10] sm:$0xff] %vm1435_vm9, %v1416_v42  ;;  %3227 = vmatmul.mubr.msk.bf16.vlgmr.msra.gmra.mrb[0].mxu0 %vm2376_vm2, %v2342_v50 }
 0x1b0   : >> { %v1418_v54 = vpop.permute.xlu1 %1417 }
 0x1b1   : >> { %1439 = vst.msk [vmem:[#allocation3 + $0x18] sm:$0xff] %vm1435_vm9, %v1418_v54 }
 0x1b2   : >> { %v1669_v58 = vpop.permute.xlu0 %1668 }
 0x1b3   : >> { %1691 = vst.msk [vmem:[#allocation3 + $0x10] sm:$0xff] %vm1688_vm10, %v1669_v58 }
 0x1b4   : >> { %v1671_v57 = vpop.permute.xlu1 %1670 }
 0x1b5   : >> { %1692 = vst.msk [vmem:[#allocation3 + $0x18] sm:$0xff] %vm1688_vm10, %v1671_v57 }
 0x1b6   : >> { %v1818_v28 = vpop.permute.xlu0 %1817 }
 0x1b7   : >> { %1840 = vst.msk [vmem:[#allocation3 + $0x10] sm:$0xff] %vm1837_vm11, %v1818_v28 }
 0x1b8   : >> { %v1820_v49 = vpop.permute.xlu1 %1819 }
 0x1b9   : >> { %1841 = vst.msk [vmem:[#allocation3 + $0x18] sm:$0xff] %vm1837_vm11, %v1820_v49 }
 0x1ba   : >> { %v1911_v60 = vpop.permute.xlu0 %1910 }
 0x1bb   : >> { %1933 = vst.msk [vmem:[#allocation3 + $0x10] sm:$0xff] %vm1930_vm12, %v1911_v60 }
 0x1bc   : >> { %v1913_v61 = vpop.permute.xlu1 %1912 }
 0x1bd   : >> { %1934 = vst.msk [vmem:[#allocation3 + $0x18] sm:$0xff] %vm1930_vm12, %v1913_v61 }
 0x1be   : >> { %v2164_v62 = vpop.permute.xlu0 %2163 }
 0x1bf   : >> { %2186 = vst.msk [vmem:[#allocation3 + $0x10] sm:$0xff] %vm2183_vm13, %v2164_v62 }
 0x1c0   : >> { %v2166_v63 = vpop.permute.xlu1 %2165 }
 0x1c1   : >> { %2187 = vst.msk [vmem:[#allocation3 + $0x18] sm:$0xff] %vm2183_vm13, %v2166_v63 }
 0x1c2   : >> { %v2313_v0 = vpop.permute.xlu0 %2312 }
 0x1c3   : >> { %2335 = vst.msk [vmem:[#allocation3 + $0x10] sm:$0xff] %vm2332_vm15, %v2313_v0 }
 0x1c6   : >> { %v1175_v1 = vpop.permute.xlu1 %1174  ;;  %v2315_v2 = vpop.permute.xlu0 %2314 }
 0x1c7   : >> { %1195 = vst.msk [vmem:[#allocation3 + $0x20] sm:$0xff] %vm1190_vm7, %v1175_v1 }
 0x1c8   : >> { %2336 = vst.msk [vmem:[#allocation3 + $0x18] sm:$0xff] %vm2332_vm15, %v2315_v2 }
 0x1ca   : >> { %v2343_v4 = vld [vmem:[#allocation3 + $0x10] sm:$0xff] }
 0x1cb   : >> { %v1327_v5 = vpop.permute.xlu0 %1326  ;;  %3230 = vmatprep.mubr.msk.bf16.mxu0 %vm2376_vm2, %v2343_v4  ;;  %v1177_v6 = vpop.permute.xlu1 %1176 }
 0x1cc   : >> { %1347 = vst.msk [vmem:[#allocation3 + $0x20] sm:$0xff] %vm1342_vm8, %v1327_v5 }
 0x1cd   : >> { %1196 = vst.msk [vmem:[#allocation3 + $0x28] sm:$0xff] %vm1190_vm7, %v1177_v6 }
 0x1cf   : >> { %v2344_v7 = vld [vmem:[#allocation3 + $0x18] sm:$0xff]  ;;  %v1420_v8 = vpop.permute.xlu0 %1419  ;;  %v1329_v9 = vpop.permute.xlu1 %1328 }
 0x1d0   : >> { %3231 = vmatmul.mubr.msk.bf16.gmra.mrb[4].mxu0 %vm2376_vm2, %v2344_v7  ;;  %1440 = vst.msk [vmem:[#allocation3 + $0x20] sm:$0xff] %vm1435_vm9, %v1420_v8 }
 0x1d1   : >> { %1348 = vst.msk [vmem:[#allocation3 + $0x28] sm:$0xff] %vm1342_vm8, %v1329_v9 }
 0x1d3   : >> { %v1673_v11 = vpop.permute.xlu0 %1672  ;;  %v1422_v12 = vpop.permute.xlu1 %1421 }
 0x1d4   : >> { %1693 = vst.msk [vmem:[#allocation3 + $0x20] sm:$0xff] %vm1688_vm10, %v1673_v11 }
 0x1d5   : >> { %1441 = vst.msk [vmem:[#allocation3 + $0x28] sm:$0xff] %vm1435_vm9, %v1422_v12 }
 0x1d7   : >> { %v1822_v13 = vpop.permute.xlu0 %1821  ;;  %v1675_v16 = vpop.permute.xlu1 %1674 }
 0x1d8   : >> { %1842 = vst.msk [vmem:[#allocation3 + $0x20] sm:$0xff] %vm1837_vm11, %v1822_v13 }
 0x1d9   : >> { %1694 = vst.msk [vmem:[#allocation3 + $0x28] sm:$0xff] %vm1688_vm10, %v1675_v16 }
 0x1db   : >> { %v1915_v52 = vpop.permute.xlu0 %1914  ;;  %v1824_v17 = vpop.permute.xlu1 %1823 }
 0x1dc   : >> { %1935 = vst.msk [vmem:[#allocation3 + $0x20] sm:$0xff] %vm1930_vm12, %v1915_v52 }
 0x1dd   : >> { %1843 = vst.msk [vmem:[#allocation3 + $0x28] sm:$0xff] %vm1837_vm11, %v1824_v17 }
 0x1df   : >> { %v1917_v19 = vpop.permute.xlu1 %1916 }
 0x1e0   : >> { %v2168_v20 = vpop.permute.xlu0 %2167  ;;  %1936 = vst.msk [vmem:[#allocation3 + $0x28] sm:$0xff] %vm1930_vm12, %v1917_v19 }
 0x1e1   : >> { %2188 = vst.msk [vmem:[#allocation3 + $0x20] sm:$0xff] %vm2183_vm13, %v2168_v20 }
 0x1e3   : >> { %v2170_v21 = vpop.permute.xlu1 %2169 }
 0x1e4   : >> { %v2317_v22 = vpop.permute.xlu0 %2316  ;;  %2189 = vst.msk [vmem:[#allocation3 + $0x28] sm:$0xff] %vm2183_vm13, %v2170_v21 }
 0x1e5   : >> { %2337 = vst.msk [vmem:[#allocation3 + $0x20] sm:$0xff] %vm2332_vm15, %v2317_v22 }
 0x1e8   : >> { %v2319_v23 = vpop.permute.xlu0 %2318  ;;  %v1179_v53 = vpop.permute.xlu1 %1178 }
 0x1e9   : >> { %2338 = vst.msk [vmem:[#allocation3 + $0x28] sm:$0xff] %vm2332_vm15, %v2319_v23 }
 0x1ea   : >> { %1197 = vst.msk [vmem:[#allocation3 + $0x30] sm:$0xff] %vm1190_vm7, %v1179_v53 }
 0x1ec   : >> { %v2345_v24 = vld [vmem:[#allocation3 + $0x20] sm:$0xff]  ;;  %v1331_v26 = vpop.permute.xlu0 %1330 }
 0x1ed   : >> { %3234 = vmatprep.mubr.msk.bf16.mxu1 %vm2376_vm2, %v2345_v24  ;;  %1349 = vst.msk [vmem:[#allocation3 + $0x30] sm:$0xff] %vm1342_vm8, %v1331_v26 }
 0x1ee   : >> { %v1181_v27 = vpop.permute.xlu1 %1180 }
 0x1ef   : >> { %1198 = vst.msk [vmem:[#allocation3 + $0x38] sm:$0xff] %vm1190_vm7, %v1181_v27 }
 0x1f0   : >> { %v2346_v29 = vld [vmem:[#allocation3 + $0x28] sm:$0xff]  ;;  %v1424_v37 = vpop.permute.xlu0 %1423 }
 0x1f1   : >> { %3235 = vmatmul.mubr.msk.bf16.vlgmr.msra.gmra.mrb[0].mxu1 %vm2376_vm2, %v2346_v29  ;;  %1442 = vst.msk [vmem:[#allocation3 + $0x30] sm:$0xff] %vm1435_vm9, %v1424_v37 }
 0x1f2   : >> { %v1333_v47 = vpop.permute.xlu1 %1332 }
 0x1f3   : >> { %1350 = vst.msk [vmem:[#allocation3 + $0x38] sm:$0xff] %vm1342_vm8, %v1333_v47 }
 0x1f5   : >> { %v1677_v31 = vpop.permute.xlu0 %1676 }
 0x1f6   : >> { %v1426_v30 = vpop.permute.xlu1 %1425  ;;  %1695 = vst.msk [vmem:[#allocation3 + $0x30] sm:$0xff] %vm1688_vm10, %v1677_v31 }
 0x1f7   : >> { %1443 = vst.msk [vmem:[#allocation3 + $0x38] sm:$0xff] %vm1435_vm9, %v1426_v30 }
 0x1f9   : >> { %v1826_v3 = vpop.permute.xlu0 %1825 }
 0x1fa   : >> { %v1679_v34 = vpop.permute.xlu1 %1678  ;;  %1844 = vst.msk [vmem:[#allocation3 + $0x30] sm:$0xff] %vm1837_vm11, %v1826_v3 }
 0x1fb   : >> { %1696 = vst.msk [vmem:[#allocation3 + $0x38] sm:$0xff] %vm1688_vm10, %v1679_v34 }
 0x1fd   : >> { %v1919_v35 = vpop.permute.xlu0 %1918 }
 0x1fe   : >> { %v1828_v32 = vpop.permute.xlu1 %1827  ;;  %1937 = vst.msk [vmem:[#allocation3 + $0x30] sm:$0xff] %vm1930_vm12, %v1919_v35 }
 0x1ff   : >> { %1845 = vst.msk [vmem:[#allocation3 + $0x38] sm:$0xff] %vm1837_vm11, %v1828_v32 }
 0x202   : >> { %v1921_v59 = vpop.permute.xlu1 %1920 }
 0x203   : >> { %1938 = vst.msk [vmem:[#allocation3 + $0x38] sm:$0xff] %vm1930_vm12, %v1921_v59  ;;  %v2172_v51 = vpop.permute.xlu0 %2171 }
 0x204   : >> { %2190 = vst.msk [vmem:[#allocation3 + $0x30] sm:$0xff] %vm2183_vm13, %v2172_v51 }
 0x206   : >> { %v2174_v36 = vpop.permute.xlu1 %2173 }
 0x207   : >> { %2191 = vst.msk [vmem:[#allocation3 + $0x38] sm:$0xff] %vm2183_vm13, %v2174_v36  ;;  %v2321_v43 = vpop.permute.xlu0 %2320 }
 0x208   : >> { %2339 = vst.msk [vmem:[#allocation3 + $0x30] sm:$0xff] %vm2332_vm15, %v2321_v43 }
 0x20a   : >> { %v2323_v25 = vpop.permute.xlu1 %2322 }
 0x20b   : >> { %2340 = vst.msk [vmem:[#allocation3 + $0x38] sm:$0xff] %vm2332_vm15, %v2323_v25 }
 0x20f   : >> { %v2347_v55 = vld [vmem:[#allocation3 + $0x30] sm:$0xff] }
 0x210   : >> { %3238 = vmatprep.mubr.msk.bf16.mxu1 %vm2376_vm2, %v2347_v55 }
 0x212   : >> { %v2348_v56 = vld [vmem:[#allocation3 + $0x38] sm:$0xff] }
 0x213   : >> { %3239 = vmatmul.mubr.msk.bf16.gmra.mrb[4].mxu1 %vm2376_vm2, %v2348_v56 }
 0x282   : >> { %v3228_v15 = vpop.f32.mrb[0].mxu0 }
 0x283   : >> { %v3187_v48 = vpack.c.bf16 %v3228_v15, %v3228_v15  ;;  %v2439_v42 = vpop.f32.mrb[1].mxu0  ;;  %v2626_v57 = vmul.f32 %v3228_v15, %v3228_v15  ;;  %v2589_v1 = vsel %vm934_vm6, %v3228_v15, 0.0 }
 0x284   : >> { %v3185_v50 = vpack.c.bf16 %v2439_v42, %v2439_v42  ;;  %v2624_v54 = vmul.f32 %v2439_v42, %v2439_v42  ;;  %v3229_v58 = vpop.f32.mrb[2].mxu0  ;;  %v2586_v60 = vsel %vm934_vm6, %v2439_v42, 0.0 }
 0x285   : >> { %2572 = vst.msk [vmem:[%s4758_s26 + $0x8] sm:$0xf] %vm267_vm0, %v3187_v48  ;;  %v3188_v28 = vpack.c.bf16 %v3229_v58, %v3229_v58  ;;  %v2442_v49 = vpop.f32.mrb[3].mxu0  ;;  %v2627_v4 = vmul.f32 %v3229_v58, %v3229_v58  ;;  %v2643_v8 = vsel %vm934_vm6, %v2626_v57, 0.0  ;;  %v2591_v9 = vsel %vm934_vm6, %v3229_v58, 0.0 }
 0x286   : >> { %2570 = vst.msk [vmem:[%s4758_s26] sm:$0xf] %vm267_vm0, %v3185_v50  ;;  %v3186_v61 = vpack.c.bf16 %v2442_v49, %v2442_v49  ;;  %v2587_v62 = vsel %vm934_vm6, %v2442_v49, 0.0  ;;  %v2625_v63 = vmul.f32 %v2442_v49, %v2442_v49  ;;  %v2640_v2 = vsel %vm934_vm6, %v2624_v54, 0.0 }
 0x287   : >> { %2573 = vst.msk [vmem:[%s4758_s26 + $0xc] sm:$0xf] %vm267_vm0, %v3188_v28  ;;  %v2588_v0 = vadd.f32 %v2587_v62, %v2586_v60  ;;  %v2645_v13 = vsel %vm934_vm6, %v2627_v4, 0.0 }
 0x288   : >> { %2571 = vst.msk [vmem:[%s4758_s26 + $0x4] sm:$0xf] %vm267_vm0, %v3186_v61  ;;  %v2641_v5 = vsel %vm934_vm6, %v2625_v63, 0.0 }
 0x289   : >> { %v2590_v6 = vadd.f32 %v2589_v1, %v2588_v0  ;;  %v2642_v7 = vadd.f32 %v2641_v5, %v2640_v2 }
 0x28b   : >> { %v2644_v11 = vadd.f32 %v2643_v8, %v2642_v7  ;;  %v2592_v12 = vadd.f32 %v2591_v9, %v2590_v6 }
 0x28d   : >> { %v2646_v16 = vadd.f32 %v2645_v13, %v2644_v11 }
 0x2a3   : >> { %v3232_v52 = vpop.f32.mrb[4].mxu0 }
 0x2a4   : >> { %v3191_v17 = vpack.c.bf16 %v3232_v52, %v3232_v52  ;;  %v2455_v19 = vpop.f32.mrb[5].mxu0  ;;  %v2630_v47 = vmul.f32 %v3232_v52, %v3232_v52  ;;  %v2597_v3 = vsel %vm934_vm6, %v3232_v52, 0.0 }
 0x2a5   : >> { %v3189_v20 = vpack.c.bf16 %v2455_v19, %v2455_v19  ;;  %v2593_v21 = vsel %vm934_vm6, %v2455_v19, 0.0  ;;  %v2628_v22 = vmul.f32 %v2455_v19, %v2455_v19  ;;  %v3233_v23 = vpop.f32.mrb[6].mxu0 }
 0x2a6   : >> { %2576 = vst.msk [vmem:[%s4758_s26 + $0x18] sm:$0xf] %vm267_vm0, %v3191_v17  ;;  %v2594_v53 = vadd.f32 %v2593_v21, %v2592_v12  ;;  %v3192_v24 = vpack.c.bf16 %v3233_v23, %v3233_v23  ;;  %v2458_v26 = vpop.f32.mrb[7].mxu0  ;;  %v2631_v32 = vmul.f32 %v3233_v23, %v3233_v23  ;;  %v2599_v51 = vsel %vm934_vm6, %v3233_v23, 0.0 }
 0x2a7   : >> { %2574 = vst.msk [vmem:[%s4758_s26 + $0x10] sm:$0xf] %vm267_vm0, %v3189_v20  ;;  %v2647_v27 = vsel %vm934_vm6, %v2628_v22, 0.0  ;;  %v3190_v29 = vpack.c.bf16 %v2458_v26, %v2458_v26  ;;  %v2595_v37 = vsel %vm934_vm6, %v2458_v26, 0.0  ;;  %v2629_v34 = vmul.f32 %v2458_v26, %v2458_v26 }
 0x2a8   : >> { %v2648_v30 = vadd.f32 %v2647_v27, %v2646_v16  ;;  %2577 = vst.msk [vmem:[%s4758_s26 + $0x1c] sm:$0xf] %vm267_vm0, %v3192_v24  ;;  %v2596_v31 = vadd.f32 %v2595_v37, %v2594_v53  ;;  %v2651_v43 = vsel %vm934_vm6, %v2630_v47, 0.0  ;;  %v2653_v56 = vsel %vm934_vm6, %v2631_v32, 0.0 }
 0x2a9   : >> { %2575 = vst.msk [vmem:[%s4758_s26 + $0x14] sm:$0xf] %vm267_vm0, %v3190_v29  ;;  %v2649_v59 = vsel %vm934_vm6, %v2629_v34, 0.0 }
 0x2aa   : >> { %v2598_v35 = vadd.f32 %v2597_v3, %v2596_v31  ;;  %v2650_v36 = vadd.f32 %v2649_v59, %v2648_v30 }
 0x2ac   : >> { %v2600_v25 = vadd.f32 %v2599_v51, %v2598_v35  ;;  %v2652_v55 = vadd.f32 %v2651_v43, %v2650_v36 }
 0x2ae   : >> { %v2654_v15 = vadd.f32 %v2653_v56, %v2652_v55 }
 0x2c4   : >> { %v3236_v48 = vpop.f32.mrb[0].mxu1 }
 0x2c5   : >> { %v3195_v42 = vpack.c.bf16 %v3236_v48, %v3236_v48  ;;  %v2471_v50 = vpop.f32.mrb[1].mxu1  ;;  %v2634_v1 = vmul.f32 %v3236_v48, %v3236_v48  ;;  %v2605_v6 = vsel %vm934_vm6, %v3236_v48, 0.0 }
 0x2c6   : >> { %v3193_v54 = vpack.c.bf16 %v2471_v50, %v2471_v50  ;;  %v2601_v58 = vsel %vm934_vm6, %v2471_v50, 0.0  ;;  %v2632_v57 = vmul.f32 %v2471_v50, %v2471_v50  ;;  %v3237_v28 = vpop.f32.mrb[2].mxu1 }
 0x2c7   : >> { %2580 = vst.msk [vmem:[%s4758_s26 + $0x28] sm:$0xf] %vm267_vm0, %v3195_v42  ;;  %v2602_v49 = vadd.f32 %v2601_v58, %v2600_v25  ;;  %v3196_v60 = vpack.c.bf16 %v3237_v28, %v3237_v28  ;;  %v2474_v61 = vpop.f32.mrb[3].mxu1  ;;  %v2635_v7 = vmul.f32 %v3237_v28, %v3237_v28  ;;  %v2607_v11 = vsel %vm934_vm6, %v3237_v28, 0.0 }
 0x2c8   : >> { %2578 = vst.msk [vmem:[%s4758_s26 + $0x20] sm:$0xf] %vm267_vm0, %v3193_v54  ;;  %v2655_v62 = vsel %vm934_vm6, %v2632_v57, 0.0  ;;  %v3194_v63 = vpack.c.bf16 %v2474_v61, %v2474_v61  ;;  %v2603_v0 = vsel %vm934_vm6, %v2474_v61, 0.0  ;;  %v2633_v5 = vmul.f32 %v2474_v61, %v2474_v61 }
 0x2c9   : >> { %v2656_v2 = vadd.f32 %v2655_v62, %v2654_v15  ;;  %2581 = vst.msk [vmem:[%s4758_s26 + $0x2c] sm:$0xf] %vm267_vm0, %v3196_v60  ;;  %v2604_v4 = vadd.f32 %v2603_v0, %v2602_v49  ;;  %v2659_v13 = vsel %vm934_vm6, %v2634_v1, 0.0  ;;  %v2661_v17 = vsel %vm934_vm6, %v2635_v7, 0.0 }
 0x2ca   : >> { %2579 = vst.msk [vmem:[%s4758_s26 + $0x24] sm:$0xf] %vm267_vm0, %v3194_v63  ;;  %v2657_v9 = vsel %vm934_vm6, %v2633_v5, 0.0 }
 0x2cb   : >> { %v2606_v8 = vadd.f32 %v2605_v6, %v2604_v4  ;;  %v2658_v12 = vadd.f32 %v2657_v9, %v2656_v2 }
 0x2cd   : >> { %v2608_v16 = vadd.f32 %v2607_v11, %v2606_v8  ;;  %v2660_v52 = vadd.f32 %v2659_v13, %v2658_v12 }
 0x2cf   : >> { %v2662_v19 = vadd.f32 %v2661_v17, %v2660_v52 }
 0x2e6   : >> { %v3240_v20 = vpop.f32.mrb[4].mxu1 }
 0x2e7   : >> { %v3199_v21 = vpack.c.bf16 %v3240_v20, %v3240_v20  ;;  %v2487_v22 = vpop.f32.mrb[5].mxu1  ;;  %v2638_v34 = vmul.f32 %v3240_v20, %v3240_v20  ;;  %v2613_v59 = vsel %vm934_vm6, %v3240_v20, 0.0 }
 0x2e8   : >> { %v3197_v23 = vpack.c.bf16 %v2487_v22, %v2487_v22  ;;  %v2609_v53 = vsel %vm934_vm6, %v2487_v22, 0.0  ;;  %v2636_v24 = vmul.f32 %v2487_v22, %v2487_v22  ;;  %v3241_v26 = vpop.f32.mrb[6].mxu1 }
 0x2e9   : >> { %2584 = vst.msk [vmem:[%s4758_s26 + $0x38] sm:$0xf] %vm267_vm0, %v3199_v21  ;;  %v2610_v27 = vadd.f32 %v2609_v53, %v2608_v16  ;;  %v3200_v29 = vpack.c.bf16 %v3241_v26, %v3241_v26  ;;  %v2490_v37 = vpop.f32.mrb[7].mxu1  ;;  %v2639_v51 = vmul.f32 %v3241_v26, %v3241_v26  ;;  %v2615_v25 = vsel %vm934_vm6, %v3241_v26, 0.0 }
 0x2ea   : >> { %2582 = vst.msk [vmem:[%s4758_s26 + $0x30] sm:$0xf] %vm267_vm0, %v3197_v23  ;;  %v2663_v47 = vsel %vm934_vm6, %v2636_v24, 0.0  ;;  %v3198_v30 = vpack.c.bf16 %v2490_v37, %v2490_v37  ;;  %v2611_v31 = vsel %vm934_vm6, %v2490_v37, 0.0  ;;  %v2637_v35 = vmul.f32 %v2490_v37, %v2490_v37 }
 0x2eb   : >> { %v2664_v3 = vadd.f32 %v2663_v47, %v2662_v19  ;;  %2585 = vst.msk [vmem:[%s4758_s26 + $0x3c] sm:$0xf] %vm267_vm0, %v3200_v29  ;;  %v2612_v32 = vadd.f32 %v2611_v31, %v2610_v27  ;;  %v2667_v56 = vsel %vm934_vm6, %v2638_v34, 0.0  ;;  %v2669_v42 = vsel %vm934_vm6, %v2639_v51, 0.0 }
 0x2ec   : >> { %2583 = vst.msk [vmem:[%s4758_s26 + $0x34] sm:$0xf] %vm267_vm0, %v3198_v30  ;;  %v2665_v43 = vsel %vm934_vm6, %v2637_v35, 0.0 }
 0x2ed   : >> { %v2614_v36 = vadd.f32 %v2613_v59, %v2612_v32  ;;  %v2666_v55 = vadd.f32 %v2665_v43, %v2664_v3 }
 0x2ef   : >> { %v2616_v15 = vadd.f32 %v2615_v25, %v2614_v36  ;;  %v2668_v48 = vadd.f32 %v2667_v56, %v2666_v55 }
 0x2f1   : >> { %v2617_v50 = vrot.slane %v2616_v15, 4  ;;  %v2670_v54 = vadd.f32 %v2669_v42, %v2668_v48 }
 0x2f3   : >> { %v2618_v58 = vadd.f32 %v2617_v50, %v2616_v15  ;;  %v2671_v57 = vrot.slane %v2670_v54, 4 }
 0x2f5   : >> { %v2619_v28 = vrot.slane %v2618_v58, 2  ;;  %v2672_v49 = vadd.f32 %v2671_v57, %v2670_v54 }
 0x2f7   : >> { %v2620_v60 = vadd.f32 %v2619_v28, %v2618_v58  ;;  %v2673_v61 = vrot.slane %v2672_v49, 2 }
 0x2f9   : >> { %v2621_v62 = vrot.slane %v2620_v60, 1  ;;  %v2674_v63 = vadd.f32 %v2673_v61, %v2672_v49 }
 0x2fb   : >> { %v2622_v0 = vadd.f32 %v2621_v62, %v2620_v60  ;;  %v2675_v1 = vrot.slane %v2674_v63, 1  ;;  %861 = sbr.rel (!%p859_p6) target bundleno = 253 (0xfd), region = 113 }
 0x2fd   : >> { %v2623_v2 = vadd.f32 %v3394_v38, %v2622_v0   ;;  %v2676_v4 = vadd.f32 %v2675_v1, %v2674_v63 }
 0x2ff   : >> { %v2677_v5 = vadd.f32 %v3390_v14, %v2676_v4   ;;  %v4866_v38 = vmov %v2623_v2  ;;  %2679 = vst.msk [vmem:[%s3817_s7] sm:$0x1] (%p859_p6), %vm272_vm1, %v2623_v2 }
 0x301   : >> { %v4865_v14 = vmov %v2677_v5  ;;  %2680 = vst.msk [vmem:[%s3817_s7 + $0x1] sm:$0x1] (%p859_p6), %vm272_vm1, %v2677_v5 }
 0x302 PF: > { %s15_s17 = sadd.s32 1, %s3382_s17   ;;  %s4867_s15 = smov %s3378_s16 }
 0x303   : > { %p12_p7 = scmp.ge.s32.totalorder %s15_s17, 4   ;;  %s4868_s16 = smov %s4870_s18 }
 0x305   :  { %14 = sbr.rel (!%p12_p7) target bundleno = 2 (0x2), region = 124 }

</bundles_post_ra>
